<compile_context>
chip_gen: v7x
topology: tpu7x:2x2x1
jax: 0.10.0
libtpu: 0.0.40
codegen_flags: <defaults>
</compile_context>

<pallas_src>
import math

import jax
import jax.numpy as jnp
from jax.experimental import pallas as pl
from jax.experimental.pallas import tpu as pltpu

L_IN = 128        # sequence length; x[:, 15, :] after 3x MaxPool(2) needs L/8 >= 16
C_IN = 3
K1 = 16           # stage-1 im2col depth: 3 taps * 3 channels = 9, zero-padded to 16
C1, C2, C3 = 512, 64, 32
H = 128           # LSTM hidden size
BN_EPS = 1e-5

L1 = L_IN // 2    # 64  pooled length after stage 1
L2 = L_IN // 4    # 32  pooled length after stage 2
L3 = L_IN // 8    # 16  pooled length after stage 3 (= LSTM "batch")


# -----------------------------------------------------------------------------
# Kernel helpers
# -----------------------------------------------------------------------------
def _act(y, b_ref, s_ref, t_ref):
    # conv bias + ReLU, then BatchNorm1d (inference, folded to scale/shift).
    # ReLU precedes BN (matching the torch forward); BN precedes MaxPool.
    return jnp.maximum(y + b_ref[...], 0.0) * s_ref[...] + t_ref[...]


def _shift_prev(z, period):
    """row r -> z[r-1], zeroed at the start of every `period`-row sample block."""
    zero = jnp.zeros((1, z.shape[1]), z.dtype)
    shifted = jnp.concatenate([zero, z[:-1, :]], axis=0)
    rows = jax.lax.broadcasted_iota(jnp.int32, (z.shape[0], 1), 0)
    return jnp.where((rows % period) != 0, shifted, 0.0)


def _shift_next(z, period):
    """row r -> z[r+1], zeroed at the end of every `period`-row sample block."""
    zero = jnp.zeros((1, z.shape[1]), z.dtype)
    shifted = jnp.concatenate([z[1:, :], zero], axis=0)
    rows = jax.lax.broadcasted_iota(jnp.int32, (z.shape[0], 1), 0)
    return jnp.where((rows % period) != (period - 1), shifted, 0.0)


def _conv_pool_stage(x_split_bf, w_ref, b_ref, s_ref, t_ref, half_rows, period, c_out):
    """Conv1d(k=3, pad=1) + ReLU + BN + MaxPool(2), batch-folded over all samples.

    x_split_bf : (2*half_rows, Cin) bf16, laid out as
                 [even-position block ; odd-position block]; each block is
                 sample-major with `period` rows per sample.
    w_ref      : (Cin, 3*c_out) bf16 tap-stacked weights [w0 | w1 | w2].
    Returns (half_rows, c_out) f32 pooled output, sample-major, natural order.
    """
    z = jnp.dot(x_split_bf, w_ref[...], preferred_element_type=jnp.float32)
    ze, zo = z[0:half_rows, :], z[half_rows:2 * half_rows, :]
    ze0, ze1, ze2 = ze[:, 0:c_out], ze[:, c_out:2 * c_out], ze[:, 2 * c_out:3 * c_out]
    zo0, zo1, zo2 = zo[:, 0:c_out], zo[:, c_out:2 * c_out], zo[:, 2 * c_out:3 * c_out]
    # conv at even output position 2r:  w0*x[2r-1] + w1*x[2r]   + w2*x[2r+1]
    # conv at odd  output position 2r+1: w0*x[2r]  + w1*x[2r+1] + w2*x[2r+2]
    conv_e = _shift_prev(zo0, period) + ze1 + zo2
    conv_o = ze0 + zo1 + _shift_next(ze2, period)
    # MaxPool(2) is an elementwise max of the two parities.
    return jnp.maximum(_act(conv_e, b_ref, s_ref, t_ref),
                       _act(conv_o, b_ref, s_ref, t_ref))


def _lstm_layer(x_all, wih_ref, whh_ref, bb_ref, n_steps):
    """One LSTM layer; x_all is the (n_steps*L3, in) step-major slab.

    Input projections for ALL timesteps are one batch-folded matmul; only the
    h @ Whh matmul stays on the serial recurrence path.
    """
    gx = jnp.dot(x_all.astype(jnp.bfloat16), wih_ref[...],
                 preferred_element_type=jnp.float32) + bb_ref[...]
    whh = whh_ref[...]

    def cell(g, c_prev):
        sig = jax.nn.sigmoid(g[:, 0:3 * H])               # gates packed (i, f, o | g)
        i, f, o = sig[:, 0:H], sig[:, H:2 * H], sig[:, 2 * H:3 * H]
        c = f * c_prev + i * jnp.tanh(g[:, 3 * H:4 * H])
        return o * jnp.tanh(c), c

    # t = 0: h0 = c0 = 0, so the Whh matmul vanishes.
    h, c = cell(gx[0:L3, :], jnp.zeros((L3, H), jnp.float32))
    outs = [h]
    # TODO(synk): for large n_steps switch to lax.fori_loop with VMEM-resident gx/seq.
    for t in range(1, n_steps):
        g = gx[t * L3:(t + 1) * L3, :] + jnp.dot(
            h.astype(jnp.bfloat16), whh, preferred_element_type=jnp.float32)
        h, c = cell(g, c)
        outs.append(h)
    return jnp.concatenate(outs, axis=0)                   # (n_steps*L3, H)


# -----------------------------------------------------------------------------
# Fused kernel
# -----------------------------------------------------------------------------
def alone_merged_kernel(im_ref,
                        w1_ref, b1_ref, s1_ref, t1_ref,
                        w2_ref, b2_ref, s2_ref, t2_ref,
                        w3_ref, b3_ref, s3_ref, t3_ref,
                        wih1_ref, whh1_ref, bb1_ref,
                        wih2_ref, whh2_ref, bb2_ref,
                        wih3_ref, whh3_ref, bb3_ref,
                        out_ref,
                        h2_scr):
    n = out_ref.shape[0]          # PyTorch batch == LSTM time axis (batch_first=False)
    m1 = n * L1                   # rows per stage-1 parity half

    # ---- Stage 1: one parity-stacked im2col matmul (batch folded into M);
    # MaxPool(2) = max of the halves.  The wrapper's row ordering makes the
    # result already split into the [even ; odd] position blocks stage 2 needs.
    y1 = jnp.dot(im_ref[...], w1_ref[...], preferred_element_type=jnp.float32)
    y1 = _act(y1, b1_ref, s1_ref, t1_ref)
    h1 = jnp.maximum(y1[0:m1, :], y1[m1:2 * m1, :])        # (n*64, 512) [E2 ; O2]

    # ---- Stage 2: batch-folded (one matmul, M = n*64, K = 512, Nout = 192) ----
    h2 = _conv_pool_stage(h1.astype(jnp.bfloat16), w2_ref, b2_ref, s2_ref, t2_ref,
                          half_rows=n * L2, period=L2, c_out=C2)   # (n*32, 64)

    # One deinterleave (2 strided reads of a tiny scratch) to build the
    # [even ; odd] split for stage 3.
    h2_scr[...] = h2
    e3 = h2_scr[pl.ds(0, n * L3, stride=2), :]
    o3 = h2_scr[pl.ds(1, n * L3, stride=2), :]
    h2_split = jnp.concatenate([e3, o3], axis=0)           # (n*32, 64)

    # ---- Stage 3: batch-folded (one matmul, M = n*32, K = 64, Nout = 96) ----
    h3 = _conv_pool_stage(h2_split.astype(jnp.bfloat16), w3_ref, b3_ref, s3_ref, t3_ref,
                          half_rows=n * L3, period=L3, c_out=C3)   # (n*16, 32)

    # ---- 3 stacked LSTMs (Dropout = identity in eval) ----
    seq = _lstm_layer(h3, wih1_ref, whh1_ref, bb1_ref, n)
    seq = _lstm_layer(seq, wih2_ref, whh2_ref, bb2_ref, n)
    seq = _lstm_layer(seq, wih3_ref, whh3_ref, bb3_ref, n)

    # torch: x[:, 15, :] on the (T=n, B=16, H) output; one lane-dense (n, H) store.
    out_ref[...] = jnp.concatenate(
        [seq[t * L3 + (L3 - 1):t * L3 + L3, :] for t in range(n)], axis=0)


def _vmem_limit_bytes(n):
    # Rough footprint (params + activations + LSTM gx/seq slabs) with 2x headroom,
    # clamped to stay inside every generation's VMEM (v7x: 64 MiB physical).
    weights = (K1 * C1 + C1 * 3 * C2 + C2 * 3 * C3
               + (C3 + H) * 4 * H + 2 * (2 * H) * 4 * H) * 2 \
              + 8 * (C1 + C2 + C3 + 4 * H) * 4
    acts = n * (2 * L1 * K1 * 2            # im2col slab (bf16)
                + 2 * L1 * C1 * 4          # y1
                + L1 * C1 * (4 + 2)        # h1 (f32 + bf16 copy)
                + L1 * 3 * C2 * 4          # z2
                + 6 * L2 * C2 * 4          # conv_e/o, h2, scratch, split (+ slack)
                + L2 * 3 * C3 * 4          # z3
                + 6 * L3 * C3 * 4
                + 3 * L3 * 4 * H * 4       # gx slabs
                + 4 * L3 * H * 4)          # seq slabs
    est = weights + acts + (2 << 20)
    return int(min(48 * 2 ** 20, max(16 * 2 ** 20, 2 * est)))


def _fused_call(im_stacked, kp, n):
    vmem = pl.BlockSpec(memory_space=pltpu.MemorySpace.VMEM)
    # TODO(synk): for large N on v7x, split the (fully parallel) conv front-end into
    # its own pallas_call with a sample grid + dimension_semantics=("parallel",).
    return pl.pallas_call(
        alone_merged_kernel,
        in_specs=[vmem] * 22,
        out_specs=vmem,
        out_shape=jax.ShapeDtypeStruct((n, H), jnp.float32),
        scratch_shapes=[pltpu.VMEM((n * L2, C2), jnp.float32)],   # stage-2->3 deinterleave
        compiler_params=pltpu.CompilerParams(vmem_limit_bytes=_vmem_limit_bytes(n)),
    )(im_stacked,
      kp["w1"], kp["b1"], kp["s1"], kp["t1"],
      kp["w2"], kp["b2"], kp["s2"], kp["t2"],
      kp["w3"], kp["b3"], kp["s3"], kp["t3"],
      kp["wih1"], kp["whh1"], kp["bb1"],
      kp["wih2"], kp["whh2"], kp["bb2"],
      kp["wih3"], kp["whh3"], kp["bb3"])


# -----------------------------------------------------------------------------
# Parameters (deterministic synthetic init, PyTorch-style fan-in uniform)
# -----------------------------------------------------------------------------
def init_params(key):
    ks = jax.random.split(key, 16)

    def uniform(k, shape, fan_in):
        b = 1.0 / math.sqrt(fan_in)
        return jax.random.uniform(k, shape, jnp.float32, -b, b)

    p = {}
    p["w1_taps"] = uniform(ks[0], (3, C_IN, C1), C_IN * 3)    # (tap, cin, cout)
    p["b1"] = uniform(ks[1], (1, C1), C_IN * 3)
    p["w2_taps"] = uniform(ks[2], (3, C1, C2), C1 * 3)
    p["b2"] = uniform(ks[3], (1, C2), C1 * 3)
    p["w3_taps"] = uniform(ks[4], (3, C2, C3), C2 * 3)
    p["b3"] = uniform(ks[5], (1, C3), C2 * 3)

    # BatchNorm1d (inference): scale = gamma / sqrt(var + eps), shift = beta - mean*scale
    def bn(kg, kb, c):
        gamma = 1.0 + 0.1 * jax.random.normal(kg, (1, c), jnp.float32)
        beta = 0.1 * jax.random.normal(kb, (1, c), jnp.float32)
        mean = jnp.zeros((1, c), jnp.float32)
        var = jnp.ones((1, c), jnp.float32)
        scale = gamma / jnp.sqrt(var + BN_EPS)
        return scale, beta - mean * scale

    p["s1"], p["t1"] = bn(ks[6], ks[7], C1)
    p["s2"], p["t2"] = bn(ks[8], ks[9], C2)
    p["s3"], p["t3"] = bn(ks[10], ks[11], C3)

    # LSTM weights stored transposed vs torch; gate columns packed (i, f, o, g);
    # the two biases are pre-summed.
    def lstm_params(k, in_dim):
        k1, k2, k3, k4 = jax.random.split(k, 4)
        b = 1.0 / math.sqrt(H)
        wih = jax.random.uniform(k1, (in_dim, 4 * H), jnp.float32, -b, b)
        whh = jax.random.uniform(k2, (H, 4 * H), jnp.float32, -b, b)
        bih = jax.random.uniform(k3, (1, 4 * H), jnp.float32, -b, b)
        bhh = jax.random.uniform(k4, (1, 4 * H), jnp.float32, -b, b)
        return wih, whh, bih + bhh

    p["wih1"], p["whh1"], p["bb1"] = lstm_params(ks[12], C3)
    p["wih2"], p["whh2"], p["bb2"] = lstm_params(ks[13], H)
    p["wih3"], p["whh3"], p["bb3"] = lstm_params(ks[14], H)
    return p


def prepare_kernel_params(p):
    """Kernel-side layouts: tap-stacked conv weights; matmul operands in bf16."""
    bf = jnp.bfloat16
    kp = {}
    w1 = p["w1_taps"].reshape(3 * C_IN, C1)                   # rows tap-major, channel-minor
    kp["w1"] = jnp.pad(w1, ((0, K1 - 3 * C_IN), (0, 0))).astype(bf)        # (16, 512)
    kp["w2"] = jnp.concatenate([p["w2_taps"][s] for s in range(3)], axis=1).astype(bf)  # (512,192)
    kp["w3"] = jnp.concatenate([p["w3_taps"][s] for s in range(3)], axis=1).astype(bf)  # (64, 96)
    for i in (1, 2, 3):
        kp[f"b{i}"] = p[f"b{i}"]
        kp[f"s{i}"] = p[f"s{i}"]
        kp[f"t{i}"] = p[f"t{i}"]
        kp[f"wih{i}"] = p[f"wih{i}"].astype(bf)
        kp[f"whh{i}"] = p[f"whh{i}"].astype(bf)
        kp[f"bb{i}"] = p[f"bb{i}"]
    return kp


# -----------------------------------------------------------------------------
# Forward pass: wrapper builds the parity-stacked stage-1 im2col (layout
# plumbing only), the fused kernel does everything else.
# -----------------------------------------------------------------------------
@jax.jit
def alone_merged_forward(x_ncl, kernel_params):
    # x_ncl: (N, 3, L) float32 -- PyTorch nn.Conv1d NCL layout.
    n, c, l = x_ncl.shape
    assert c == C_IN and l == L_IN, "fixed-shape kernel: expects (N, 3, 128)"
    x = jnp.transpose(x_ncl, (0, 2, 1))                        # (N, L, 3) channels-last
    xp = jnp.pad(x, ((0, 0), (1, 1), (0, 0)))                  # Conv1d padding=1
    # im2col row p = [xpad[p], xpad[p+1], xpad[p+2]] (3 taps x 3 channels), padded to K1.
    im = jnp.concatenate([xp[:, 0:l, :], xp[:, 1:l + 1, :], xp[:, 2:l + 2, :]], axis=-1)
    im = jnp.pad(im, ((0, 0), (0, 0), (0, K1 - 3 * c)))        # (N, L, K1)
    # Row ordering: stage-1 pool-even half then pool-odd half (so MaxPool is a
    # max of halves), and within each half the stage-2-even positions then the
    # stage-2-odd positions (so the pooled result is already deinterleaved).
    blocks = [im[:, 0::4, :], im[:, 2::4, :],    # pool-even half: q even, q odd
              im[:, 1::4, :], im[:, 3::4, :]]    # pool-odd  half: q even, q odd
    im_stacked = jnp.concatenate([b.reshape(n * (l // 4), K1) for b in blocks], axis=0)
    im_stacked = im_stacked.astype(jnp.bfloat16)               # (2*N*64, 16)
    return _fused_call(im_stacked, kernel_params, n)


# -----------------------------------------------------------------------------
# Pure-JAX f32 reference (same eval-mode math) for validation
# -----------------------------------------------------------------------------
def reference_forward(x_ncl, p):
    def conv_stage(h, w_taps, b, s, t):            # h: (N, L, Cin)
        L = h.shape[1]
        hp = jnp.pad(h, ((0, 0), (1, 1), (0, 0)))
        y = sum(jnp.einsum("nlc,cd->nld", hp[:, k:k + L, :], w_taps[k]) for k in range(3))
        y = jnp.maximum(y + b, 0.0) * s + t
        return jnp.maximum(y[:, 0::2, :], y[:, 1::2, :])

    x = jnp.transpose(x_ncl, (0, 2, 1))
    h = conv_stage(x, p["w1_taps"], p["b1"], p["s1"], p["t1"])
    h = conv_stage(h, p["w2_taps"], p["b2"], p["s2"], p["t2"])
    h = conv_stage(h, p["w3_taps"], p["b3"], p["s3"], p["t3"])   # (N, 16, 32)

    def lstm(xs, wih, whh, bb):                    # xs: (T=N, B=16, in)
        hT = jnp.zeros((xs.shape[1], H), jnp.float32)
        cT = jnp.zeros((xs.shape[1], H), jnp.float32)
        outs = []
        for t in range(xs.shape[0]):
            g = xs[t] @ wih + hT @ whh + bb
            i = jax.nn.sigmoid(g[:, 0:H])
            f = jax.nn.sigmoid(g[:, H:2 * H])
            o = jax.nn.sigmoid(g[:, 2 * H:3 * H])
            gg = jnp.tanh(g[:, 3 * H:4 * H])
            cT = f * cT + i * gg
            hT = o * jnp.tanh(cT)
            outs.append(hT)
        return jnp.stack(outs, axis=0)

    seq = lstm(h, p["wih1"], p["whh1"], p["bb1"])
    seq = lstm(seq, p["wih2"], p["whh2"], p["bb2"])
    seq = lstm(seq, p["wih3"], p["whh3"], p["bb3"])
    return seq[:, L3 - 1, :]


if __name__ == "__main__":
    key = jax.random.PRNGKey(0)
    k_x, k_p = jax.random.split(key)
    n = 2
    x = jax.random.normal(k_x, (n, C_IN, L_IN), jnp.float32)   # PyTorch NCL layout
    params = init_params(k_p)
    kparams = prepare_kernel_params(params)

    out = alone_merged_forward(x, kparams)
    out = jax.block_until_ready(out)
    assert out.shape == (n, H) and out.dtype == jnp.float32

    ref = reference_forward(x, params)
    err = float(jnp.max(jnp.abs(out - ref)))
    assert err < 3e-2, f"kernel/reference mismatch: max abs err {err}"
    print("KERNEL_OK")
</pallas_src>

<mosaic_0001>
module attributes {stable_mosaic.version = 11 : i64} {
  func.func @alone_merged_kernel(%arg0: memref<256x16xbf16, #tpu.memory_space<vmem>>, %arg1: memref<16x512xbf16, #tpu.memory_space<vmem>>, %arg2: memref<1x512xf32, #tpu.memory_space<vmem>>, %arg3: memref<1x512xf32, #tpu.memory_space<vmem>>, %arg4: memref<1x512xf32, #tpu.memory_space<vmem>>, %arg5: memref<512x192xbf16, #tpu.memory_space<vmem>>, %arg6: memref<1x64xf32, #tpu.memory_space<vmem>>, %arg7: memref<1x64xf32, #tpu.memory_space<vmem>>, %arg8: memref<1x64xf32, #tpu.memory_space<vmem>>, %arg9: memref<64x96xbf16, #tpu.memory_space<vmem>>, %arg10: memref<1x32xf32, #tpu.memory_space<vmem>>, %arg11: memref<1x32xf32, #tpu.memory_space<vmem>>, %arg12: memref<1x32xf32, #tpu.memory_space<vmem>>, %arg13: memref<32x512xbf16, #tpu.memory_space<vmem>>, %arg14: memref<128x512xbf16, #tpu.memory_space<vmem>>, %arg15: memref<1x512xf32, #tpu.memory_space<vmem>>, %arg16: memref<128x512xbf16, #tpu.memory_space<vmem>>, %arg17: memref<128x512xbf16, #tpu.memory_space<vmem>>, %arg18: memref<1x512xf32, #tpu.memory_space<vmem>>, %arg19: memref<128x512xbf16, #tpu.memory_space<vmem>>, %arg20: memref<128x512xbf16, #tpu.memory_space<vmem>>, %arg21: memref<1x512xf32, #tpu.memory_space<vmem>>, %arg22: memref<2x128xf32, #tpu.memory_space<vmem>>, %arg23: memref<64x64xf32, #tpu.memory_space<vmem>>) attributes {dimension_semantics = [], scalar_prefetch = 0 : i64, scratch_operands = 1 : i64, tpu.core_type = #tpu.core_type<tc>} {
    %c0 = arith.constant 0 : index
    %c0_0 = arith.constant 0 : index
    %0 = vector.load %arg0[%c0, %c0_0] : memref<256x16xbf16, #tpu.memory_space<vmem>>, vector<256x16xbf16>
    %c0_1 = arith.constant 0 : index
    %c0_2 = arith.constant 0 : index
    %1 = vector.load %arg1[%c0_1, %c0_2] : memref<16x512xbf16, #tpu.memory_space<vmem>>, vector<16x512xbf16>
    %cst = arith.constant dense<0.000000e+00> : vector<256x512xf32>
    %2 = tpu.matmul %0, %1, %cst {dimension_numbers = #tpu.dot_dimension_numbers<[1], [0], [0], [1], [0, 0, 1, 1], [], []>} : vector<256x16xbf16>, vector<16x512xbf16>, vector<256x512xf32> -> vector<256x512xf32>
    %c0_3 = arith.constant 0 : index
    %c0_4 = arith.constant 0 : index
    %3 = vector.load %arg2[%c0_3, %c0_4] : memref<1x512xf32, #tpu.memory_space<vmem>>, vector<1x512xf32>
    %4 = vector.broadcast %3 : vector<1x512xf32> to vector<256x512xf32>
    %5 = arith.addf %2, %4 : vector<256x512xf32>
    %cst_5 = arith.constant 0.000000e+00 : f32
    %6 = vector.broadcast %cst_5 : f32 to vector<256x512xf32>
    %7 = arith.maximumf %5, %6 : vector<256x512xf32>
    %c0_6 = arith.constant 0 : index
    %c0_7 = arith.constant 0 : index
    %8 = vector.load %arg3[%c0_6, %c0_7] : memref<1x512xf32, #tpu.memory_space<vmem>>, vector<1x512xf32>
    %9 = vector.broadcast %8 : vector<1x512xf32> to vector<256x512xf32>
    %10 = arith.mulf %7, %9 : vector<256x512xf32>
    %c0_8 = arith.constant 0 : index
    %c0_9 = arith.constant 0 : index
    %11 = vector.load %arg4[%c0_8, %c0_9] : memref<1x512xf32, #tpu.memory_space<vmem>>, vector<1x512xf32>
    %12 = vector.broadcast %11 : vector<1x512xf32> to vector<256x512xf32>
    %13 = arith.addf %10, %12 : vector<256x512xf32>
    %14 = vector.extract_strided_slice %13 {offsets = [0, 0], sizes = [128, 512], strides = [1, 1]} : vector<256x512xf32> to vector<128x512xf32>
    %15 = vector.extract_strided_slice %13 {offsets = [128, 0], sizes = [128, 512], strides = [1, 1]} : vector<256x512xf32> to vector<128x512xf32>
    %16 = arith.maximumf %14, %15 : vector<128x512xf32>
    %17 = arith.truncf %16 : vector<128x512xf32> to vector<128x512xbf16>
    %c0_10 = arith.constant 0 : index
    %c0_11 = arith.constant 0 : index
    %18 = vector.load %arg5[%c0_10, %c0_11] : memref<512x192xbf16, #tpu.memory_space<vmem>>, vector<512x192xbf16>
    %cst_12 = arith.constant dense<0.000000e+00> : vector<128x192xf32>
    %19 = tpu.matmul %17, %18, %cst_12 {dimension_numbers = #tpu.dot_dimension_numbers<[1], [0], [0], [1], [0, 0, 1, 1], [], []>} : vector<128x512xbf16>, vector<512x192xbf16>, vector<128x192xf32> -> vector<128x192xf32>
    %20 = vector.extract_strided_slice %19 {offsets = [0, 0], sizes = [64, 192], strides = [1, 1]} : vector<128x192xf32> to vector<64x192xf32>
    %21 = vector.extract_strided_slice %19 {offsets = [64, 0], sizes = [64, 192], strides = [1, 1]} : vector<128x192xf32> to vector<64x192xf32>
    %22 = vector.extract_strided_slice %20 {offsets = [0, 0], sizes = [64, 64], strides = [1, 1]} : vector<64x192xf32> to vector<64x64xf32>
    %23 = vector.extract_strided_slice %20 {offsets = [0, 64], sizes = [64, 64], strides = [1, 1]} : vector<64x192xf32> to vector<64x64xf32>
    %24 = vector.extract_strided_slice %20 {offsets = [0, 128], sizes = [64, 64], strides = [1, 1]} : vector<64x192xf32> to vector<64x64xf32>
    %25 = vector.extract_strided_slice %21 {offsets = [0, 0], sizes = [64, 64], strides = [1, 1]} : vector<64x192xf32> to vector<64x64xf32>
    %26 = vector.extract_strided_slice %21 {offsets = [0, 64], sizes = [64, 64], strides = [1, 1]} : vector<64x192xf32> to vector<64x64xf32>
    %27 = vector.extract_strided_slice %21 {offsets = [0, 128], sizes = [64, 64], strides = [1, 1]} : vector<64x192xf32> to vector<64x64xf32>
    %cst_13 = arith.constant 0.000000e+00 : f32
    %28 = vector.broadcast %cst_13 : f32 to vector<1x64xf32>
    %29 = vector.extract_strided_slice %25 {offsets = [0, 0], sizes = [63, 64], strides = [1, 1]} : vector<64x64xf32> to vector<63x64xf32>
    %30 = tpu.concatenate %28, %29 in 0 : vector<1x64xf32>, vector<63x64xf32> -> vector<64x64xf32>
    %31 = tpu.iota {dimensions = array<i32: 0>} : vector<64x1xi32>
    %c32_i32 = arith.constant 32 : i32
    %c0_i32 = arith.constant 0 : i32
    %32 = arith.cmpi eq, %c32_i32, %c0_i32 : i32
    %c1_i32 = arith.constant 1 : i32
    %33 = arith.select %32, %c1_i32, %c32_i32 : i32
    %34 = vector.broadcast %33 : i32 to vector<64x1xi32>
    %35 = arith.remsi %31, %34 : vector<64x1xi32>
    %c0_i32_14 = arith.constant 0 : i32
    %36 = vector.broadcast %c0_i32_14 : i32 to vector<64x1xi32>
    %37 = arith.cmpi ne, %35, %36 : vector<64x1xi32>
    %c0_i32_15 = arith.constant 0 : i32
    %38 = vector.broadcast %c0_i32_15 : i32 to vector<64x1xi32>
    %39 = arith.cmpi slt, %35, %38 : vector<64x1xi32>
    %c0_i32_16 = arith.constant 0 : i32
    %40 = arith.cmpi slt, %33, %c0_i32_16 : i32
    %41 = vector.broadcast %40 : i1 to vector<64x1xi1>
    %42 = vector.broadcast %41 : vector<64x1xi1> to vector<64x1xi1>
    %43 = arith.xori %39, %42 : vector<64x1xi1>
    %44 = arith.andi %43, %37 : vector<64x1xi1>
    %45 = vector.broadcast %33 : i32 to vector<64x1xi32>
    %46 = arith.addi %35, %45 : vector<64x1xi32>
    %47 = arith.select %44, %46, %35 : vector<64x1xi1>, vector<64x1xi32>
    %c0_i32_17 = arith.constant 0 : i32
    %48 = vector.broadcast %c0_i32_17 : i32 to vector<64x1xi32>
    %49 = arith.cmpi ne, %47, %48 : vector<64x1xi32>
    %cst_18 = arith.constant 0.000000e+00 : f32
    %50 = vector.shape_cast %49 : vector<64x1xi1> to vector<64x1xi1>
    %51 = vector.broadcast %50 : vector<64x1xi1> to vector<64x64xi1>
    %52 = vector.broadcast %cst_18 : f32 to vector<64x64xf32>
    %53 = arith.select %51, %30, %52 : vector<64x64xi1>, vector<64x64xf32>
    %54 = arith.addf %53, %23 : vector<64x64xf32>
    %55 = arith.addf %54, %27 : vector<64x64xf32>
    %56 = arith.addf %22, %26 : vector<64x64xf32>
    %cst_19 = arith.constant 0.000000e+00 : f32
    %57 = vector.broadcast %cst_19 : f32 to vector<1x64xf32>
    %58 = vector.extract_strided_slice %24 {offsets = [1, 0], sizes = [63, 64], strides = [1, 1]} : vector<64x64xf32> to vector<63x64xf32>
    %59 = tpu.concatenate %58, %57 in 0 : vector<63x64xf32>, vector<1x64xf32> -> vector<64x64xf32>
    %60 = tpu.iota {dimensions = array<i32: 0>} : vector<64x1xi32>
    %c32_i32_20 = arith.constant 32 : i32
    %c0_i32_21 = arith.constant 0 : i32
    %61 = arith.cmpi eq, %c32_i32_20, %c0_i32_21 : i32
    %c1_i32_22 = arith.constant 1 : i32
    %62 = arith.select %61, %c1_i32_22, %c32_i32_20 : i32
    %63 = vector.broadcast %62 : i32 to vector<64x1xi32>
    %64 = arith.remsi %60, %63 : vector<64x1xi32>
    %c0_i32_23 = arith.constant 0 : i32
    %65 = vector.broadcast %c0_i32_23 : i32 to vector<64x1xi32>
    %66 = arith.cmpi ne, %64, %65 : vector<64x1xi32>
    %c0_i32_24 = arith.constant 0 : i32
    %67 = vector.broadcast %c0_i32_24 : i32 to vector<64x1xi32>
    %68 = arith.cmpi slt, %64, %67 : vector<64x1xi32>
    %c0_i32_25 = arith.constant 0 : i32
    %69 = arith.cmpi slt, %62, %c0_i32_25 : i32
    %70 = vector.broadcast %69 : i1 to vector<64x1xi1>
    %71 = vector.broadcast %70 : vector<64x1xi1> to vector<64x1xi1>
    %72 = arith.xori %68, %71 : vector<64x1xi1>
    %73 = arith.andi %72, %66 : vector<64x1xi1>
    %74 = vector.broadcast %62 : i32 to vector<64x1xi32>
    %75 = arith.addi %64, %74 : vector<64x1xi32>
    %76 = arith.select %73, %75, %64 : vector<64x1xi1>, vector<64x1xi32>
    %c31_i32 = arith.constant 31 : i32
    %77 = vector.broadcast %c31_i32 : i32 to vector<64x1xi32>
    %78 = arith.cmpi ne, %76, %77 : vector<64x1xi32>
    %cst_26 = arith.constant 0.000000e+00 : f32
    %79 = vector.shape_cast %78 : vector<64x1xi1> to vector<64x1xi1>
    %80 = vector.broadcast %79 : vector<64x1xi1> to vector<64x64xi1>
    %81 = vector.broadcast %cst_26 : f32 to vector<64x64xf32>
    %82 = arith.select %80, %59, %81 : vector<64x64xi1>, vector<64x64xf32>
    %83 = arith.addf %56, %82 : vector<64x64xf32>
    %c0_27 = arith.constant 0 : index
    %c0_28 = arith.constant 0 : index
    %84 = vector.load %arg6[%c0_27, %c0_28] : memref<1x64xf32, #tpu.memory_space<vmem>>, vector<1x64xf32>
    %85 = vector.broadcast %84 : vector<1x64xf32> to vector<64x64xf32>
    %86 = arith.addf %55, %85 : vector<64x64xf32>
    %cst_29 = arith.constant 0.000000e+00 : f32
    %87 = vector.broadcast %cst_29 : f32 to vector<64x64xf32>
    %88 = arith.maximumf %86, %87 : vector<64x64xf32>
    %c0_30 = arith.constant 0 : index
    %c0_31 = arith.constant 0 : index
    %89 = vector.load %arg7[%c0_30, %c0_31] : memref<1x64xf32, #tpu.memory_space<vmem>>, vector<1x64xf32>
    %90 = vector.broadcast %89 : vector<1x64xf32> to vector<64x64xf32>
    %91 = arith.mulf %88, %90 : vector<64x64xf32>
    %c0_32 = arith.constant 0 : index
    %c0_33 = arith.constant 0 : index
    %92 = vector.load %arg8[%c0_32, %c0_33] : memref<1x64xf32, #tpu.memory_space<vmem>>, vector<1x64xf32>
    %93 = vector.broadcast %92 : vector<1x64xf32> to vector<64x64xf32>
    %94 = arith.addf %91, %93 : vector<64x64xf32>
    %c0_34 = arith.constant 0 : index
    %c0_35 = arith.constant 0 : index
    %95 = vector.load %arg6[%c0_34, %c0_35] : memref<1x64xf32, #tpu.memory_space<vmem>>, vector<1x64xf32>
    %96 = vector.broadcast %95 : vector<1x64xf32> to vector<64x64xf32>
    %97 = arith.addf %83, %96 : vector<64x64xf32>
    %cst_36 = arith.constant 0.000000e+00 : f32
    %98 = vector.broadcast %cst_36 : f32 to vector<64x64xf32>
    %99 = arith.maximumf %97, %98 : vector<64x64xf32>
    %c0_37 = arith.constant 0 : index
    %c0_38 = arith.constant 0 : index
    %100 = vector.load %arg7[%c0_37, %c0_38] : memref<1x64xf32, #tpu.memory_space<vmem>>, vector<1x64xf32>
    %101 = vector.broadcast %100 : vector<1x64xf32> to vector<64x64xf32>
    %102 = arith.mulf %99, %101 : vector<64x64xf32>
    %c0_39 = arith.constant 0 : index
    %c0_40 = arith.constant 0 : index
    %103 = vector.load %arg8[%c0_39, %c0_40] : memref<1x64xf32, #tpu.memory_space<vmem>>, vector<1x64xf32>
    %104 = vector.broadcast %103 : vector<1x64xf32> to vector<64x64xf32>
    %105 = arith.addf %102, %104 : vector<64x64xf32>
    %106 = arith.maximumf %94, %105 : vector<64x64xf32>
    %c0_41 = arith.constant 0 : index
    %c0_42 = arith.constant 0 : index
    %107 = vector.load %arg23[%c0_41, %c0_42] : memref<64x64xf32, #tpu.memory_space<vmem>>, vector<64x64xf32>
    tpu.vector_store %arg23[%c0_41, %c0_42], %106 {strides = array<i32>} : memref<64x64xf32, #tpu.memory_space<vmem>>, vector<64x64xf32>,
    %c0_43 = arith.constant 0 : index
    %c0_44 = arith.constant 0 : index
    %108 = tpu.strided_load %arg23[%c0_43, %c0_44] {strides = array<i32: 2, 1>} : memref<64x64xf32, #tpu.memory_space<vmem>>, vector<32x64xf32>
    %c1 = arith.constant 1 : index
    %c0_45 = arith.constant 0 : index
    %109 = tpu.strided_load %arg23[%c1, %c0_45] {strides = array<i32: 2, 1>} : memref<64x64xf32, #tpu.memory_space<vmem>>, vector<32x64xf32>
    %110 = tpu.concatenate %108, %109 in 0 : vector<32x64xf32>, vector<32x64xf32> -> vector<64x64xf32>
    %111 = arith.truncf %110 : vector<64x64xf32> to vector<64x64xbf16>
    %c0_46 = arith.constant 0 : index
    %c0_47 = arith.constant 0 : index
    %112 = vector.load %arg9[%c0_46, %c0_47] : memref<64x96xbf16, #tpu.memory_space<vmem>>, vector<64x96xbf16>
    %cst_48 = arith.constant dense<0.000000e+00> : vector<64x96xf32>
    %113 = tpu.matmul %111, %112, %cst_48 {dimension_numbers = #tpu.dot_dimension_numbers<[1], [0], [0], [1], [0, 0, 1, 1], [], []>} : vector<64x64xbf16>, vector<64x96xbf16>, vector<64x96xf32> -> vector<64x96xf32>
    %114 = vector.extract_strided_slice %113 {offsets = [0, 0], sizes = [32, 96], strides = [1, 1]} : vector<64x96xf32> to vector<32x96xf32>
    %115 = vector.extract_strided_slice %113 {offsets = [32, 0], sizes = [32, 96], strides = [1, 1]} : vector<64x96xf32> to vector<32x96xf32>
    %116 = vector.extract_strided_slice %114 {offsets = [0, 0], sizes = [32, 32], strides = [1, 1]} : vector<32x96xf32> to vector<32x32xf32>
    %117 = vector.extract_strided_slice %114 {offsets = [0, 32], sizes = [32, 32], strides = [1, 1]} : vector<32x96xf32> to vector<32x32xf32>
    %118 = vector.extract_strided_slice %114 {offsets = [0, 64], sizes = [32, 32], strides = [1, 1]} : vector<32x96xf32> to vector<32x32xf32>
    %119 = vector.extract_strided_slice %115 {offsets = [0, 0], sizes = [32, 32], strides = [1, 1]} : vector<32x96xf32> to vector<32x32xf32>
    %120 = vector.extract_strided_slice %115 {offsets = [0, 32], sizes = [32, 32], strides = [1, 1]} : vector<32x96xf32> to vector<32x32xf32>
    %121 = vector.extract_strided_slice %115 {offsets = [0, 64], sizes = [32, 32], strides = [1, 1]} : vector<32x96xf32> to vector<32x32xf32>
    %cst_49 = arith.constant 0.000000e+00 : f32
    %122 = vector.broadcast %cst_49 : f32 to vector<1x32xf32>
    %123 = vector.extract_strided_slice %119 {offsets = [0, 0], sizes = [31, 32], strides = [1, 1]} : vector<32x32xf32> to vector<31x32xf32>
    %124 = tpu.concatenate %122, %123 in 0 : vector<1x32xf32>, vector<31x32xf32> -> vector<32x32xf32>
    %125 = tpu.iota {dimensions = array<i32: 0>} : vector<32x1xi32>
    %c16_i32 = arith.constant 16 : i32
    %c0_i32_50 = arith.constant 0 : i32
    %126 = arith.cmpi eq, %c16_i32, %c0_i32_50 : i32
    %c1_i32_51 = arith.constant 1 : i32
    %127 = arith.select %126, %c1_i32_51, %c16_i32 : i32
    %128 = vector.broadcast %127 : i32 to vector<32x1xi32>
    %129 = arith.remsi %125, %128 : vector<32x1xi32>
    %c0_i32_52 = arith.constant 0 : i32
    %130 = vector.broadcast %c0_i32_52 : i32 to vector<32x1xi32>
    %131 = arith.cmpi ne, %129, %130 : vector<32x1xi32>
    %c0_i32_53 = arith.constant 0 : i32
    %132 = vector.broadcast %c0_i32_53 : i32 to vector<32x1xi32>
    %133 = arith.cmpi slt, %129, %132 : vector<32x1xi32>
    %c0_i32_54 = arith.constant 0 : i32
    %134 = arith.cmpi slt, %127, %c0_i32_54 : i32
    %135 = vector.broadcast %134 : i1 to vector<32x1xi1>
    %136 = vector.broadcast %135 : vector<32x1xi1> to vector<32x1xi1>
    %137 = arith.xori %133, %136 : vector<32x1xi1>
    %138 = arith.andi %137, %131 : vector<32x1xi1>
    %139 = vector.broadcast %127 : i32 to vector<32x1xi32>
    %140 = arith.addi %129, %139 : vector<32x1xi32>
    %141 = arith.select %138, %140, %129 : vector<32x1xi1>, vector<32x1xi32>
    %c0_i32_55 = arith.constant 0 : i32
    %142 = vector.broadcast %c0_i32_55 : i32 to vector<32x1xi32>
    %143 = arith.cmpi ne, %141, %142 : vector<32x1xi32>
    %cst_56 = arith.constant 0.000000e+00 : f32
    %144 = vector.shape_cast %143 : vector<32x1xi1> to vector<32x1xi1>
    %145 = vector.broadcast %144 : vector<32x1xi1> to vector<32x32xi1>
    %146 = vector.broadcast %cst_56 : f32 to vector<32x32xf32>
    %147 = arith.select %145, %124, %146 : vector<32x32xi1>, vector<32x32xf32>
    %148 = arith.addf %147, %117 : vector<32x32xf32>
    %149 = arith.addf %148, %121 : vector<32x32xf32>
    %150 = arith.addf %116, %120 : vector<32x32xf32>
    %cst_57 = arith.constant 0.000000e+00 : f32
    %151 = vector.broadcast %cst_57 : f32 to vector<1x32xf32>
    %152 = vector.extract_strided_slice %118 {offsets = [1, 0], sizes = [31, 32], strides = [1, 1]} : vector<32x32xf32> to vector<31x32xf32>
    %153 = tpu.concatenate %152, %151 in 0 : vector<31x32xf32>, vector<1x32xf32> -> vector<32x32xf32>
    %154 = tpu.iota {dimensions = array<i32: 0>} : vector<32x1xi32>
    %c16_i32_58 = arith.constant 16 : i32
    %c0_i32_59 = arith.constant 0 : i32
    %155 = arith.cmpi eq, %c16_i32_58, %c0_i32_59 : i32
    %c1_i32_60 = arith.constant 1 : i32
    %156 = arith.select %155, %c1_i32_60, %c16_i32_58 : i32
    %157 = vector.broadcast %156 : i32 to vector<32x1xi32>
    %158 = arith.remsi %154, %157 : vector<32x1xi32>
    %c0_i32_61 = arith.constant 0 : i32
    %159 = vector.broadcast %c0_i32_61 : i32 to vector<32x1xi32>
    %160 = arith.cmpi ne, %158, %159 : vector<32x1xi32>
    %c0_i32_62 = arith.constant 0 : i32
    %161 = vector.broadcast %c0_i32_62 : i32 to vector<32x1xi32>
    %162 = arith.cmpi slt, %158, %161 : vector<32x1xi32>
    %c0_i32_63 = arith.constant 0 : i32
    %163 = arith.cmpi slt, %156, %c0_i32_63 : i32
    %164 = vector.broadcast %163 : i1 to vector<32x1xi1>
    %165 = vector.broadcast %164 : vector<32x1xi1> to vector<32x1xi1>
    %166 = arith.xori %162, %165 : vector<32x1xi1>
    %167 = arith.andi %166, %160 : vector<32x1xi1>
    %168 = vector.broadcast %156 : i32 to vector<32x1xi32>
    %169 = arith.addi %158, %168 : vector<32x1xi32>
    %170 = arith.select %167, %169, %158 : vector<32x1xi1>, vector<32x1xi32>
    %c15_i32 = arith.constant 15 : i32
    %171 = vector.broadcast %c15_i32 : i32 to vector<32x1xi32>
    %172 = arith.cmpi ne, %170, %171 : vector<32x1xi32>
    %cst_64 = arith.constant 0.000000e+00 : f32
    %173 = vector.shape_cast %172 : vector<32x1xi1> to vector<32x1xi1>
    %174 = vector.broadcast %173 : vector<32x1xi1> to vector<32x32xi1>
    %175 = vector.broadcast %cst_64 : f32 to vector<32x32xf32>
    %176 = arith.select %174, %153, %175 : vector<32x32xi1>, vector<32x32xf32>
    %177 = arith.addf %150, %176 : vector<32x32xf32>
    %c0_65 = arith.constant 0 : index
    %c0_66 = arith.constant 0 : index
    %178 = vector.load %arg10[%c0_65, %c0_66] : memref<1x32xf32, #tpu.memory_space<vmem>>, vector<1x32xf32>
    %179 = vector.broadcast %178 : vector<1x32xf32> to vector<32x32xf32>
    %180 = arith.addf %149, %179 : vector<32x32xf32>
    %cst_67 = arith.constant 0.000000e+00 : f32
    %181 = vector.broadcast %cst_67 : f32 to vector<32x32xf32>
    %182 = arith.maximumf %180, %181 : vector<32x32xf32>
    %c0_68 = arith.constant 0 : index
    %c0_69 = arith.constant 0 : index
    %183 = vector.load %arg11[%c0_68, %c0_69] : memref<1x32xf32, #tpu.memory_space<vmem>>, vector<1x32xf32>
    %184 = vector.broadcast %183 : vector<1x32xf32> to vector<32x32xf32>
    %185 = arith.mulf %182, %184 : vector<32x32xf32>
    %c0_70 = arith.constant 0 : index
    %c0_71 = arith.constant 0 : index
    %186 = vector.load %arg12[%c0_70, %c0_71] : memref<1x32xf32, #tpu.memory_space<vmem>>, vector<1x32xf32>
    %187 = vector.broadcast %186 : vector<1x32xf32> to vector<32x32xf32>
    %188 = arith.addf %185, %187 : vector<32x32xf32>
    %c0_72 = arith.constant 0 : index
    %c0_73 = arith.constant 0 : index
    %189 = vector.load %arg10[%c0_72, %c0_73] : memref<1x32xf32, #tpu.memory_space<vmem>>, vector<1x32xf32>
    %190 = vector.broadcast %189 : vector<1x32xf32> to vector<32x32xf32>
    %191 = arith.addf %177, %190 : vector<32x32xf32>
    %cst_74 = arith.constant 0.000000e+00 : f32
    %192 = vector.broadcast %cst_74 : f32 to vector<32x32xf32>
    %193 = arith.maximumf %191, %192 : vector<32x32xf32>
    %c0_75 = arith.constant 0 : index
    %c0_76 = arith.constant 0 : index
    %194 = vector.load %arg11[%c0_75, %c0_76] : memref<1x32xf32, #tpu.memory_space<vmem>>, vector<1x32xf32>
    %195 = vector.broadcast %194 : vector<1x32xf32> to vector<32x32xf32>
    %196 = arith.mulf %193, %195 : vector<32x32xf32>
    %c0_77 = arith.constant 0 : index
    %c0_78 = arith.constant 0 : index
    %197 = vector.load %arg12[%c0_77, %c0_78] : memref<1x32xf32, #tpu.memory_space<vmem>>, vector<1x32xf32>
    %198 = vector.broadcast %197 : vector<1x32xf32> to vector<32x32xf32>
    %199 = arith.addf %196, %198 : vector<32x32xf32>
    %200 = arith.maximumf %188, %199 : vector<32x32xf32>
    %201 = arith.truncf %200 : vector<32x32xf32> to vector<32x32xbf16>
    %c0_79 = arith.constant 0 : index
    %c0_80 = arith.constant 0 : index
    %202 = vector.load %arg13[%c0_79, %c0_80] : memref<32x512xbf16, #tpu.memory_space<vmem>>, vector<32x512xbf16>
    %cst_81 = arith.constant dense<0.000000e+00> : vector<32x512xf32>
    %203 = tpu.matmul %201, %202, %cst_81 {dimension_numbers = #tpu.dot_dimension_numbers<[1], [0], [0], [1], [0, 0, 1, 1], [], []>} : vector<32x32xbf16>, vector<32x512xbf16>, vector<32x512xf32> -> vector<32x512xf32>
    %c0_82 = arith.constant 0 : index
    %c0_83 = arith.constant 0 : index
    %204 = vector.load %arg15[%c0_82, %c0_83] : memref<1x512xf32, #tpu.memory_space<vmem>>, vector<1x512xf32>
    %205 = vector.broadcast %204 : vector<1x512xf32> to vector<32x512xf32>
    %206 = arith.addf %203, %205 : vector<32x512xf32>
    %c0_84 = arith.constant 0 : index
    %c0_85 = arith.constant 0 : index
    %207 = vector.load %arg14[%c0_84, %c0_85] : memref<128x512xbf16, #tpu.memory_space<vmem>>, vector<128x512xbf16>
    %208 = vector.extract_strided_slice %206 {offsets = [0, 0], sizes = [16, 512], strides = [1, 1]} : vector<32x512xf32> to vector<16x512xf32>
    %cst_86 = arith.constant 0.000000e+00 : f32
    %209 = vector.broadcast %cst_86 : f32 to vector<16x128xf32>
    %210 = vector.extract_strided_slice %208 {offsets = [0, 0], sizes = [16, 384], strides = [1, 1]} : vector<16x512xf32> to vector<16x384xf32>
    %211 = arith.negf %210 : vector<16x384xf32>
    %212 = math.exp %211 : vector<16x384xf32>
    %cst_87 = arith.constant 1.000000e+00 : f32
    %213 = vector.broadcast %cst_87 : f32 to vector<16x384xf32>
    %214 = arith.addf %213, %212 : vector<16x384xf32>
    %215 = arith.divf %213, %214 : vector<16x384xf32>
    %216 = vector.extract_strided_slice %215 {offsets = [0, 0], sizes = [16, 128], strides = [1, 1]} : vector<16x384xf32> to vector<16x128xf32>
    %217 = vector.extract_strided_slice %215 {offsets = [0, 128], sizes = [16, 128], strides = [1, 1]} : vector<16x384xf32> to vector<16x128xf32>
    %218 = vector.extract_strided_slice %215 {offsets = [0, 256], sizes = [16, 128], strides = [1, 1]} : vector<16x384xf32> to vector<16x128xf32>
    %219 = arith.mulf %217, %209 : vector<16x128xf32>
    %220 = vector.extract_strided_slice %208 {offsets = [0, 384], sizes = [16, 128], strides = [1, 1]} : vector<16x512xf32> to vector<16x128xf32>
    %221 = math.tanh %220 : vector<16x128xf32>
    %222 = arith.mulf %216, %221 : vector<16x128xf32>
    %223 = arith.addf %219, %222 : vector<16x128xf32>
    %224 = math.tanh %223 : vector<16x128xf32>
    %225 = arith.mulf %218, %224 : vector<16x128xf32>
    %226 = vector.extract_strided_slice %206 {offsets = [16, 0], sizes = [16, 512], strides = [1, 1]} : vector<32x512xf32> to vector<16x512xf32>
    %227 = arith.truncf %225 : vector<16x128xf32> to vector<16x128xbf16>
    %cst_88 = arith.constant dense<0.000000e+00> : vector<16x512xf32>
    %228 = tpu.matmul %227, %207, %cst_88 {dimension_numbers = #tpu.dot_dimension_numbers<[1], [0], [0], [1], [0, 0, 1, 1], [], []>} : vector<16x128xbf16>, vector<128x512xbf16>, vector<16x512xf32> -> vector<16x512xf32>
    %229 = arith.addf %226, %228 : vector<16x512xf32>
    %230 = vector.extract_strided_slice %229 {offsets = [0, 0], sizes = [16, 384], strides = [1, 1]} : vector<16x512xf32> to vector<16x384xf32>
    %231 = arith.negf %230 : vector<16x384xf32>
    %232 = math.exp %231 : vector<16x384xf32>
    %cst_89 = arith.constant 1.000000e+00 : f32
    %233 = vector.broadcast %cst_89 : f32 to vector<16x384xf32>
    %234 = arith.addf %233, %232 : vector<16x384xf32>
    %235 = arith.divf %233, %234 : vector<16x384xf32>
    %236 = vector.extract_strided_slice %235 {offsets = [0, 0], sizes = [16, 128], strides = [1, 1]} : vector<16x384xf32> to vector<16x128xf32>
    %237 = vector.extract_strided_slice %235 {offsets = [0, 128], sizes = [16, 128], strides = [1, 1]} : vector<16x384xf32> to vector<16x128xf32>
    %238 = vector.extract_strided_slice %235 {offsets = [0, 256], sizes = [16, 128], strides = [1, 1]} : vector<16x384xf32> to vector<16x128xf32>
    %239 = arith.mulf %237, %223 : vector<16x128xf32>
    %240 = vector.extract_strided_slice %229 {offsets = [0, 384], sizes = [16, 128], strides = [1, 1]} : vector<16x512xf32> to vector<16x128xf32>
    %241 = math.tanh %240 : vector<16x128xf32>
    %242 = arith.mulf %236, %241 : vector<16x128xf32>
    %243 = arith.addf %239, %242 : vector<16x128xf32>
    %244 = math.tanh %243 : vector<16x128xf32>
    %245 = arith.mulf %238, %244 : vector<16x128xf32>
    %246 = tpu.concatenate %225, %245 in 0 : vector<16x128xf32>, vector<16x128xf32> -> vector<32x128xf32>
    %247 = arith.truncf %246 : vector<32x128xf32> to vector<32x128xbf16>
    %c0_90 = arith.constant 0 : index
    %c0_91 = arith.constant 0 : index
    %248 = vector.load %arg16[%c0_90, %c0_91] : memref<128x512xbf16, #tpu.memory_space<vmem>>, vector<128x512xbf16>
    %cst_92 = arith.constant dense<0.000000e+00> : vector<32x512xf32>
    %249 = tpu.matmul %247, %248, %cst_92 {dimension_numbers = #tpu.dot_dimension_numbers<[1], [0], [0], [1], [0, 0, 1, 1], [], []>} : vector<32x128xbf16>, vector<128x512xbf16>, vector<32x512xf32> -> vector<32x512xf32>
    %c0_93 = arith.constant 0 : index
    %c0_94 = arith.constant 0 : index
    %250 = vector.load %arg18[%c0_93, %c0_94] : memref<1x512xf32, #tpu.memory_space<vmem>>, vector<1x512xf32>
    %251 = vector.broadcast %250 : vector<1x512xf32> to vector<32x512xf32>
    %252 = arith.addf %249, %251 : vector<32x512xf32>
    %c0_95 = arith.constant 0 : index
    %c0_96 = arith.constant 0 : index
    %253 = vector.load %arg17[%c0_95, %c0_96] : memref<128x512xbf16, #tpu.memory_space<vmem>>, vector<128x512xbf16>
    %254 = vector.extract_strided_slice %252 {offsets = [0, 0], sizes = [16, 512], strides = [1, 1]} : vector<32x512xf32> to vector<16x512xf32>
    %cst_97 = arith.constant 0.000000e+00 : f32
    %255 = vector.broadcast %cst_97 : f32 to vector<16x128xf32>
    %256 = vector.extract_strided_slice %254 {offsets = [0, 0], sizes = [16, 384], strides = [1, 1]} : vector<16x512xf32> to vector<16x384xf32>
    %257 = arith.negf %256 : vector<16x384xf32>
    %258 = math.exp %257 : vector<16x384xf32>
    %cst_98 = arith.constant 1.000000e+00 : f32
    %259 = vector.broadcast %cst_98 : f32 to vector<16x384xf32>
    %260 = arith.addf %259, %258 : vector<16x384xf32>
    %261 = arith.divf %259, %260 : vector<16x384xf32>
    %262 = vector.extract_strided_slice %261 {offsets = [0, 0], sizes = [16, 128], strides = [1, 1]} : vector<16x384xf32> to vector<16x128xf32>
    %263 = vector.extract_strided_slice %261 {offsets = [0, 128], sizes = [16, 128], strides = [1, 1]} : vector<16x384xf32> to vector<16x128xf32>
    %264 = vector.extract_strided_slice %261 {offsets = [0, 256], sizes = [16, 128], strides = [1, 1]} : vector<16x384xf32> to vector<16x128xf32>
    %265 = arith.mulf %263, %255 : vector<16x128xf32>
    %266 = vector.extract_strided_slice %254 {offsets = [0, 384], sizes = [16, 128], strides = [1, 1]} : vector<16x512xf32> to vector<16x128xf32>
    %267 = math.tanh %266 : vector<16x128xf32>
    %268 = arith.mulf %262, %267 : vector<16x128xf32>
    %269 = arith.addf %265, %268 : vector<16x128xf32>
    %270 = math.tanh %269 : vector<16x128xf32>
    %271 = arith.mulf %264, %270 : vector<16x128xf32>
    %272 = vector.extract_strided_slice %252 {offsets = [16, 0], sizes = [16, 512], strides = [1, 1]} : vector<32x512xf32> to vector<16x512xf32>
    %273 = arith.truncf %271 : vector<16x128xf32> to vector<16x128xbf16>
    %cst_99 = arith.constant dense<0.000000e+00> : vector<16x512xf32>
    %274 = tpu.matmul %273, %253, %cst_99 {dimension_numbers = #tpu.dot_dimension_numbers<[1], [0], [0], [1], [0, 0, 1, 1], [], []>} : vector<16x128xbf16>, vector<128x512xbf16>, vector<16x512xf32> -> vector<16x512xf32>
    %275 = arith.addf %272, %274 : vector<16x512xf32>
    %276 = vector.extract_strided_slice %275 {offsets = [0, 0], sizes = [16, 384], strides = [1, 1]} : vector<16x512xf32> to vector<16x384xf32>
    %277 = arith.negf %276 : vector<16x384xf32>
    %278 = math.exp %277 : vector<16x384xf32>
    %cst_100 = arith.constant 1.000000e+00 : f32
    %279 = vector.broadcast %cst_100 : f32 to vector<16x384xf32>
    %280 = arith.addf %279, %278 : vector<16x384xf32>
    %281 = arith.divf %279, %280 : vector<16x384xf32>
    %282 = vector.extract_strided_slice %281 {offsets = [0, 0], sizes = [16, 128], strides = [1, 1]} : vector<16x384xf32> to vector<16x128xf32>
    %283 = vector.extract_strided_slice %281 {offsets = [0, 128], sizes = [16, 128], strides = [1, 1]} : vector<16x384xf32> to vector<16x128xf32>
    %284 = vector.extract_strided_slice %281 {offsets = [0, 256], sizes = [16, 128], strides = [1, 1]} : vector<16x384xf32> to vector<16x128xf32>
    %285 = arith.mulf %283, %269 : vector<16x128xf32>
    %286 = vector.extract_strided_slice %275 {offsets = [0, 384], sizes = [16, 128], strides = [1, 1]} : vector<16x512xf32> to vector<16x128xf32>
    %287 = math.tanh %286 : vector<16x128xf32>
    %288 = arith.mulf %282, %287 : vector<16x128xf32>
    %289 = arith.addf %285, %288 : vector<16x128xf32>
    %290 = math.tanh %289 : vector<16x128xf32>
    %291 = arith.mulf %284, %290 : vector<16x128xf32>
    %292 = tpu.concatenate %271, %291 in 0 : vector<16x128xf32>, vector<16x128xf32> -> vector<32x128xf32>
    %293 = arith.truncf %292 : vector<32x128xf32> to vector<32x128xbf16>
    %c0_101 = arith.constant 0 : index
    %c0_102 = arith.constant 0 : index
    %294 = vector.load %arg19[%c0_101, %c0_102] : memref<128x512xbf16, #tpu.memory_space<vmem>>, vector<128x512xbf16>
    %cst_103 = arith.constant dense<0.000000e+00> : vector<32x512xf32>
    %295 = tpu.matmul %293, %294, %cst_103 {dimension_numbers = #tpu.dot_dimension_numbers<[1], [0], [0], [1], [0, 0, 1, 1], [], []>} : vector<32x128xbf16>, vector<128x512xbf16>, vector<32x512xf32> -> vector<32x512xf32>
    %c0_104 = arith.constant 0 : index
    %c0_105 = arith.constant 0 : index
    %296 = vector.load %arg21[%c0_104, %c0_105] : memref<1x512xf32, #tpu.memory_space<vmem>>, vector<1x512xf32>
    %297 = vector.broadcast %296 : vector<1x512xf32> to vector<32x512xf32>
    %298 = arith.addf %295, %297 : vector<32x512xf32>
    %c0_106 = arith.constant 0 : index
    %c0_107 = arith.constant 0 : index
    %299 = vector.load %arg20[%c0_106, %c0_107] : memref<128x512xbf16, #tpu.memory_space<vmem>>, vector<128x512xbf16>
    %300 = vector.extract_strided_slice %298 {offsets = [0, 0], sizes = [16, 512], strides = [1, 1]} : vector<32x512xf32> to vector<16x512xf32>
    %cst_108 = arith.constant 0.000000e+00 : f32
    %301 = vector.broadcast %cst_108 : f32 to vector<16x128xf32>
    %302 = vector.extract_strided_slice %300 {offsets = [0, 0], sizes = [16, 384], strides = [1, 1]} : vector<16x512xf32> to vector<16x384xf32>
    %303 = arith.negf %302 : vector<16x384xf32>
    %304 = math.exp %303 : vector<16x384xf32>
    %cst_109 = arith.constant 1.000000e+00 : f32
    %305 = vector.broadcast %cst_109 : f32 to vector<16x384xf32>
    %306 = arith.addf %305, %304 : vector<16x384xf32>
    %307 = arith.divf %305, %306 : vector<16x384xf32>
    %308 = vector.extract_strided_slice %307 {offsets = [0, 0], sizes = [16, 128], strides = [1, 1]} : vector<16x384xf32> to vector<16x128xf32>
    %309 = vector.extract_strided_slice %307 {offsets = [0, 128], sizes = [16, 128], strides = [1, 1]} : vector<16x384xf32> to vector<16x128xf32>
    %310 = vector.extract_strided_slice %307 {offsets = [0, 256], sizes = [16, 128], strides = [1, 1]} : vector<16x384xf32> to vector<16x128xf32>
    %311 = arith.mulf %309, %301 : vector<16x128xf32>
    %312 = vector.extract_strided_slice %300 {offsets = [0, 384], sizes = [16, 128], strides = [1, 1]} : vector<16x512xf32> to vector<16x128xf32>
    %313 = math.tanh %312 : vector<16x128xf32>
    %314 = arith.mulf %308, %313 : vector<16x128xf32>
    %315 = arith.addf %311, %314 : vector<16x128xf32>
    %316 = math.tanh %315 : vector<16x128xf32>
    %317 = arith.mulf %310, %316 : vector<16x128xf32>
    %318 = vector.extract_strided_slice %298 {offsets = [16, 0], sizes = [16, 512], strides = [1, 1]} : vector<32x512xf32> to vector<16x512xf32>
    %319 = arith.truncf %317 : vector<16x128xf32> to vector<16x128xbf16>
    %cst_110 = arith.constant dense<0.000000e+00> : vector<16x512xf32>
    %320 = tpu.matmul %319, %299, %cst_110 {dimension_numbers = #tpu.dot_dimension_numbers<[1], [0], [0], [1], [0, 0, 1, 1], [], []>} : vector<16x128xbf16>, vector<128x512xbf16>, vector<16x512xf32> -> vector<16x512xf32>
    %321 = arith.addf %318, %320 : vector<16x512xf32>
    %322 = vector.extract_strided_slice %321 {offsets = [0, 0], sizes = [16, 384], strides = [1, 1]} : vector<16x512xf32> to vector<16x384xf32>
    %323 = arith.negf %322 : vector<16x384xf32>
    %324 = math.exp %323 : vector<16x384xf32>
    %cst_111 = arith.constant 1.000000e+00 : f32
    %325 = vector.broadcast %cst_111 : f32 to vector<16x384xf32>
    %326 = arith.addf %325, %324 : vector<16x384xf32>
    %327 = arith.divf %325, %326 : vector<16x384xf32>
    %328 = vector.extract_strided_slice %327 {offsets = [0, 0], sizes = [16, 128], strides = [1, 1]} : vector<16x384xf32> to vector<16x128xf32>
    %329 = vector.extract_strided_slice %327 {offsets = [0, 128], sizes = [16, 128], strides = [1, 1]} : vector<16x384xf32> to vector<16x128xf32>
    %330 = vector.extract_strided_slice %327 {offsets = [0, 256], sizes = [16, 128], strides = [1, 1]} : vector<16x384xf32> to vector<16x128xf32>
    %331 = arith.mulf %329, %315 : vector<16x128xf32>
    %332 = vector.extract_strided_slice %321 {offsets = [0, 384], sizes = [16, 128], strides = [1, 1]} : vector<16x512xf32> to vector<16x128xf32>
    %333 = math.tanh %332 : vector<16x128xf32>
    %334 = arith.mulf %328, %333 : vector<16x128xf32>
    %335 = arith.addf %331, %334 : vector<16x128xf32>
    %336 = math.tanh %335 : vector<16x128xf32>
    %337 = arith.mulf %330, %336 : vector<16x128xf32>
    %338 = tpu.concatenate %317, %337 in 0 : vector<16x128xf32>, vector<16x128xf32> -> vector<32x128xf32>
    %339 = vector.extract_strided_slice %338 {offsets = [15, 0], sizes = [1, 128], strides = [1, 1]} : vector<32x128xf32> to vector<1x128xf32>
    %340 = vector.extract_strided_slice %338 {offsets = [31, 0], sizes = [1, 128], strides = [1, 1]} : vector<32x128xf32> to vector<1x128xf32>
    %341 = tpu.concatenate %339, %340 in 0 : vector<1x128xf32>, vector<1x128xf32> -> vector<2x128xf32>
    %c0_112 = arith.constant 0 : index
    %c0_113 = arith.constant 0 : index
    %342 = vector.load %arg22[%c0_112, %c0_113] : memref<2x128xf32, #tpu.memory_space<vmem>>, vector<2x128xf32>
    tpu.vector_store %arg22[%c0_112, %c0_113], %341 {strides = array<i32>} : memref<2x128xf32, #tpu.memory_space<vmem>>, vector<2x128xf32>,
    return
  }
}

</mosaic_0001>

<bundles_post_ra>
// kernel: alone_merged_forward.1
= control target key start
LH: loop header
LB: loop body
LE: loop exit
PB: predicated region body
PF: predicated region fallthrough
CT: control target
= control target key end

     0   :  { %s8270_s0 = inlined_call_operand.vmem [shape: bf16[256,16], index: 0, kind: input, shape index: {}]   ;;  %s8271_s1 = inlined_call_operand.hbm [shape: bf16[16,512], index: 1, kind: input, shape index: {}]   ;;  %s8272_s2 = inlined_call_operand.vmem [shape: f32[1,512], index: 2, kind: input, shape index: {}]   ;;  %s8273_s3 = inlined_call_operand.vmem [shape: f32[1,512], index: 3, kind: input, shape index: {}]   ;;  %s8274_s4 = inlined_call_operand.hbm [shape: f32[1,512], index: 4, kind: input, shape index: {}]   ;;  %s8275_s5 = inlined_call_operand.vmem [shape: bf16[512,192], index: 5, kind: input, shape index: {}]   ;;  %s8276_s6 = inlined_call_operand.hbm [shape: f32[1,64], index: 6, kind: input, shape index: {}]   ;;  %s8277_s7 = inlined_call_operand.hbm [shape: f32[1,64], index: 7, kind: input, shape index: {}]   ;;  %s8278_s8 = inlined_call_operand.hbm [shape: f32[1,64], index: 8, kind: input, shape index: {}]   ;;  %s8279_s9 = inlined_call_operand.hbm [shape: bf16[64,96], index: 9, kind: input, shape index: {}]   ;;  %s8280_s10 = inlined_call_operand.hbm [shape: f32[1,32], index: 10, kind: input, shape index: {}]   ;;  %s8281_s11 = inlined_call_operand.hbm [shape: f32[1,32], index: 11, kind: input, shape index: {}]   ;;  %s8282_s12 = inlined_call_operand.hbm [shape: f32[1,32], index: 12, kind: input, shape index: {}]   ;;  %s8283_s13 = inlined_call_operand.hbm [shape: bf16[32,512], index: 13, kind: input, shape index: {}]   ;;  %s8284_s14 = inlined_call_operand.vmem [shape: bf16[128,512], index: 14, kind: input, shape index: {}]   ;;  %s8285_s15 = inlined_call_operand.hbm [shape: f32[1,512], index: 15, kind: input, shape index: {}]   ;;  %s8286_s16 = inlined_call_operand.vmem [shape: bf16[128,512], index: 16, kind: input, shape index: {}]   ;;  %s8287_s17 = inlined_call_operand.vmem [shape: bf16[128,512], index: 17, kind: input, shape index: {}]   ;;  %s8288_s18 = inlined_call_operand.hbm [shape: f32[1,512], index: 18, kind: input, shape index: {}]   ;;  %s8289_s19 = inlined_call_operand.vmem [shape: bf16[128,512], index: 19, kind: input, shape index: {}]   ;;  %s8290_s20 = inlined_call_operand.hbm [shape: bf16[128,512], index: 20, kind: input, shape index: {}]   ;;  %s8291_s21 = inlined_call_operand.hbm [shape: f32[1,512], index: 21, kind: input, shape index: {}]   ;;  %s8292_s22 = inlined_call_operand.hbm [shape: f32[2,128], index: 22, kind: output, shape index: {}]  }
   0x1   :  { %8310 = sst [smem:[#allocation90_spill]] %s8270_s0 }
   0x2   :  { %8311 = sst [smem:[#allocation91_spill]] %s8271_s1 }
   0x3   :  { %8312 = sst [smem:[#allocation92_spill]] %s8272_s2 }
   0x4   :  { %8313 = sst [smem:[#allocation93_spill]] %s8273_s3 }
   0x5   :  { %8314 = sst [smem:[#allocation94_spill]] %s8274_s4 }
   0x6   :  { %8315 = sst [smem:[#allocation95_spill]] %s8275_s5 }
   0x7   :  { %8316 = sst [smem:[#allocation96_spill]] %s8276_s6 }
   0x8   :  { %27 = vsyncpa [#allocation4], 0 }
   0x9   :  { %28 = vsyncpa [#allocation7], 0 }
   0xa   :  { %29 = vsyncpa [#allocation10], 0 }
   0xb   :  { %30 = vsyncpa [#allocation13], 0 }
   0xc   :  { %31 = vsyncpa [#allocation16], 0 }
   0xd   :  { %32 = vsyncpa [#allocation19], 0 }
   0xe   :  { %33 = vsyncpa [#allocation22], 0 }
   0xf   :  { %34 = vsyncpa [#allocation25], 0 }
  0x10   :  { %35 = vsyncpa [#allocation5], 0  ;;  %s6084_s3 = smov [#allocation6]   ;;  %s6085_s29 = smov [#allocation9]  }
  0x11   :  { %s60_s28 = sshll.u32 %s6084_s3, 4  ;;  %s82_s30 = sshll.u32 %s6085_s29, 4  ;;  %s61_s28 = int_to_ptr.vmem [resolvable:$true] %s60_s28  ;;  %s83_s30 = int_to_ptr.vmem [resolvable:$true] %s82_s30 }
  0x12   :  { %s8317_s23 = sld [smem:[#allocation94_spill]] }
  0x18   :  { %s5736_s1 = scalar_lea.hbm %s8317_s23, 64 }
  0x19   :  { %p5737_p0 = scmp.ne.s32.totalorder %s8317_s23, %s5736_s1  ;;  %p5740_p1 = scmp.lt.u32.totalorder %s5736_s1, %s8317_s23 }
  0x1b   :  { %p5742_p2 = pnand %p5740_p1, %p5737_p0 }
  0x1d   :  { %5745 = shalt.err (!%p5742_p2)
}
  0x1e   :  { %s5746_s26 = scalar_lea.vmem %s61_s28, 64  ;;  %p5751_p4 = scmp.lt.s32.totalorder %s61_s28, %s61_s28 }
  0x1f   :  { %p5747_p3 = scmp.ne.s32.totalorder %s61_s28, %s5746_s26  ;;  %p5752_p5 = scmp.lt.s32.totalorder %s5746_s26, %s5746_s26 }
  0x21   :  { %p5753_p6 = por %p5752_p5, %p5751_p4 }
  0x23   :  { %p5754_p7 = pnand %p5753_p6, %p5747_p3 }
  0x25   :  { %5757 = shalt.err (!%p5754_p7)
}
  0x26   :  { %63 = dma.hbm_to_vmem [thread:$0]  %s8317_s23, 64, %s61_s28, [#allocation7]  }
  0x27   :  { %s5758_s4 = scalar_lea.hbm %s8277_s7, 16 }
  0x28   :  { %p5759_p8 = scmp.ne.s32.totalorder %s8277_s7, %s5758_s4  ;;  %p5762_p9 = scmp.lt.u32.totalorder %s5758_s4, %s8277_s7 }
  0x2a   :  { %p5764_p10 = pnand %p5762_p9, %p5759_p8 }
  0x2c   :  { %5767 = shalt.err (!%p5764_p10)
}
  0x2d   :  { %s5768_s6 = scalar_lea.vmem %s83_s30, 16  ;;  %s5772_s25 = scalar_lea.vmem %s83_s30, 32 }
  0x2e   :  { %p5769_p11 = scmp.ne.s32.totalorder %s83_s30, %s5768_s6  ;;  %p5773_p12 = scmp.lt.s32.totalorder %s83_s30, %s83_s30 }
  0x2f   :  { %p5774_p13 = scmp.lt.s32.totalorder %s5772_s25, %s5768_s6 }
  0x31   :  { %p5775_p0 = por %p5774_p13, %p5773_p12 }
  0x33   :  { %p5776_p1 = pnand %p5775_p0, %p5769_p11 }
  0x35   :  { %5779 = shalt.err (!%p5776_p1)
}
  0x36   :  { %85 = dma.hbm_to_vmem [thread:$0]  %s8277_s7, 16, %s83_s30, [#allocation10]  }
  0x37   :  { %s6086_s26 = smov [#allocation12]   ;;  %s5780_s29 = scalar_lea.hbm %s8279_s9, 512 }
  0x38   :  { %s101_s2 = sshll.u32 %s6086_s26, 4  ;;  %p5781_p2 = scmp.ne.s32.totalorder %s8279_s9, %s5780_s29  ;;  %s102_s2 = int_to_ptr.vmem [resolvable:$true] %s101_s2 }
  0x39   :  { %p5784_p3 = scmp.lt.u32.totalorder %s5780_s29, %s8279_s9 }
  0x3b   :  { %p5786_p4 = pnand %p5784_p3, %p5781_p2 }
  0x3d   :  { %5789 = shalt.err (!%p5786_p4)
}
  0x3e   :  { %s5790_s24 = scalar_lea.vmem %s102_s2, 512  ;;  %p5795_p6 = scmp.lt.s32.totalorder %s102_s2, %s102_s2 }
  0x3f   :  { %p5791_p5 = scmp.ne.s32.totalorder %s102_s2, %s5790_s24  ;;  %p5796_p7 = scmp.lt.s32.totalorder %s5790_s24, %s5790_s24 }
  0x41   :  { %p5797_p8 = por %p5796_p7, %p5795_p6 }
  0x43   :  { %p5798_p9 = pnand %p5797_p8, %p5791_p5 }
  0x45   :  { %5801 = shalt.err (!%p5798_p9)
}
  0x46   :  { %s6087_s7 = smov 64   ;;  %s6088_s30 = smov 4  }
  0x47   :  { %107 = dma.hbm_to_vmem [thread:$0]  %s8279_s9, 512, %s102_s2, [#allocation13], %s6087_s7, %s6087_s7, %s6088_s30  }
  0x48   :  { %s6089_s28 = smov [#allocation15]   ;;  %s5802_s3 = scalar_lea.hbm %s8281_s11, 16 }
  0x49   :  { %s124_s23 = sshll.u32 %s6089_s28, 4  ;;  %p5803_p10 = scmp.ne.s32.totalorder %s8281_s11, %s5802_s3  ;;  %s125_s23 = int_to_ptr.vmem [resolvable:$true] %s124_s23 }
  0x4a   :  { %p5806_p11 = scmp.lt.u32.totalorder %s5802_s3, %s8281_s11 }
  0x4c   :  { %p5808_p12 = pnand %p5806_p11, %p5803_p10 }
  0x4e   :  { %5811 = shalt.err (!%p5808_p12)
}
  0x4f   :  { %s5812_s1 = scalar_lea.vmem %s125_s23, 16  ;;  %s5816_s9 = scalar_lea.vmem %s125_s23, 32 }
  0x50   :  { %p5813_p13 = scmp.ne.s32.totalorder %s125_s23, %s5812_s1  ;;  %p5817_p0 = scmp.lt.s32.totalorder %s125_s23, %s125_s23 }
  0x51   :  { %p5818_p1 = scmp.lt.s32.totalorder %s5816_s9, %s5812_s1 }
  0x53   :  { %p5819_p2 = por %p5818_p1, %p5817_p0 }
  0x55   :  { %p5820_p3 = pnand %p5819_p2, %p5813_p13 }
  0x57   :  { %5823 = shalt.err (!%p5820_p3)
}
  0x58   :  { %127 = dma.hbm_to_vmem [thread:$0]  %s8281_s11, 16, %s125_s23, [#allocation16]  }
  0x59   :  { %s6090_s30 = smov [#allocation18]   ;;  %s6091_s25 = smov [#allocation21]  }
  0x5a   :  { %s143_s6 = sshll.u32 %s6090_s30, 4  ;;  %s172_s28 = sshll.u32 %s6091_s25, 4  ;;  %s144_s6 = int_to_ptr.vmem [resolvable:$true] %s143_s6  ;;  %s173_s28 = int_to_ptr.vmem [resolvable:$true] %s172_s28 }
  0x5b   :  { %s5824_s3 = scalar_lea.hbm %s8283_s13, 1024 }
  0x5c   :  { %p5825_p4 = scmp.ne.s32.totalorder %s8283_s13, %s5824_s3  ;;  %p5828_p5 = scmp.lt.u32.totalorder %s5824_s3, %s8283_s13 }
  0x5e   :  { %p5830_p6 = pnand %p5828_p5, %p5825_p4 }
  0x60   :  { %5833 = shalt.err (!%p5830_p6)
}
  0x61   :  { %s5834_s11 = scalar_lea.vmem %s144_s6, 1024  ;;  %p5839_p8 = scmp.lt.s32.totalorder %s144_s6, %s144_s6 }
  0x62   :  { %p5835_p7 = scmp.ne.s32.totalorder %s144_s6, %s5834_s11  ;;  %p5840_p9 = scmp.lt.s32.totalorder %s5834_s11, %s5834_s11 }
  0x64   :  { %p5841_p10 = por %p5840_p9, %p5839_p8 }
  0x66   :  { %p5842_p11 = pnand %p5841_p10, %p5835_p7 }
  0x68   :  { %5845 = shalt.err (!%p5842_p11)
}
  0x69   :  { %s6092_s23 = smov 256   ;;  %s6093_s1 = smov 16  }
  0x6a   :  { %149 = dma.hbm_to_vmem [thread:$0]  %s8283_s13, 1024, %s144_s6, [#allocation19], %s6092_s23, %s6092_s23, %s6093_s1  }
  0x6b   :  { %s5846_s25 = scalar_lea.hbm %s8288_s18, 64 }
  0x6c   :  { %p5847_p12 = scmp.ne.s32.totalorder %s8288_s18, %s5846_s25  ;;  %p5850_p13 = scmp.lt.u32.totalorder %s5846_s25, %s8288_s18 }
  0x6e   :  { %p5852_p0 = pnand %p5850_p13, %p5847_p12 }
  0x70   :  { %5855 = shalt.err (!%p5852_p0)
}
  0x71   :  { %s5856_s4 = scalar_lea.vmem %s173_s28, 64  ;;  %p5861_p2 = scmp.lt.s32.totalorder %s173_s28, %s173_s28 }
  0x72   :  { %p5857_p1 = scmp.ne.s32.totalorder %s173_s28, %s5856_s4  ;;  %p5862_p3 = scmp.lt.s32.totalorder %s5856_s4, %s5856_s4 }
  0x74   :  { %p5863_p4 = por %p5862_p3, %p5861_p2 }
  0x76   :  { %p5864_p5 = pnand %p5863_p4, %p5857_p1 }
  0x78   :  { %5867 = shalt.err (!%p5864_p5)
}
  0x79   :  { %175 = dma.hbm_to_vmem [thread:$0]  %s8288_s18, 64, %s173_s28, [#allocation22]  }
  0x7a   :  { %s6094_s0 = smov [#allocation3]   ;;  %s6095_s11 = smov [#allocation8]  }
  0x7b   :  { %s43_s5 = sshll.u32 %s6094_s0, 4  ;;  %s72_s9 = sshll.u32 %s6095_s11, 4  ;;  %s44_s5 = int_to_ptr.vmem [resolvable:$true] %s43_s5  ;;  %s73_s9 = int_to_ptr.vmem [resolvable:$true] %s72_s9 }
  0x7c   :  { %s8318_s30 = sld [smem:[#allocation91_spill]] }
  0x82   :  { %s5868_s25 = scalar_lea.hbm %s8318_s30, 512 }
  0x83   :  { %p5869_p6 = scmp.ne.s32.totalorder %s8318_s30, %s5868_s25  ;;  %p5872_p7 = scmp.lt.u32.totalorder %s5868_s25, %s8318_s30 }
  0x85   :  { %p5874_p8 = pnand %p5872_p7, %p5869_p6 }
  0x87   :  { %5877 = shalt.err (!%p5874_p8)
}
  0x88   :  { %s5878_s18 = scalar_lea.vmem %s44_s5, 512  ;;  %p5883_p10 = scmp.lt.s32.totalorder %s44_s5, %s44_s5 }
  0x89   :  { %p5879_p9 = scmp.ne.s32.totalorder %s44_s5, %s5878_s18  ;;  %p5884_p11 = scmp.lt.s32.totalorder %s5878_s18, %s5878_s18 }
  0x8b   :  { %p5885_p12 = por %p5884_p11, %p5883_p10 }
  0x8d   :  { %p5886_p13 = pnand %p5885_p12, %p5879_p9 }
  0x8f   :  { %5889 = shalt.err (!%p5886_p13)
}
  0x90   :  { %49 = dma.hbm_to_vmem [thread:$0]  %s8318_s30, 512, %s44_s5, [#allocation4], %s6092_s23, %s6092_s23, %s6093_s1  }
  0x91   :  { %s8319_s0 = sld [smem:[#allocation96_spill]] }
  0x97   :  { %s5890_s11 = scalar_lea.hbm %s8319_s0, 16 }
  0x98   :  { %p5891_p0 = scmp.ne.s32.totalorder %s8319_s0, %s5890_s11  ;;  %p5894_p1 = scmp.lt.u32.totalorder %s5890_s11, %s8319_s0 }
  0x9a   :  { %p5896_p2 = pnand %p5894_p1, %p5891_p0 }
  0x9c   :  { %5899 = shalt.err (!%p5896_p2)
}
  0x9d   :  { %s5900_s27 = scalar_lea.vmem %s73_s9, 16  ;;  %s5904_s3 = scalar_lea.vmem %s73_s9, 32 }
  0x9e   :  { %p5901_p3 = scmp.ne.s32.totalorder %s73_s9, %s5900_s27  ;;  %p5905_p4 = scmp.lt.s32.totalorder %s73_s9, %s73_s9 }
  0x9f   :  { %p5906_p5 = scmp.lt.s32.totalorder %s5904_s3, %s5900_s27 }
  0xa1   :  { %p5907_p6 = por %p5906_p5, %p5905_p4 }
  0xa3   :  { %p5908_p7 = pnand %p5907_p6, %p5901_p3 }
  0xa5   :  { %5911 = shalt.err (!%p5908_p7)
}
  0xa6   :  { %75 = dma.hbm_to_vmem [thread:$0]  %s8319_s0, 16, %s73_s9, [#allocation7]  }
  0xa7   :  { %s6096_s29 = smov [#allocation11]   ;;  %s6097_s28 = smov [#allocation14]  }
  0xa8   :  { %s92_s18 = sshll.u32 %s6096_s29, 4  ;;  %s114_s4 = sshll.u32 %s6097_s28, 4  ;;  %s93_s18 = int_to_ptr.vmem [resolvable:$true] %s92_s18  ;;  %s115_s4 = int_to_ptr.vmem [resolvable:$true] %s114_s4 }
  0xa9   :  { %s5912_s11 = scalar_lea.hbm %s8278_s8, 16 }
  0xaa   :  { %p5913_p8 = scmp.ne.s32.totalorder %s8278_s8, %s5912_s11  ;;  %p5916_p9 = scmp.lt.u32.totalorder %s5912_s11, %s8278_s8 }
  0xac   :  { %p5918_p10 = pnand %p5916_p9, %p5913_p8 }
  0xae   :  { %5921 = shalt.err (!%p5918_p10)
}
  0xaf   :  { %s5922_s9 = scalar_lea.vmem %s93_s18, 16  ;;  %s5926_s0 = scalar_lea.vmem %s93_s18, 32 }
  0xb0   :  { %p5923_p11 = scmp.ne.s32.totalorder %s93_s18, %s5922_s9  ;;  %p5927_p12 = scmp.lt.s32.totalorder %s93_s18, %s93_s18 }
  0xb1   :  { %p5928_p13 = scmp.lt.s32.totalorder %s5926_s0, %s5922_s9 }
  0xb3   :  { %p5929_p0 = por %p5928_p13, %p5927_p12 }
  0xb5   :  { %p5930_p1 = pnand %p5929_p0, %p5923_p11 }
  0xb7   :  { %5933 = shalt.err (!%p5930_p1)
}
  0xb8   :  { %95 = dma.hbm_to_vmem [thread:$0]  %s8278_s8, 16, %s93_s18, [#allocation10]  }
  0xb9   :  { %s5934_s29 = scalar_lea.hbm %s8280_s10, 16 }
  0xba   :  { %p5935_p2 = scmp.ne.s32.totalorder %s8280_s10, %s5934_s29  ;;  %p5938_p3 = scmp.lt.u32.totalorder %s5934_s29, %s8280_s10 }
  0xbc   :  { %p5940_p4 = pnand %p5938_p3, %p5935_p2 }
  0xbe   :  { %5943 = shalt.err (!%p5940_p4)
}
  0xbf   :  { %s5944_s2 = scalar_lea.vmem %s115_s4, 16  ;;  %s5948_s24 = scalar_lea.vmem %s115_s4, 32 }
  0xc0   :  { %p5945_p5 = scmp.ne.s32.totalorder %s115_s4, %s5944_s2  ;;  %p5949_p6 = scmp.lt.s32.totalorder %s115_s4, %s115_s4 }
  0xc1   :  { %p5950_p7 = scmp.lt.s32.totalorder %s5948_s24, %s5944_s2 }
  0xc3   :  { %p5951_p8 = por %p5950_p7, %p5949_p6 }
  0xc5   :  { %p5952_p9 = pnand %p5951_p8, %p5945_p5 }
  0xc7   :  { %5955 = shalt.err (!%p5952_p9)
}
  0xc8   :  { %117 = dma.hbm_to_vmem [thread:$0]  %s8280_s10, 16, %s115_s4, [#allocation13]  }
  0xc9   :  { %s6098_s25 = smov [#allocation17]   ;;  %s6099_s9 = smov [#allocation20]  }
  0xca   :  { %s134_s26 = sshll.u32 %s6098_s25, 4  ;;  %s158_s0 = sshll.u32 %s6099_s9, 4  ;;  %s135_s26 = int_to_ptr.vmem [resolvable:$true] %s134_s26  ;;  %s159_s0 = int_to_ptr.vmem [resolvable:$true] %s158_s0 }
  0xcb   :  { %s5956_s5 = scalar_lea.hbm %s8282_s12, 16 }
  0xcc   :  { %p5957_p10 = scmp.ne.s32.totalorder %s8282_s12, %s5956_s5  ;;  %p5960_p11 = scmp.lt.u32.totalorder %s5956_s5, %s8282_s12 }
  0xce   :  { %p5962_p12 = pnand %p5960_p11, %p5957_p10 }
  0xd0   :  { %5965 = shalt.err (!%p5962_p12)
}
  0xd1   :  { %s5966_s10 = scalar_lea.vmem %s135_s26, 16  ;;  %s5970_s4 = scalar_lea.vmem %s135_s26, 32 }
  0xd2   :  { %p5967_p13 = scmp.ne.s32.totalorder %s135_s26, %s5966_s10  ;;  %p5971_p0 = scmp.lt.s32.totalorder %s135_s26, %s135_s26 }
  0xd3   :  { %p5972_p1 = scmp.lt.s32.totalorder %s5970_s4, %s5966_s10 }
  0xd5   :  { %p5973_p2 = por %p5972_p1, %p5971_p0 }
  0xd7   :  { %p5974_p3 = pnand %p5973_p2, %p5967_p13 }
  0xd9   :  { %5977 = shalt.err (!%p5974_p3)
}
  0xda   :  { %137 = dma.hbm_to_vmem [thread:$0]  %s8282_s12, 16, %s135_s26, [#allocation16]  }
  0xdb   :  { %s5978_s8 = scalar_lea.hbm %s8285_s15, 64 }
  0xdc   :  { %p5979_p4 = scmp.ne.s32.totalorder %s8285_s15, %s5978_s8  ;;  %p5982_p5 = scmp.lt.u32.totalorder %s5978_s8, %s8285_s15 }
  0xde   :  { %p5984_p6 = pnand %p5982_p5, %p5979_p4 }
  0xe0   :  { %5987 = shalt.err (!%p5984_p6)
}
  0xe1   :  { %s5988_s3 = scalar_lea.vmem %s159_s0, 64  ;;  %p5993_p8 = scmp.lt.s32.totalorder %s159_s0, %s159_s0 }
  0xe2   :  { %p5989_p7 = scmp.ne.s32.totalorder %s159_s0, %s5988_s3  ;;  %p5994_p9 = scmp.lt.s32.totalorder %s5988_s3, %s5988_s3 }
  0xe4   :  { %p5995_p10 = por %p5994_p9, %p5993_p8 }
  0xe6   :  { %p5996_p11 = pnand %p5995_p10, %p5989_p7 }
  0xe8   :  { %5999 = shalt.err (!%p5996_p11)
}
  0xe9   :  { %161 = dma.hbm_to_vmem [thread:$0]  %s8285_s15, 64, %s159_s0, [#allocation19]  }
  0xea   :  { %s6100_s5 = smov [#allocation23]   ;;  %s6101_s29 = smov [#allocation24]  }
  0xeb   :  { %s183_s30 = sshll.u32 %s6100_s5, 4  ;;  %s196_s28 = sshll.u32 %s6101_s29, 4  ;;  %s184_s30 = int_to_ptr.vmem [resolvable:$true] %s183_s30  ;;  %s197_s28 = int_to_ptr.vmem [resolvable:$true] %s196_s28 }
  0xec   :  { %s6000_s4 = scalar_lea.hbm %s8290_s20, 4096 }
  0xed   :  { %p6001_p12 = scmp.ne.s32.totalorder %s8290_s20, %s6000_s4  ;;  %p6004_p13 = scmp.lt.u32.totalorder %s6000_s4, %s8290_s20 }
  0xef   :  { %p6006_p0 = pnand %p6004_p13, %p6001_p12 }
  0xf1   :  { %6009 = shalt.err (!%p6006_p0)
}
  0xf2   :  { %s6010_s15 = scalar_lea.vmem %s184_s30, 4096  ;;  %p6015_p2 = scmp.lt.s32.totalorder %s184_s30, %s184_s30 }
  0xf3   :  { %p6011_p1 = scmp.ne.s32.totalorder %s184_s30, %s6010_s15  ;;  %p6016_p3 = scmp.lt.s32.totalorder %s6010_s15, %s6010_s15 }
  0xf5   :  { %p6017_p4 = por %p6016_p3, %p6015_p2 }
  0xf7   :  { %p6018_p5 = pnand %p6017_p4, %p6011_p1 }
  0xf9   :  { %6021 = shalt.err (!%p6018_p5)
}
  0xfa   :  { %189 = dma.hbm_to_vmem [thread:$0]  %s8290_s20, 4096, %s184_s30, [#allocation22], %s6092_s23, %s6092_s23, %s6093_s1  }
  0xfb   :  { %s6022_s9 = scalar_lea.hbm %s8291_s21, 64 }
  0xfc   :  { %p6023_p6 = scmp.ne.s32.totalorder %s8291_s21, %s6022_s9  ;;  %p6026_p7 = scmp.lt.u32.totalorder %s6022_s9, %s8291_s21 }
  0xfe   :  { %p6028_p8 = pnand %p6026_p7, %p6023_p6 }
 0x100   :  { %6031 = shalt.err (!%p6028_p8)
}
 0x101   :  { %s6032_s5 = scalar_lea.vmem %s197_s28, 64  ;;  %p6037_p10 = scmp.lt.s32.totalorder %s197_s28, %s197_s28 }
 0x102   :  { %p6033_p9 = scmp.ne.s32.totalorder %s197_s28, %s6032_s5  ;;  %p6038_p11 = scmp.lt.s32.totalorder %s6032_s5, %s6032_s5 }
 0x104   :  { %p6039_p12 = por %p6038_p11, %p6037_p10 }
 0x106   :  { %p6040_p13 = pnand %p6039_p12, %p6033_p9 }
 0x108   :  { %6043 = shalt.err (!%p6040_p13)
}
 0x109   :  { %199 = dma.hbm_to_vmem [thread:$0]  %s8291_s21, 64, %s197_s28, [#allocation25]  }
 0x10a   :  { %6066 = dma.done.wait [#allocation4], 512  }
 0x10b   :  { %6067 = vsyncadd [#allocation4], 4294966784 }
 0x10c   :  { %6068 = dma.done.wait [#allocation7], 80  }
 0x10d   :  { %6069 = vsyncadd [#allocation7], 4294967216 }
 0x10e   :  { %6070 = dma.done.wait [#allocation10], 32  }
 0x10f   :  { %6071 = vsyncadd [#allocation10], 4294967264 }
 0x110   :  { %6072 = dma.done.wait [#allocation13], 528  }
 0x111   :  { %6073 = vsyncadd [#allocation13], 4294966768 }
 0x112   :  { %6074 = dma.done.wait [#allocation16], 32  }
 0x113   :  { %6075 = vsyncadd [#allocation16], 4294967264 }
 0x114   :  { %6076 = dma.done.wait [#allocation19], 1088  }
 0x115   :  { %6077 = vsyncadd [#allocation19], 4294966208 }
 0x116   :  { %6078 = dma.done.wait [#allocation22], 4160  }
 0x117   :  { %6079 = vsyncadd [#allocation22], 4294963136 }
 0x118   :  { %6080 = dma.done.wait [#allocation25], 64  }
 0x119   :  { %6081 = vsyncadd [#allocation25], 4294967232  ;;  %v8298_v0 = vmov 0   ;;  %v5186_v1 = vld [vmem:[#allocation3 + $0x4] ss:$16 sps:$4 sm:$0xff]   ;;  %s8320_s30 = sld [smem:[#allocation90_spill]]  ;;  %v281_v54 = vlaneseq }
 0x11a   :  { %482 = vmatprep.mubr.bf16.mxu0 %v8298_v0  ;;  %675 = vmatprep.mubr.bf16.mxu1 %v8298_v0  ;;  %v5188_v2 = vld [vmem:[#allocation3 + $0xc] ss:$16 sps:$4 sm:$0xff]   ;;  %v5190_v3 = vld [vmem:[#allocation3] ss:$16 sps:$4 sm:$0xff]   ;;  %v5191_v4 = vld [vmem:[#allocation3 + $0x8] ss:$16 sps:$4 sm:$0xff]  }
 0x11b   :  { %450 = vmatprep.subr.bf16.mxu0 %v5186_v1  ;;  %643 = vmatprep.subr.bf16.mxu1 %v5188_v2  ;;  %vm401_vm0 = vcmask 130048   ;;  %s8321_s11 = sld [smem:[#allocation95_spill]]  ;;  %v6610_v55 = vshrl.u32 %v281_v54, 7  ;;  %s8325_s6 = sld [smem:[#allocation92_spill]]  ;;  %v1114_v63 = vld [vmem:[#allocation6] sm:$0xf] }
 0x11c   :  { %451 = vmatpush1.bf16.msra.mxu0 %v5190_v3  ;;  %644 = vmatpush1.bf16.msra.mxu1 %v5191_v4  ;;  %s8328_s24 = sld [smem:[#allocation93_spill]]  ;;  %vm2228_vm1 = vcmask 1046528   ;;  %vm1978_vm2 = vcmask 1040384   ;;  %vm2386_vm6 = vcmask 523264   ;;  %vm2832_vm12 = vcmask 261120  }
 0x11d   :  { %8322 = vst [vmem:[#allocation36_spill] sm:$0xff] %v6610_v55  ;;  %v6613_v56 = vsub.s32 0, %v6610_v55  ;;  %v6616_v57 = vsub.s32 2, %v6610_v55  ;;  %v6622_v59 = vsub.s32 1, %v6610_v55  ;;  %v6625_v60 = vsub.s32 3, %v6610_v55 }
 0x11f   :  { %v5192_v5 = vld [vmem:[%s8320_s30] sm:$0xff]   ;;  %v5193_v6 = vld [vmem:[%s8320_s30 + $0x8] sm:$0xff]   ;;  %v5194_v7 = vld [vmem:[%s8320_s30 + $0x10] sm:$0xff]   ;;  %8323 = vst [vmem:[#allocation37_spill] sm:$0xff] %v6613_v56 }
 0x120   :  { %4750 = vmatmul.mubr.msk.bf16.vlgmr.msra.gmra.mrb[0].mxu0 %vm401_vm0, %v5192_v5  ;;  %4766 = vmatmul.mubr.msk.bf16.vlgmr.msra.gmra.mrb[0].mxu1 %vm401_vm0, %v5192_v5  ;;  %v5195_v13 = vld [vmem:[%s8320_s30 + $0x18] sm:$0xff]   ;;  %v5196_v19 = vld [vmem:[%s8320_s30 + $0x20] sm:$0xff]   ;;  %v5197_v22 = vld [vmem:[%s8320_s30 + $0x28] sm:$0xff]   ;;  %8324 = vst [vmem:[#allocation38_spill] sm:$0xff] %v6616_v57 }
 0x121   :  { %492 = vmatprep.mubr.bf16.mxu0 %v8298_v0  ;;  %685 = vmatprep.mubr.bf16.mxu1 %v8298_v0  ;;  %v5208_v8 = vld [vmem:[%s8321_s11] ss:$8 sps:$4 sm:$0xff]   ;;  %v5210_v9 = vld [vmem:[%s8321_s11 + $0x4] ss:$8 sps:$4 sm:$0xff]   ;;  %v5213_v10 = vld [vmem:[%s8321_s11 + $0x14] ss:$8 sps:$4 sm:$0xff]  }
 0x122   :  { %1744 = vmatprep.subr.bf16.mxu0 %v5210_v9  ;;  %v5211_v11 = vld [vmem:[%s8321_s11 + $0x10] ss:$8 sps:$4 sm:$0xff]   ;;  %v5216_v12 = vld [vmem:[%s8321_s11 + $0x24] ss:$8 sps:$4 sm:$0xff]   ;;  %v5214_v14 = vld [vmem:[%s8321_s11 + $0x20] ss:$8 sps:$4 sm:$0xff]  }
 0x123   :  { %1745 = vmatpush1.bf16.msra.mxu0 %v5208_v8  ;;  %v5219_v15 = vld [vmem:[%s8321_s11 + $0x34] ss:$8 sps:$4 sm:$0xff]   ;;  %v5217_v16 = vld [vmem:[%s8321_s11 + $0x30] ss:$8 sps:$4 sm:$0xff]   ;;  %v5222_v17 = vld [vmem:[%s8321_s11 + $0x44] ss:$8 sps:$4 sm:$0xff]   ;;  %v6652_v8 = vrot.slane %v1114_v63, %v6622_v59 }
 0x124   :  { %1746 = vmatprep.subr.bf16.mxu0 %v5213_v10  ;;  %v5220_v18 = vld [vmem:[%s8321_s11 + $0x40] ss:$8 sps:$4 sm:$0xff]   ;;  %v5225_v20 = vld [vmem:[%s8321_s11 + $0x54] ss:$8 sps:$4 sm:$0xff]   ;;  %v5223_v21 = vld [vmem:[%s8321_s11 + $0x50] ss:$8 sps:$4 sm:$0xff]  }
 0x125   :  { %v5198_v23 = vld [vmem:[%s8320_s30 + $0x30] sm:$0xff]   ;;  %v5199_v24 = vld [vmem:[%s8320_s30 + $0x38] sm:$0xff]   ;;  %v5200_v25 = vld [vmem:[%s8320_s30 + $0x40] sm:$0xff]   ;;  %8326 = vst [vmem:[#allocation39_spill] sm:$0xff] %v6622_v59 }
 0x126   :  { %v5201_v26 = vld [vmem:[%s8320_s30 + $0x48] sm:$0xff]   ;;  %v5202_v27 = vld [vmem:[%s8320_s30 + $0x50] sm:$0xff]   ;;  %v5203_v28 = vld [vmem:[%s8320_s30 + $0x58] sm:$0xff]   ;;  %8327 = vst [vmem:[#allocation40_spill] sm:$0xff] %v6625_v60 }
 0x127   :  { %1747 = vmatpush1.bf16.msra.mxu0 %v5211_v11  ;;  %v5204_v29 = vld [vmem:[%s8320_s30 + $0x60] sm:$0xff]   ;;  %v5229_v32 = vld [vmem:[%s8321_s11 + $0x70] ss:$8 sps:$4 sm:$0xff]   ;;  %v5231_v33 = vld [vmem:[%s8321_s11 + $0x74] ss:$8 sps:$4 sm:$0xff]  }
 0x128   :  { %4751 = vmatmul.mubr.msk.bf16.gmra.mrb[4].mxu0 %vm401_vm0, %v5193_v6  ;;  %4767 = vmatmul.mubr.msk.bf16.gmra.mrb[4].mxu1 %vm401_vm0, %v5193_v6  ;;  %v5226_v30 = vld [vmem:[%s8321_s11 + $0x60] ss:$8 sps:$4 sm:$0xff]   ;;  %v5228_v31 = vld [vmem:[%s8321_s11 + $0x64] ss:$8 sps:$4 sm:$0xff]   ;;  %v5206_v37 = vld [vmem:[%s8320_s30 + $0x70] sm:$0xff]   ;;  %v6646_v6 = vrot.slane %v1114_v63, %v6613_v56 }
 0x129   :  { %502 = vmatprep.mubr.bf16.mxu0 %v8298_v0  ;;  %695 = vmatprep.mubr.bf16.mxu1 %v8298_v0  ;;  %v5205_v34 = vld [vmem:[%s8320_s30 + $0x68] sm:$0xff]   ;;  %v5235_v38 = vld [vmem:[%s8321_s11 + $0x90] ss:$8 sps:$4 sm:$0xff]   ;;  %v5237_v39 = vld [vmem:[%s8321_s11 + $0x94] ss:$8 sps:$4 sm:$0xff]  }
 0x12a   :  { %1748 = vmatprep.subr.bf16.mxu0 %v5216_v12  ;;  %v5232_v35 = vld [vmem:[%s8321_s11 + $0x80] ss:$8 sps:$4 sm:$0xff]   ;;  %v5234_v36 = vld [vmem:[%s8321_s11 + $0x84] ss:$8 sps:$4 sm:$0xff]   ;;  %v5207_v40 = vld [vmem:[%s8320_s30 + $0x78] sm:$0xff]  }
 0x12b   :  { %1749 = vmatpush1.bf16.msra.mxu0 %v5214_v14  ;;  %v5238_v41 = vld [vmem:[%s8321_s11 + $0xa0] ss:$8 sps:$4 sm:$0xff]   ;;  %v5240_v42 = vld [vmem:[%s8321_s11 + $0xa4] ss:$8 sps:$4 sm:$0xff]   ;;  %v5241_v43 = vld [vmem:[%s8321_s11 + $0xb0] ss:$8 sps:$4 sm:$0xff]   ;;  %v6660_v14 = vrot.slane %v1114_v63, %v6616_v57 }
 0x12c   :  { %1750 = vmatprep.subr.bf16.mxu0 %v5219_v15  ;;  %v5243_v44 = vld [vmem:[%s8321_s11 + $0xb4] ss:$8 sps:$4 sm:$0xff]   ;;  %v5244_v45 = vld [vmem:[%s8321_s11 + $0xc0] ss:$8 sps:$4 sm:$0xff]   ;;  %v5246_v46 = vld [vmem:[%s8321_s11 + $0xc4] ss:$8 sps:$4 sm:$0xff]  }
 0x12d   :  { %v5247_v47 = vld [vmem:[%s8321_s11 + $0xd0] ss:$8 sps:$4 sm:$0xff]   ;;  %v5249_v48 = vld [vmem:[%s8321_s11 + $0xd4] ss:$8 sps:$4 sm:$0xff]   ;;  %v5252_v49 = vld [vmem:[%s8321_s11 + $0xe4] ss:$8 sps:$4 sm:$0xff]  }
 0x12e   :  { %v5250_v50 = vld [vmem:[%s8321_s11 + $0xe0] ss:$8 sps:$4 sm:$0xff]   ;;  %v5255_v51 = vld [vmem:[%s8321_s11 + $0xf4] ss:$8 sps:$4 sm:$0xff]   ;;  %v5253_v52 = vld [vmem:[%s8321_s11 + $0xf0] ss:$8 sps:$4 sm:$0xff]  }
 0x12f   :  { %1751 = vmatpush1.bf16.msra.mxu0 %v5217_v16  ;;  %v5258_v53 = vld [vmem:[%s8321_s11 + $0x104] ss:$8 sps:$4 sm:$0xff]   ;;  %v279_v58 = vld [vmem:[%s8325_s6] sm:$0xf] }
 0x130   :  { %4752 = vmatmul.mubr.msk.bf16.gmra.mrb[8].mxu0 %vm401_vm0, %v5194_v7  ;;  %4768 = vmatmul.mubr.msk.bf16.gmra.mrb[8].mxu1 %vm401_vm0, %v5194_v7  ;;  %v6628_v61 = vrot.slane %v279_v58, %v6613_v56  ;;  %v964_v62 = vld [vmem:[%s8328_s24] sm:$0xf]  ;;  %v6634_v1 = vrot.slane %v279_v58, %v6616_v57  ;;  %v6637_v2 = vrot.slane %v279_v58, %v6622_v59 }
 0x131   :  { %512 = vmatprep.mubr.bf16.mxu0 %v8298_v0  ;;  %705 = vmatprep.mubr.bf16.mxu1 %v8298_v0  ;;  %v6640_v3 = vrot.slane %v279_v58, %v6625_v60  ;;  %v6643_v5 = vrot.slane %v964_v62, %v6613_v56  ;;  %v6649_v7 = vrot.slane %v964_v62, %v6622_v59 }
 0x132   :  { %1752 = vmatprep.subr.bf16.mxu0 %v5222_v17 }
 0x133   :  { %1753 = vmatpush1.bf16.msra.mxu0 %v5220_v18 }
 0x134   :  { %1754 = vmatprep.subr.bf16.mxu0 %v5225_v20  ;;  %v6668_v20 = vrot.slane %v1114_v63, %v6625_v60 }
 0x137   :  { %1755 = vmatpush1.bf16.msra.mxu0 %v5223_v21 }
 0x138   :  { %4753 = vmatmul.mubr.msk.bf16.gmra.mrb[12].mxu0 %vm401_vm0, %v5195_v13  ;;  %4769 = vmatmul.mubr.msk.bf16.gmra.mrb[12].mxu1 %vm401_vm0, %v5195_v13  ;;  %v6657_v13 = vrot.slane %v964_v62, %v6616_v57 }
 0x139   :  { %522 = vmatprep.mubr.bf16.mxu0 %v8298_v0  ;;  %715 = vmatprep.mubr.bf16.mxu1 %v8298_v0 }
 0x13a   :  { %1756 = vmatprep.subr.bf16.mxu0 %v5228_v31 }
 0x13b   :  { %1757 = vmatpush1.bf16.msra.mxu0 %v5226_v30 }
 0x13c   :  { %1758 = vmatprep.subr.bf16.mxu0 %v5231_v33 }
 0x13f   :  { %1759 = vmatpush1.bf16.msra.mxu0 %v5229_v32 }
 0x140   :  { %4754 = vmatmul.mubr.msk.bf16.gmra.mrb[16].mxu0 %vm401_vm0, %v5196_v19  ;;  %4770 = vmatmul.mubr.msk.bf16.gmra.mrb[16].mxu1 %vm401_vm0, %v5196_v19  ;;  %v6665_v19 = vrot.slane %v964_v62, %v6625_v60 }
 0x141   :  { %532 = vmatprep.mubr.bf16.mxu0 %v8298_v0  ;;  %725 = vmatprep.mubr.bf16.mxu1 %v8298_v0 }
 0x142   :  { %1760 = vmatprep.subr.bf16.mxu0 %v5234_v36 }
 0x143   :  { %1761 = vmatpush1.bf16.msra.mxu0 %v5232_v35 }
 0x144   :  { %1762 = vmatprep.subr.bf16.mxu0 %v5237_v39 }
 0x147   :  { %1763 = vmatpush1.bf16.msra.mxu0 %v5235_v38 }
 0x148   :  { %4755 = vmatmul.mubr.msk.bf16.gmra.mrb[20].mxu0 %vm401_vm0, %v5197_v22  ;;  %4771 = vmatmul.mubr.msk.bf16.gmra.mrb[20].mxu1 %vm401_vm0, %v5197_v22 }
 0x149   :  { %542 = vmatprep.mubr.bf16.mxu0 %v8298_v0  ;;  %735 = vmatprep.mubr.bf16.mxu1 %v8298_v0 }
 0x14a   :  { %1764 = vmatprep.subr.bf16.mxu0 %v5240_v42 }
 0x14b   :  { %1765 = vmatpush1.bf16.msra.mxu0 %v5238_v41 }
 0x14c   :  { %1766 = vmatprep.subr.bf16.mxu0 %v5243_v44 }
 0x14f   :  { %1767 = vmatpush1.bf16.msra.mxu0 %v5241_v43 }
 0x150   :  { %4756 = vmatmul.mubr.msk.bf16.gmra.mrb[24].mxu0 %vm401_vm0, %v5198_v23  ;;  %4772 = vmatmul.mubr.msk.bf16.gmra.mrb[24].mxu1 %vm401_vm0, %v5198_v23 }
 0x151   :  { %552 = vmatprep.mubr.bf16.mxu0 %v8298_v0  ;;  %745 = vmatprep.mubr.bf16.mxu1 %v8298_v0 }
 0x152   :  { %1768 = vmatprep.subr.bf16.mxu0 %v5246_v46 }
 0x153   :  { %1769 = vmatpush1.bf16.msra.mxu0 %v5244_v45 }
 0x154   :  { %1770 = vmatprep.subr.bf16.mxu0 %v5249_v48 }
 0x157   :  { %1771 = vmatpush1.bf16.msra.mxu0 %v5247_v47 }
 0x158   :  { %4757 = vmatmul.mubr.msk.bf16.gmra.mrb[28].mxu0 %vm401_vm0, %v5199_v24  ;;  %4773 = vmatmul.mubr.msk.bf16.gmra.mrb[28].mxu1 %vm401_vm0, %v5199_v24 }
 0x159   :  { %562 = vmatprep.mubr.bf16.mxu0 %v8298_v0  ;;  %755 = vmatprep.mubr.bf16.mxu1 %v8298_v0 }
 0x15a   :  { %1772 = vmatprep.subr.bf16.mxu0 %v5252_v49 }
 0x15b   :  { %1773 = vmatpush1.bf16.msra.mxu0 %v5250_v50 }
 0x15c   :  { %1774 = vmatprep.subr.bf16.mxu0 %v5255_v51 }
 0x15f   :  { %1775 = vmatpush1.bf16.msra.mxu0 %v5253_v52 }
 0x160   :  { %4758 = vmatmul.mubr.msk.bf16.gmra.mrb[32].mxu0 %vm401_vm0, %v5200_v25  ;;  %4774 = vmatmul.mubr.msk.bf16.gmra.mrb[32].mxu1 %vm401_vm0, %v5200_v25 }
 0x161   :  { %572 = vmatprep.mubr.bf16.mxu0 %v8298_v0  ;;  %765 = vmatprep.mubr.bf16.mxu1 %v8298_v0 }
 0x162   :  { %1857 = vmatprep.subr.bf16.mxu0 %v5258_v53 }
 0x168   :  { %4759 = vmatmul.mubr.msk.bf16.gmra.mrb[36].mxu0 %vm401_vm0, %v5201_v26  ;;  %4775 = vmatmul.mubr.msk.bf16.gmra.mrb[36].mxu1 %vm401_vm0, %v5201_v26 }
 0x169   :  { %582 = vmatprep.mubr.bf16.mxu0 %v8298_v0  ;;  %775 = vmatprep.mubr.bf16.mxu1 %v8298_v0 }
 0x170   :  { %4760 = vmatmul.mubr.msk.bf16.gmra.mrb[40].mxu0 %vm401_vm0, %v5202_v27  ;;  %4776 = vmatmul.mubr.msk.bf16.gmra.mrb[40].mxu1 %vm401_vm0, %v5202_v27 }
 0x171   :  { %592 = vmatprep.mubr.bf16.mxu0 %v8298_v0  ;;  %785 = vmatprep.mubr.bf16.mxu1 %v8298_v0 }
 0x178   :  { %4761 = vmatmul.mubr.msk.bf16.gmra.mrb[44].mxu0 %vm401_vm0, %v5203_v28  ;;  %4777 = vmatmul.mubr.msk.bf16.gmra.mrb[44].mxu1 %vm401_vm0, %v5203_v28 }
 0x179   :  { %602 = vmatprep.mubr.bf16.mxu0 %v8298_v0  ;;  %795 = vmatprep.mubr.bf16.mxu1 %v8298_v0 }
 0x180   :  { %4762 = vmatmul.mubr.msk.bf16.gmra.mrb[48].mxu0 %vm401_vm0, %v5204_v29  ;;  %4778 = vmatmul.mubr.msk.bf16.gmra.mrb[48].mxu1 %vm401_vm0, %v5204_v29 }
 0x181   :  { %612 = vmatprep.mubr.bf16.mxu0 %v8298_v0  ;;  %805 = vmatprep.mubr.bf16.mxu1 %v8298_v0 }
 0x188   :  { %4763 = vmatmul.mubr.msk.bf16.gmra.mrb[52].mxu0 %vm401_vm0, %v5205_v34  ;;  %4779 = vmatmul.mubr.msk.bf16.gmra.mrb[52].mxu1 %vm401_vm0, %v5205_v34 }
 0x189   :  { %622 = vmatprep.mubr.bf16.mxu0 %v8298_v0  ;;  %815 = vmatprep.mubr.bf16.mxu1 %v8298_v0 }
 0x190   :  { %4764 = vmatmul.mubr.msk.bf16.gmra.mrb[56].mxu0 %vm401_vm0, %v5206_v37  ;;  %4780 = vmatmul.mubr.msk.bf16.gmra.mrb[56].mxu1 %vm401_vm0, %v5206_v37 }
 0x191   :  { %632 = vmatprep.mubr.bf16.mxu0 %v8298_v0  ;;  %825 = vmatprep.mubr.bf16.mxu1 %v8298_v0 }
 0x198   :  { %4765 = vmatmul.mubr.msk.bf16.gmra.mrb[60].mxu0 %vm401_vm0, %v5207_v40  ;;  %4781 = vmatmul.mubr.msk.bf16.gmra.mrb[60].mxu1 %vm401_vm0, %v5207_v40 }
 0x1f3   :  { %v484_v4 = vpop.f32.mrb[0].mxu0  ;;  %v677_v9 = vpop.f32.mrb[0].mxu1 }
 0x1f4   :  { %v485_v10 = vadd.f32 %v484_v4, %v6628_v61  ;;  %v486_v11 = vpop.f32.mrb[1].mxu0  ;;  %v678_v12 = vadd.f32 %v677_v9, %v6634_v1  ;;  %v679_v15 = vpop.f32.mrb[1].mxu1 }
 0x1f5   :  { %v487_v16 = vadd.f32 %v486_v11, %v6637_v2  ;;  %v488_v17 = vpop.f32.mrb[2].mxu0  ;;  %v680_v18 = vadd.f32 %v679_v15, %v6640_v3  ;;  %v681_v21 = vpop.f32.mrb[2].mxu1 }
 0x1f6   :  { %v836_v22 = vmax.f32 %v485_v10, 0.0  ;;  %v489_v23 = vadd.f32 %v488_v17, %v6628_v61  ;;  %v490_v24 = vpop.f32.mrb[3].mxu0  ;;  %v838_v25 = vmax.f32 %v678_v12, 0.0  ;;  %v682_v26 = vadd.f32 %v681_v21, %v6634_v1  ;;  %v683_v27 = vpop.f32.mrb[3].mxu1 }
 0x1f7   :  { %v837_v28 = vmax.f32 %v487_v16, 0.0  ;;  %v491_v29 = vadd.f32 %v490_v24, %v6637_v2  ;;  %v839_v30 = vmax.f32 %v680_v18, 0.0  ;;  %v684_v31 = vadd.f32 %v683_v27, %v6640_v3 }
 0x1f8   :  { %v986_v32 = vmul.f32 %v6643_v5, %v836_v22  ;;  %v840_v33 = vmax.f32 %v489_v23, 0.0  ;;  %v988_v34 = vmul.f32 %v6657_v13, %v838_v25  ;;  %v842_v35 = vmax.f32 %v682_v26, 0.0 }
 0x1f9   :  { %v987_v36 = vmul.f32 %v6649_v7, %v837_v28  ;;  %v841_v37 = vmax.f32 %v491_v29, 0.0  ;;  %v989_v38 = vmul.f32 %v6665_v19, %v839_v30  ;;  %v843_v39 = vmax.f32 %v684_v31, 0.0 }
 0x1fa   :  { %v6679_v40 = vadd.f32 %v6646_v6, %v986_v32  ;;  %v990_v41 = vmul.f32 %v6643_v5, %v840_v33  ;;  %v6683_v42 = vadd.f32 %v6660_v14, %v988_v34  ;;  %v992_v43 = vmul.f32 %v6657_v13, %v842_v35 }
 0x1fb   :  { %v6687_v44 = vadd.f32 %v6652_v8, %v987_v36  ;;  %v991_v45 = vmul.f32 %v6649_v7, %v841_v37  ;;  %v494_v46 = vpop.f32.mrb[4].mxu0  ;;  %v6691_v47 = vadd.f32 %v6668_v20, %v989_v38  ;;  %v993_v48 = vmul.f32 %v6665_v19, %v843_v39  ;;  %v687_v49 = vpop.f32.mrb[4].mxu1 }
 0x1fc   :  { %v6695_v50 = vadd.f32 %v6646_v6, %v990_v41  ;;  %v495_v51 = vadd.f32 %v494_v46, %v6628_v61  ;;  %v496_v52 = vpop.f32.mrb[5].mxu0  ;;  %v6699_v53 = vadd.f32 %v6660_v14, %v992_v43  ;;  %v688_v54 = vadd.f32 %v687_v49, %v6634_v1  ;;  %v689_v58 = vpop.f32.mrb[5].mxu1 }
 0x1fd   :  { %8329 = vst [vmem:[#allocation41_spill] sm:$0xff] %v6691_v47  ;;  %v6703_v62 = vadd.f32 %v6652_v8, %v991_v45  ;;  %v497_v63 = vadd.f32 %v496_v52, %v6637_v2  ;;  %v498_v4 = vpop.f32.mrb[6].mxu0  ;;  %v6707_v9 = vadd.f32 %v6668_v20, %v993_v48  ;;  %v690_v10 = vadd.f32 %v689_v58, %v6640_v3  ;;  %v691_v11 = vpop.f32.mrb[6].mxu1 }
 0x1fe   :  { %v844_v12 = vmax.f32 %v495_v51, 0.0  ;;  %v499_v15 = vadd.f32 %v498_v4, %v6628_v61  ;;  %v500_v16 = vpop.f32.mrb[7].mxu0  ;;  %v846_v17 = vmax.f32 %v688_v54, 0.0  ;;  %v692_v18 = vadd.f32 %v691_v11, %v6634_v1  ;;  %v693_v21 = vpop.f32.mrb[7].mxu1 }
 0x1ff   :  { %8330 = vst [vmem:[#allocation42_spill] sm:$0xff] %v6707_v9  ;;  %v845_v22 = vmax.f32 %v497_v63, 0.0  ;;  %v501_v23 = vadd.f32 %v500_v16, %v6637_v2  ;;  %v847_v24 = vmax.f32 %v690_v10, 0.0  ;;  %v694_v25 = vadd.f32 %v693_v21, %v6640_v3 }
 0x200   :  { %v994_v26 = vmul.f32 %v6643_v5, %v844_v12  ;;  %v848_v27 = vmax.f32 %v499_v15, 0.0  ;;  %v996_v28 = vmul.f32 %v6657_v13, %v846_v17  ;;  %v850_v29 = vmax.f32 %v692_v18, 0.0 }
 0x201   :  { %v995_v30 = vmul.f32 %v6649_v7, %v845_v22  ;;  %v849_v31 = vmax.f32 %v501_v23, 0.0  ;;  %v997_v32 = vmul.f32 %v6665_v19, %v847_v24  ;;  %v851_v33 = vmax.f32 %v694_v25, 0.0 }
 0x202   :  { %v6719_v34 = vadd.f32 %v6646_v6, %v994_v26  ;;  %v998_v35 = vmul.f32 %v6643_v5, %v848_v27  ;;  %v6723_v36 = vadd.f32 %v6660_v14, %v996_v28  ;;  %v1000_v37 = vmul.f32 %v6657_v13, %v850_v29 }
 0x203   :  { %v6727_v38 = vadd.f32 %v6652_v8, %v995_v30  ;;  %v999_v39 = vmul.f32 %v6649_v7, %v849_v31  ;;  %v504_v41 = vpop.f32.mrb[8].mxu0  ;;  %v6731_v43 = vadd.f32 %v6668_v20, %v997_v32  ;;  %v1001_v45 = vmul.f32 %v6665_v19, %v851_v33  ;;  %v697_v46 = vpop.f32.mrb[8].mxu1 }
 0x204   :  { %8331 = vst [vmem:[#allocation43_spill] sm:$0xff] %v6723_v36  ;;  %v6735_v48 = vadd.f32 %v6646_v6, %v998_v35  ;;  %v505_v49 = vadd.f32 %v504_v41, %v6628_v61  ;;  %v506_v51 = vpop.f32.mrb[9].mxu0  ;;  %v6739_v52 = vadd.f32 %v6660_v14, %v1000_v37  ;;  %v698_v54 = vadd.f32 %v697_v46, %v6634_v1  ;;  %v699_v58 = vpop.f32.mrb[9].mxu1 }
 0x205   :  { %8332 = vst [vmem:[#allocation44_spill] sm:$0xff] %v6731_v43  ;;  %v6743_v63 = vadd.f32 %v6652_v8, %v999_v39  ;;  %v507_v4 = vadd.f32 %v506_v51, %v6637_v2  ;;  %v508_v10 = vpop.f32.mrb[10].mxu0  ;;  %v6747_v11 = vadd.f32 %v6668_v20, %v1001_v45  ;;  %v700_v12 = vadd.f32 %v699_v58, %v6640_v3  ;;  %v701_v15 = vpop.f32.mrb[10].mxu1 }
 0x206   :  { %8333 = vst [vmem:[#allocation45_spill] sm:$0xff] %v6739_v52  ;;  %v852_v16 = vmax.f32 %v505_v49, 0.0  ;;  %v509_v17 = vadd.f32 %v508_v10, %v6628_v61  ;;  %v510_v18 = vpop.f32.mrb[11].mxu0  ;;  %v854_v21 = vmax.f32 %v698_v54, 0.0  ;;  %v702_v22 = vadd.f32 %v701_v15, %v6634_v1  ;;  %v703_v23 = vpop.f32.mrb[11].mxu1 }
 0x207   :  { %8334 = vst [vmem:[#allocation46_spill] sm:$0xff] %v6747_v11  ;;  %v853_v24 = vmax.f32 %v507_v4, 0.0  ;;  %v511_v25 = vadd.f32 %v510_v18, %v6637_v2  ;;  %v855_v26 = vmax.f32 %v700_v12, 0.0  ;;  %v704_v27 = vadd.f32 %v703_v23, %v6640_v3 }
 0x208   :  { %v1002_v28 = vmul.f32 %v6643_v5, %v852_v16  ;;  %v856_v29 = vmax.f32 %v509_v17, 0.0  ;;  %v1004_v30 = vmul.f32 %v6657_v13, %v854_v21  ;;  %v858_v31 = vmax.f32 %v702_v22, 0.0 }
 0x209   :  { %v1003_v32 = vmul.f32 %v6649_v7, %v853_v24  ;;  %v857_v33 = vmax.f32 %v511_v25, 0.0  ;;  %v1005_v35 = vmul.f32 %v6665_v19, %v855_v26  ;;  %v859_v37 = vmax.f32 %v704_v27, 0.0 }
 0x20a   :  { %v6759_v39 = vadd.f32 %v6646_v6, %v1002_v28  ;;  %v1006_v41 = vmul.f32 %v6643_v5, %v856_v29  ;;  %v6763_v45 = vadd.f32 %v6660_v14, %v1004_v30  ;;  %v1008_v46 = vmul.f32 %v6657_v13, %v858_v31 }
 0x20b   :  { %v6767_v49 = vadd.f32 %v6652_v8, %v1003_v32  ;;  %v1007_v51 = vmul.f32 %v6649_v7, %v857_v33  ;;  %v514_v54 = vpop.f32.mrb[12].mxu0  ;;  %v6771_v58 = vadd.f32 %v6668_v20, %v1005_v35  ;;  %v1009_v4 = vmul.f32 %v6665_v19, %v859_v37  ;;  %v707_v10 = vpop.f32.mrb[12].mxu1 }
 0x20c   :  { %8335 = vst [vmem:[#allocation47_spill] sm:$0xff] %v6763_v45  ;;  %v6775_v12 = vadd.f32 %v6646_v6, %v1006_v41  ;;  %v515_v15 = vadd.f32 %v514_v54, %v6628_v61  ;;  %v516_v16 = vpop.f32.mrb[13].mxu0  ;;  %v6779_v17 = vadd.f32 %v6660_v14, %v1008_v46  ;;  %v708_v18 = vadd.f32 %v707_v10, %v6634_v1  ;;  %v709_v21 = vpop.f32.mrb[13].mxu1 }
 0x20d   :  { %8336 = vst [vmem:[#allocation48_spill] sm:$0xff] %v6771_v58  ;;  %v6783_v22 = vadd.f32 %v6652_v8, %v1007_v51  ;;  %v517_v23 = vadd.f32 %v516_v16, %v6637_v2  ;;  %v518_v24 = vpop.f32.mrb[14].mxu0  ;;  %v6787_v25 = vadd.f32 %v6668_v20, %v1009_v4  ;;  %v710_v26 = vadd.f32 %v709_v21, %v6640_v3  ;;  %v711_v27 = vpop.f32.mrb[14].mxu1 }
 0x20e   :  { %8337 = vst [vmem:[#allocation49_spill] sm:$0xff] %v6779_v17  ;;  %v860_v28 = vmax.f32 %v515_v15, 0.0  ;;  %v519_v29 = vadd.f32 %v518_v24, %v6628_v61  ;;  %v520_v30 = vpop.f32.mrb[15].mxu0  ;;  %v862_v31 = vmax.f32 %v708_v18, 0.0  ;;  %v712_v32 = vadd.f32 %v711_v27, %v6634_v1  ;;  %v713_v33 = vpop.f32.mrb[15].mxu1 }
 0x20f   :  { %8338 = vst [vmem:[#allocation50_spill] sm:$0xff] %v6787_v25  ;;  %v861_v35 = vmax.f32 %v517_v23, 0.0  ;;  %v521_v37 = vadd.f32 %v520_v30, %v6637_v2  ;;  %v863_v41 = vmax.f32 %v710_v26, 0.0  ;;  %v714_v46 = vadd.f32 %v713_v33, %v6640_v3 }
 0x210   :  { %v1010_v51 = vmul.f32 %v6643_v5, %v860_v28  ;;  %v864_v54 = vmax.f32 %v519_v29, 0.0  ;;  %v1012_v4 = vmul.f32 %v6657_v13, %v862_v31  ;;  %v866_v10 = vmax.f32 %v712_v32, 0.0 }
 0x211   :  { %v1011_v15 = vmul.f32 %v6649_v7, %v861_v35  ;;  %v865_v16 = vmax.f32 %v521_v37, 0.0  ;;  %v1013_v18 = vmul.f32 %v6665_v19, %v863_v41  ;;  %v867_v21 = vmax.f32 %v714_v46, 0.0 }
 0x212   :  { %v6799_v24 = vadd.f32 %v6646_v6, %v1010_v51  ;;  %v1014_v23 = vmul.f32 %v6643_v5, %v864_v54  ;;  %v6803_v26 = vadd.f32 %v6660_v14, %v1012_v4  ;;  %v1016_v27 = vmul.f32 %v6657_v13, %v866_v10 }
 0x213   :  { %v6807_v28 = vadd.f32 %v6652_v8, %v1011_v15  ;;  %v1015_v29 = vmul.f32 %v6649_v7, %v865_v16  ;;  %v524_v30 = vpop.f32.mrb[16].mxu0  ;;  %v6811_v31 = vadd.f32 %v6668_v20, %v1013_v18  ;;  %v1017_v32 = vmul.f32 %v6665_v19, %v867_v21  ;;  %v717_v33 = vpop.f32.mrb[16].mxu1 }
 0x214   :  { %8339 = vst [vmem:[#allocation51_spill] sm:$0xff] %v6803_v26  ;;  %v6815_v35 = vadd.f32 %v6646_v6, %v1014_v23  ;;  %v525_v37 = vadd.f32 %v524_v30, %v6628_v61  ;;  %v526_v41 = vpop.f32.mrb[17].mxu0  ;;  %v6819_v46 = vadd.f32 %v6660_v14, %v1016_v27  ;;  %v718_v51 = vadd.f32 %v717_v33, %v6634_v1  ;;  %v719_v54 = vpop.f32.mrb[17].mxu1 }
 0x215   :  { %8340 = vst [vmem:[#allocation52_spill] sm:$0xff] %v6811_v31  ;;  %v6823_v4 = vadd.f32 %v6652_v8, %v1015_v29  ;;  %v527_v10 = vadd.f32 %v526_v41, %v6637_v2  ;;  %v528_v15 = vpop.f32.mrb[18].mxu0  ;;  %v6827_v16 = vadd.f32 %v6668_v20, %v1017_v32  ;;  %v720_v18 = vadd.f32 %v719_v54, %v6640_v3  ;;  %v721_v21 = vpop.f32.mrb[18].mxu1 }
 0x216   :  { %8341 = vst [vmem:[#allocation53_spill] sm:$0xff] %v6819_v46  ;;  %v868_v23 = vmax.f32 %v525_v37, 0.0  ;;  %v529_v30 = vadd.f32 %v528_v15, %v6628_v61  ;;  %v530_v27 = vpop.f32.mrb[19].mxu0  ;;  %v870_v0 = vmax.f32 %v718_v51, 0.0  ;;  %v722_v33 = vadd.f32 %v721_v21, %v6634_v1  ;;  %v723_v60 = vpop.f32.mrb[19].mxu1 }
 0x217   :  { %8342 = vst [vmem:[#allocation54_spill] sm:$0xff] %v6827_v16  ;;  %v869_v57 = vmax.f32 %v527_v10, 0.0  ;;  %v531_v29 = vadd.f32 %v530_v27, %v6637_v2  ;;  %v871_v59 = vmax.f32 %v720_v18, 0.0  ;;  %v724_v41 = vadd.f32 %v723_v60, %v6640_v3 }
 0x218   :  { %v1018_v32 = vmul.f32 %v6643_v5, %v868_v23  ;;  %v872_v56 = vmax.f32 %v529_v30, 0.0  ;;  %v1020_v54 = vmul.f32 %v6657_v13, %v870_v0  ;;  %v874_v55 = vmax.f32 %v722_v33, 0.0 }
 0x219   :  { %v1019_v37 = vmul.f32 %v6649_v7, %v869_v57  ;;  %v873_v15 = vmax.f32 %v531_v29, 0.0  ;;  %v1021_v51 = vmul.f32 %v6665_v19, %v871_v59  ;;  %v875_v46 = vmax.f32 %v724_v41, 0.0 }
 0x21a   :  { %v6839_v21 = vadd.f32 %v6646_v6, %v1018_v32  ;;  %v1022_v10 = vmul.f32 %v6643_v5, %v872_v56  ;;  %v6843_v18 = vadd.f32 %v6660_v14, %v1020_v54  ;;  %v1024_v60 = vmul.f32 %v6657_v13, %v874_v55 }
 0x21b   :  { %v6847_v23 = vadd.f32 %v6652_v8, %v1019_v37  ;;  %v1023_v0 = vmul.f32 %v6649_v7, %v873_v15  ;;  %v534_v57 = vpop.f32.mrb[20].mxu0  ;;  %v6851_v30 = vadd.f32 %v6668_v20, %v1021_v51  ;;  %v1025_v59 = vmul.f32 %v6665_v19, %v875_v46  ;;  %v727_v27 = vpop.f32.mrb[20].mxu1 }
 0x21c   :  { %8343 = vst [vmem:[#allocation55_spill] sm:$0xff] %v6843_v18  ;;  %v6855_v33 = vadd.f32 %v6646_v6, %v1022_v10  ;;  %v535_v56 = vadd.f32 %v534_v57, %v6628_v61  ;;  %v536_v29 = vpop.f32.mrb[21].mxu0  ;;  %v6859_v55 = vadd.f32 %v6660_v14, %v1024_v60  ;;  %v728_v41 = vadd.f32 %v727_v27, %v6634_v1  ;;  %v729_v32 = vpop.f32.mrb[21].mxu1 }
 0x21d   :  { %8344 = vst [vmem:[#allocation56_spill] sm:$0xff] %v6851_v30  ;;  %v6863_v54 = vadd.f32 %v6652_v8, %v1023_v0  ;;  %v537_v37 = vadd.f32 %v536_v29, %v6637_v2  ;;  %v538_v15 = vpop.f32.mrb[22].mxu0  ;;  %v6867_v46 = vadd.f32 %v6668_v20, %v1025_v59  ;;  %v730_v51 = vadd.f32 %v729_v32, %v6640_v3  ;;  %v731_v10 = vpop.f32.mrb[22].mxu1 }
 0x21e   :  { %8345 = vst [vmem:[#allocation57_spill] sm:$0xff] %v6859_v55  ;;  %v876_v57 = vmax.f32 %v535_v56, 0.0  ;;  %v539_v18 = vadd.f32 %v538_v15, %v6628_v61  ;;  %v540_v60 = vpop.f32.mrb[23].mxu0  ;;  %v878_v55 = vmax.f32 %v728_v41, 0.0  ;;  %v732_v27 = vadd.f32 %v731_v10, %v6634_v1  ;;  %v733_v30 = vpop.f32.mrb[23].mxu1 }
 0x21f   :  { %8346 = vst [vmem:[#allocation58_spill] sm:$0xff] %v6867_v46  ;;  %v877_v26 = vmax.f32 %v537_v37, 0.0  ;;  %v541_v0 = vadd.f32 %v540_v60, %v6637_v2  ;;  %v879_v16 = vmax.f32 %v730_v51, 0.0  ;;  %v734_v29 = vadd.f32 %v733_v30, %v6640_v3 }
 0x220   :  { %v1026_v59 = vmul.f32 %v6643_v5, %v876_v57  ;;  %v880_v46 = vmax.f32 %v539_v18, 0.0  ;;  %v1028_v32 = vmul.f32 %v6657_v13, %v878_v55  ;;  %v882_v31 = vmax.f32 %v732_v27, 0.0 }
 0x221   :  { %v1027_v56 = vmul.f32 %v6649_v7, %v877_v26  ;;  %v881_v15 = vmax.f32 %v541_v0, 0.0  ;;  %v1029_v41 = vmul.f32 %v6665_v19, %v879_v16  ;;  %v883_v17 = vmax.f32 %v734_v29, 0.0 }
 0x222   :  { %v6879_v10 = vadd.f32 %v6646_v6, %v1026_v59  ;;  %v1030_v37 = vmul.f32 %v6643_v5, %v880_v46  ;;  %v6883_v51 = vadd.f32 %v6660_v14, %v1028_v32  ;;  %v1032_v30 = vmul.f32 %v6657_v13, %v882_v31 }
 0x223   :  { %v6887_v18 = vadd.f32 %v6652_v8, %v1027_v56  ;;  %v1031_v55 = vmul.f32 %v6649_v7, %v881_v15  ;;  %v544_v26 = vpop.f32.mrb[24].mxu0  ;;  %v6891_v57 = vadd.f32 %v6668_v20, %v1029_v41  ;;  %v1033_v16 = vmul.f32 %v6665_v19, %v883_v17  ;;  %v737_v60 = vpop.f32.mrb[24].mxu1 }
 0x224   :  { %8347 = vst [vmem:[#allocation59_spill] sm:$0xff] %v6883_v51  ;;  %v6895_v27 = vadd.f32 %v6646_v6, %v1030_v37  ;;  %v545_v46 = vadd.f32 %v544_v26, %v6628_v61  ;;  %v546_v0 = vpop.f32.mrb[25].mxu0  ;;  %v6899_v31 = vadd.f32 %v6660_v14, %v1032_v30  ;;  %v738_v29 = vadd.f32 %v737_v60, %v6634_v1  ;;  %v739_v59 = vpop.f32.mrb[25].mxu1 }
 0x225   :  { %8348 = vst [vmem:[#allocation60_spill] sm:$0xff] %v6891_v57  ;;  %v6903_v32 = vadd.f32 %v6652_v8, %v1031_v55  ;;  %v547_v56 = vadd.f32 %v546_v0, %v6637_v2  ;;  %v548_v15 = vpop.f32.mrb[26].mxu0  ;;  %v6907_v17 = vadd.f32 %v6668_v20, %v1033_v16  ;;  %v740_v41 = vadd.f32 %v739_v59, %v6640_v3  ;;  %v741_v37 = vpop.f32.mrb[26].mxu1 }
 0x226   :  { %8349 = vst [vmem:[#allocation61_spill] sm:$0xff] %v6899_v31  ;;  %v884_v26 = vmax.f32 %v545_v46, 0.0  ;;  %v549_v51 = vadd.f32 %v548_v15, %v6628_v61  ;;  %v550_v30 = vpop.f32.mrb[27].mxu0  ;;  %v886_v31 = vmax.f32 %v738_v29, 0.0  ;;  %v742_v60 = vadd.f32 %v741_v37, %v6634_v1  ;;  %v743_v57 = vpop.f32.mrb[27].mxu1 }
 0x227   :  { %8350 = vst [vmem:[#allocation62_spill] sm:$0xff] %v6907_v17  ;;  %v885_v45 = vmax.f32 %v547_v56, 0.0  ;;  %v551_v55 = vadd.f32 %v550_v30, %v6637_v2  ;;  %v887_v25 = vmax.f32 %v740_v41, 0.0  ;;  %v744_v0 = vadd.f32 %v743_v57, %v6640_v3 }
 0x228   :  { %v1034_v16 = vmul.f32 %v6643_v5, %v884_v26  ;;  %v888_v17 = vmax.f32 %v549_v51, 0.0  ;;  %v1036_v59 = vmul.f32 %v6657_v13, %v886_v31  ;;  %v890_v58 = vmax.f32 %v742_v60, 0.0 }
 0x229   :  { %v1035_v46 = vmul.f32 %v6649_v7, %v885_v45  ;;  %v889_v15 = vmax.f32 %v551_v55, 0.0  ;;  %v1037_v29 = vmul.f32 %v6665_v19, %v887_v25  ;;  %v891_v52 = vmax.f32 %v744_v0, 0.0 }
 0x22a   :  { %v6919_v37 = vadd.f32 %v6646_v6, %v1034_v16  ;;  %v1038_v56 = vmul.f32 %v6643_v5, %v888_v17  ;;  %v6923_v41 = vadd.f32 %v6660_v14, %v1036_v59  ;;  %v1040_v57 = vmul.f32 %v6657_v13, %v890_v58 }
 0x22b   :  { %v6927_v51 = vadd.f32 %v6652_v8, %v1035_v46  ;;  %v1039_v31 = vmul.f32 %v6649_v7, %v889_v15  ;;  %v554_v45 = vpop.f32.mrb[28].mxu0  ;;  %v6931_v26 = vadd.f32 %v6668_v20, %v1037_v29  ;;  %v1041_v25 = vmul.f32 %v6665_v19, %v891_v52  ;;  %v747_v30 = vpop.f32.mrb[28].mxu1 }
 0x22c   :  { %8351 = vst [vmem:[#allocation63_spill] sm:$0xff] %v6919_v37  ;;  %8352 = vst [vmem:[#allocation64_spill] sm:$0xff] %v6923_v41  ;;  %v6935_v60 = vadd.f32 %v6646_v6, %v1038_v56  ;;  %v555_v17 = vadd.f32 %v554_v45, %v6628_v61  ;;  %v556_v55 = vpop.f32.mrb[29].mxu0  ;;  %v6939_v58 = vadd.f32 %v6660_v14, %v1040_v57  ;;  %v749_v16 = vpop.f32.mrb[29].mxu1 }
 0x22d   :  { %8353 = vst [vmem:[#allocation65_spill] sm:$0xff] %v6931_v26  ;;  %v748_v0 = vadd.f32 %v747_v30, %v6634_v1  ;;  %v6943_v59 = vadd.f32 %v6652_v8, %v1039_v31  ;;  %v557_v46 = vadd.f32 %v556_v55, %v6637_v2  ;;  %v558_v15 = vpop.f32.mrb[30].mxu0  ;;  %v6947_v52 = vadd.f32 %v6668_v20, %v1041_v25  ;;  %v751_v56 = vpop.f32.mrb[30].mxu1 }
 0x22e   :  { %8354 = vst [vmem:[#allocation66_spill] sm:$0xff] %v6935_v60  ;;  %8355 = vst [vmem:[#allocation67_spill] sm:$0xff] %v6939_v58  ;;  %v750_v29 = vadd.f32 %v749_v16, %v6640_v3  ;;  %v892_v45 = vmax.f32 %v555_v17, 0.0  ;;  %v559_v41 = vadd.f32 %v558_v15, %v6628_v61  ;;  %v560_v57 = vpop.f32.mrb[31].mxu0  ;;  %v752_v30 = vadd.f32 %v751_v56, %v6634_v1  ;;  %v753_v26 = vpop.f32.mrb[31].mxu1 }
 0x22f   :  { %8356 = vst [vmem:[#allocation68_spill] sm:$0xff] %v6947_v52  ;;  %v894_v58 = vmax.f32 %v748_v0, 0.0  ;;  %v893_v36 = vmax.f32 %v557_v46, 0.0  ;;  %v561_v31 = vadd.f32 %v560_v57, %v6637_v2  ;;  %v754_v55 = vadd.f32 %v753_v26, %v6640_v3 }
 0x230   :  { %v895_v11 = vmax.f32 %v750_v29, 0.0  ;;  %v1042_v25 = vmul.f32 %v6643_v5, %v892_v45  ;;  %v896_v52 = vmax.f32 %v559_v41, 0.0  ;;  %v898_v43 = vmax.f32 %v752_v30, 0.0 }
 0x231   :  { %v1044_v16 = vmul.f32 %v6657_v13, %v894_v58  ;;  %v1043_v17 = vmul.f32 %v6649_v7, %v893_v36  ;;  %v897_v15 = vmax.f32 %v561_v31, 0.0  ;;  %v899_v9 = vmax.f32 %v754_v55, 0.0 }
 0x232   :  { %v1045_v0 = vmul.f32 %v6665_v19, %v895_v11  ;;  %v6959_v56 = vadd.f32 %v6646_v6, %v1042_v25  ;;  %v1046_v46 = vmul.f32 %v6643_v5, %v896_v52  ;;  %v1048_v26 = vmul.f32 %v6657_v13, %v898_v43 }
 0x233   :  { %v6963_v29 = vadd.f32 %v6660_v14, %v1044_v16  ;;  %v6967_v41 = vadd.f32 %v6652_v8, %v1043_v17  ;;  %v1047_v58 = vmul.f32 %v6649_v7, %v897_v15  ;;  %v1049_v11 = vmul.f32 %v6665_v19, %v899_v9  ;;  %v564_v45 = vpop.f32.mrb[32].mxu0  ;;  %v757_v57 = vpop.f32.mrb[32].mxu1 }
 0x234   :  { %8357 = vst [vmem:[#allocation69_spill] sm:$0xff] %v6959_v56  ;;  %v6971_v36 = vadd.f32 %v6668_v20, %v1045_v0  ;;  %v6975_v30 = vadd.f32 %v6646_v6, %v1046_v46  ;;  %v6978_v52 = vadd.f32 %v6660_v14, %v1048_v26  ;;  %v565_v43 = vadd.f32 %v564_v45, %v6628_v61  ;;  %v566_v55 = vpop.f32.mrb[33].mxu0  ;;  %v759_v25 = vpop.f32.mrb[33].mxu1 }
 0x235   :  { %8358 = vst [vmem:[#allocation70_spill] sm:$0xff] %v6963_v29  ;;  %8359 = vst [vmem:[#allocation71_spill] sm:$0xff] %v6967_v41  ;;  %v758_v31 = vadd.f32 %v757_v57, %v6634_v1  ;;  %v6983_v16 = vadd.f32 %v6652_v8, %v1047_v58  ;;  %v6986_v17 = vadd.f32 %v6668_v20, %v1049_v11  ;;  %v568_v0 = vpop.f32.mrb[34].mxu0  ;;  %v761_v46 = vpop.f32.mrb[34].mxu1 }
 0x236   :  { %8360 = vst [vmem:[#allocation72_spill] sm:$0xff] %v6971_v36  ;;  %8361 = vst [vmem:[#allocation73_spill] sm:$0xff] %v6975_v30  ;;  %v567_v9 = vadd.f32 %v566_v55, %v6637_v2  ;;  %v760_v15 = vadd.f32 %v759_v25, %v6640_v3  ;;  %v900_v26 = vmax.f32 %v565_v43, 0.0  ;;  %v569_v45 = vadd.f32 %v568_v0, %v6628_v61  ;;  %v570_v29 = vpop.f32.mrb[35].mxu0  ;;  %v763_v36 = vpop.f32.mrb[35].mxu1 }
 0x237   :  { %8362 = vst [vmem:[#allocation74_spill] sm:$0xff] %v6978_v52  ;;  %8363 = vst [vmem:[#allocation75_spill] sm:$0xff] %v6983_v16  ;;  %v902_v52 = vmax.f32 %v758_v31, 0.0  ;;  %v762_v57 = vadd.f32 %v761_v46, %v6634_v1  ;;  %v571_v16 = vadd.f32 %v570_v29, %v6637_v2  ;;  %v764_v11 = vadd.f32 %v763_v36, %v6640_v3 }
 0x238   :  { %8364 = vst [vmem:[#allocation76_spill] sm:$0xff] %v6986_v17  ;;  %v901_v47 = vmax.f32 %v567_v9, 0.0  ;;  %v903_v58 = vmax.f32 %v760_v15, 0.0  ;;  %v1050_v55 = vmul.f32 %v6643_v5, %v900_v26  ;;  %v904_v17 = vmax.f32 %v569_v45, 0.0 }
 0x239   :  { %v1052_v25 = vmul.f32 %v6657_v13, %v902_v52  ;;  %v906_v30 = vmax.f32 %v762_v57, 0.0  ;;  %v905_v0 = vmax.f32 %v571_v16, 0.0  ;;  %v907_v46 = vmax.f32 %v764_v11, 0.0 }
 0x23a   :  { %v1051_v43 = vmul.f32 %v6649_v7, %v901_v47  ;;  %v1053_v31 = vmul.f32 %v6665_v19, %v903_v58  ;;  %v1200_v56 = vadd.f32 %v6646_v6, %v1050_v55  ;;  %v1054_v29 = vmul.f32 %v6643_v5, %v904_v17 }
 0x23b   :  { %v1202_v9 = vadd.f32 %v6660_v14, %v1052_v25  ;;  %v1056_v36 = vmul.f32 %v6657_v13, %v906_v30  ;;  %v1055_v47 = vmul.f32 %v6649_v7, %v905_v0  ;;  %v1057_v26 = vmul.f32 %v6665_v19, %v907_v46  ;;  %v574_v16 = vpop.f32.mrb[36].mxu0  ;;  %v767_v45 = vpop.f32.mrb[36].mxu1 }
 0x23c   :  { %v7003_v15 = vadd.f32 %v6652_v8, %v1051_v43  ;;  %v7006_v52 = vadd.f32 %v6668_v20, %v1053_v31  ;;  %v1264_v57 = vmax.f32 %v6679_v40, %v1200_v56  ;;  %v1204_v17 = vadd.f32 %v6646_v6, %v1054_v29  ;;  %v576_v11 = vpop.f32.mrb[37].mxu0  ;;  %v769_v55 = vpop.f32.mrb[37].mxu1 }
 0x23d   :  { %v1266_v58 = vmax.f32 %v6683_v42, %v1202_v9  ;;  %v1206_v30 = vadd.f32 %v6660_v14, %v1056_v36  ;;  %v1205_v25 = vadd.f32 %v6652_v8, %v1055_v47  ;;  %v7016_v43 = vadd.f32 %v6668_v20, %v1057_v26  ;;  %v578_v46 = vpop.f32.mrb[38].mxu0 }
 0x23e   :  { %8365 = vst [vmem:[#allocation77_spill] sm:$0xff] %v7006_v52  ;;  %v575_v31 = vadd.f32 %v574_v16, %v6628_v61  ;;  %v768_v0 = vadd.f32 %v767_v45, %v6634_v1  ;;  %v771_v52 = vpop.f32.mrb[38].mxu1  ;;  %v1268_v40 = vmax.f32 %v6695_v50, %v1204_v17  ;;  %v577_v56 = vadd.f32 %v576_v11, %v6637_v2  ;;  %v580_v29 = vpop.f32.mrb[39].mxu0 }
 0x23f   :  { %8366 = vst [vmem:[#allocation78_spill] sm:$0xff] %v7016_v43  ;;  %v1270_v42 = vmax.f32 %v6699_v53, %v1206_v30  ;;  %v770_v9 = vadd.f32 %v769_v55, %v6640_v3  ;;  %v773_v36 = vpop.f32.mrb[39].mxu1  ;;  %v579_v26 = vadd.f32 %v578_v46, %v6628_v61  ;;  %v772_v16 = vadd.f32 %v771_v52, %v6634_v1 }
 0x240   :  { %v908_v47 = vmax.f32 %v575_v31, 0.0  ;;  %v910_v41 = vmax.f32 %v768_v0, 0.0  ;;  %v1328_v43 = vpack.c.bf16 %v1268_v40, %v1264_v57  ;;  %v909_v60 = vmax.f32 %v577_v56, 0.0 }
 0x241   :  { %v7026_v45 = vpack.c.bf16 %v1270_v42, %v1266_v58  ;;  %v911_v37 = vmax.f32 %v770_v9, 0.0  ;;  %v912_v17 = vmax.f32 %v579_v26, 0.0  ;;  %v914_v30 = vmax.f32 %v772_v16, 0.0 }
 0x242   :  { %v1058_v50 = vmul.f32 %v6643_v5, %v908_v47  ;;  %v1060_v53 = vmul.f32 %v6657_v13, %v910_v41  ;;  %v1059_v11 = vmul.f32 %v6649_v7, %v909_v60  ;;  %v581_v31 = vadd.f32 %v580_v29, %v6637_v2 }
 0x243   :  { %8367 = vst [vmem:[#allocation79_spill] sm:$0xff] %v7026_v45  ;;  %v1061_v55 = vmul.f32 %v6665_v19, %v911_v37  ;;  %v774_v0 = vadd.f32 %v773_v36, %v6640_v3  ;;  %v1062_v58 = vmul.f32 %v6643_v5, %v912_v17  ;;  %v1064_v41 = vmul.f32 %v6657_v13, %v914_v30  ;;  %v584_v46 = vpop.f32.mrb[40].mxu0  ;;  %v777_v40 = vpop.f32.mrb[40].mxu1 }
 0x244   :  { %v7035_v52 = vadd.f32 %v6646_v6, %v1058_v50  ;;  %v7038_v57 = vadd.f32 %v6660_v14, %v1060_v53  ;;  %v7043_v60 = vadd.f32 %v6652_v8, %v1059_v11  ;;  %v913_v42 = vmax.f32 %v581_v31, 0.0  ;;  %v586_v9 = vpop.f32.mrb[41].mxu0  ;;  %v779_v29 = vpop.f32.mrb[41].mxu1 }
 0x245   :  { %v7046_v37 = vadd.f32 %v6668_v20, %v1061_v55  ;;  %v915_v56 = vmax.f32 %v774_v0, 0.0  ;;  %v7049_v36 = vadd.f32 %v6646_v6, %v1062_v58  ;;  %v7052_v47 = vadd.f32 %v6660_v14, %v1064_v41  ;;  %v588_v50 = vpop.f32.mrb[42].mxu0  ;;  %v781_v53 = vpop.f32.mrb[42].mxu1 }
 0x246   :  { %8368 = vst [vmem:[#allocation80_spill] sm:$0xff] %v7038_v57  ;;  %v585_v26 = vadd.f32 %v584_v46, %v6628_v61  ;;  %v778_v16 = vadd.f32 %v777_v40, %v6634_v1  ;;  %v1063_v17 = vmul.f32 %v6649_v7, %v913_v42  ;;  %v1265_v11 = vmax.f32 %v6687_v44, %v7003_v15  ;;  %v590_v31 = vpop.f32.mrb[43].mxu0  ;;  %v783_v0 = vpop.f32.mrb[43].mxu1  ;;  %v5256_v44 = vld [vmem:[%s8321_s11 + $0x100] ss:$8 sps:$4 sm:$0xff]  }
 0x247   :  { %8369 = vst [vmem:[#allocation81_spill] sm:$0xff] %v7052_v47  ;;  %v1065_v30 = vmul.f32 %v6665_v19, %v915_v56  ;;  %v1269_v55 = vmax.f32 %v6703_v62, %v1205_v25  ;;  %v587_v45 = vadd.f32 %v586_v9, %v6637_v2  ;;  %v780_v46 = vadd.f32 %v779_v29, %v6640_v3  ;;  %v5261_v29 = vld [vmem:[%s8321_s11 + $0x114] ss:$8 sps:$4 sm:$0xff]  }
 0x248   :  { %v916_v58 = vmax.f32 %v585_v26, 0.0  ;;  %v918_v41 = vmax.f32 %v778_v16, 0.0  ;;  %v1213_v40 = vadd.f32 %v6652_v8, %v1063_v17  ;;  %v589_v62 = vadd.f32 %v588_v50, %v6628_v61 }
 0x249   :  { %v7065_v47 = vadd.f32 %v6668_v20, %v1065_v30  ;;  %v1329_v42 = vpack.c.bf16 %v1269_v55, %v1265_v11  ;;  %v917_v56 = vmax.f32 %v587_v45, 0.0  ;;  %v919_v9 = vmax.f32 %v780_v46, 0.0 }
 0x24a   :  { %v1066_v15 = vmul.f32 %v6643_v5, %v916_v58  ;;  %v1068_v25 = vmul.f32 %v6657_v13, %v918_v41  ;;  %v920_v26 = vmax.f32 %v589_v62, 0.0  ;;  %v782_v16 = vadd.f32 %v781_v53, %v6634_v1  ;;  %v5259_v58 = vld [vmem:[%s8321_s11 + $0x110] ss:$8 sps:$4 sm:$0xff]  }
 0x24b   :  { %8370 = vst [vmem:[#allocation82_spill] sm:$0xff] %v7065_v47  ;;  %1776 = vmatprep.mubr.bf16.mxu0 %v1329_v42  ;;  %v591_v17 = vadd.f32 %v590_v31, %v6637_v2  ;;  %v784_v30 = vadd.f32 %v783_v0, %v6640_v3  ;;  %v1067_v45 = vmul.f32 %v6649_v7, %v917_v56  ;;  %v594_v53 = vpop.f32.mrb[44].mxu0  ;;  %v787_v41 = vpop.f32.mrb[44].mxu1 }
 0x24c   :  { %v7080_v50 = vadd.f32 %v6646_v6, %v1066_v15  ;;  %v7083_v11 = vadd.f32 %v6660_v14, %v1068_v25  ;;  %v1069_v55 = vmul.f32 %v6665_v19, %v919_v9  ;;  %1777 = vmatmul.mubr.bf16.vlgmr.msra.gmra.mrb[64].mxu0 %v1328_v43  ;;  %v1070_v31 = vmul.f32 %v6643_v5, %v920_v26  ;;  %v596_v62 = vpop.f32.mrb[45].mxu0  ;;  %v789_v15 = vpop.f32.mrb[45].mxu1 }
 0x24d   :  { %1858 = vmatpush1.bf16.msra.mxu0 %v5256_v44  ;;  %v922_v0 = vmax.f32 %v782_v16, 0.0  ;;  %v921_v46 = vmax.f32 %v591_v17, 0.0  ;;  %v923_v42 = vmax.f32 %v784_v30, 0.0  ;;  %v7092_v25 = vadd.f32 %v6652_v8, %v1067_v45  ;;  %v5264_v44 = vld [vmem:[%s8321_s11 + $0x124] ss:$8 sps:$4 sm:$0xff]   ;;  %v598_v26 = vpop.f32.mrb[46].mxu0 }
 0x24e   :  { %8371 = vst [vmem:[#allocation83_spill] sm:$0xff] %v7083_v11  ;;  %v7095_v56 = vadd.f32 %v6668_v20, %v1069_v55  ;;  %1859 = vmatprep.subr.bf16.mxu0 %v5261_v29  ;;  %v595_v43 = vadd.f32 %v594_v53, %v6628_v61  ;;  %v788_v9 = vadd.f32 %v787_v41, %v6634_v1  ;;  %v791_v16 = vpop.f32.mrb[46].mxu1  ;;  %v600_v29 = vpop.f32.mrb[47].mxu0 }
 0x24f   :  { %v7103_v17 = vadd.f32 %v6646_v6, %v1070_v31  ;;  %v1072_v30 = vmul.f32 %v6657_v13, %v922_v0  ;;  %v1071_v45 = vmul.f32 %v6649_v7, %v921_v46  ;;  %v1073_v55 = vmul.f32 %v6665_v19, %v923_v42  ;;  %v793_v11 = vpop.f32.mrb[47].mxu1  ;;  %v5262_v46 = vld [vmem:[%s8321_s11 + $0x120] ss:$8 sps:$4 sm:$0xff]  }
 0x250   :  { %8372 = vst [vmem:[#allocation84_spill] sm:$0xff] %v7095_v56  ;;  %v924_v53 = vmax.f32 %v595_v43, 0.0  ;;  %v926_v56 = vmax.f32 %v788_v9, 0.0  ;;  %v1273_v41 = vmax.f32 %v6727_v38, %v7043_v60  ;;  %v1277_v57 = vmax.f32 %v6743_v63, %v1213_v40  ;;  %v5267_v43 = vld [vmem:[%s8321_s11 + $0x134] ss:$8 sps:$4 sm:$0xff]  }
 0x251   :  { %v7112_v47 = vadd.f32 %v6660_v14, %v1072_v30  ;;  %v7115_v31 = vadd.f32 %v6652_v8, %v1071_v45  ;;  %v7118_v0 = vadd.f32 %v6668_v20, %v1073_v55  ;;  %1860 = vmatpush1.bf16.msra.mxu0 %v5259_v58  ;;  %v597_v42 = vadd.f32 %v596_v62, %v6637_v2 }
 0x252   :  { %v1074_v38 = vmul.f32 %v6643_v5, %v924_v53  ;;  %v1076_v63 = vmul.f32 %v6657_v13, %v926_v56  ;;  %v1333_v60 = vpack.c.bf16 %v1277_v57, %v1273_v41  ;;  %1861 = vmatprep.subr.bf16.mxu0 %v5264_v44  ;;  %v790_v40 = vadd.f32 %v789_v15, %v6640_v3 }
 0x253   :  { %v925_v9 = vmax.f32 %v597_v42, 0.0  ;;  %v1272_v58 = vmax.f32 %v6719_v34, %v7035_v52  ;;  %v1276_v30 = vmax.f32 %v6735_v48, %v7049_v36  ;;  %v599_v62 = vadd.f32 %v598_v26, %v6628_v61  ;;  %v604_v44 = vpop.f32.mrb[48].mxu0  ;;  %v797_v55 = vpop.f32.mrb[48].mxu1  ;;  %v5265_v36 = vld [vmem:[%s8321_s11 + $0x130] ss:$8 sps:$4 sm:$0xff]  }
 0x254   :  { %v7136_v45 = vadd.f32 %v6646_v6, %v1074_v38  ;;  %v7139_v57 = vadd.f32 %v6660_v14, %v1076_v63  ;;  %1786 = vmatprep.mubr.bf16.mxu0 %v1333_v60  ;;  %v927_v15 = vmax.f32 %v790_v40, 0.0  ;;  %v792_v56 = vadd.f32 %v791_v16, %v6634_v1  ;;  %v606_v26 = vpop.f32.mrb[49].mxu0  ;;  %v799_v41 = vpop.f32.mrb[49].mxu1 }
 0x255   :  { %v1075_v53 = vmul.f32 %v6649_v7, %v925_v9  ;;  %v1332_v34 = vpack.c.bf16 %v1276_v30, %v1272_v58  ;;  %1862 = vmatpush1.bf16.msra.mxu0 %v5262_v46  ;;  %v928_v52 = vmax.f32 %v599_v62, 0.0  ;;  %v601_v48 = vadd.f32 %v600_v29, %v6637_v2  ;;  %v5270_v46 = vld [vmem:[%s8321_s11 + $0x144] ss:$8 sps:$4 sm:$0xff]   ;;  %v608_v60 = vpop.f32.mrb[50].mxu0  ;;  %v801_v29 = vpop.f32.mrb[50].mxu1 }
 0x256   :  { %8373 = vst [vmem:[#allocation85_spill] sm:$0xff] %v7139_v57  ;;  %v1077_v42 = vmul.f32 %v6665_v19, %v927_v15  ;;  %v930_v38 = vmax.f32 %v792_v56, 0.0  ;;  %v794_v16 = vadd.f32 %v793_v11, %v6640_v3  ;;  %1863 = vmatprep.subr.bf16.mxu0 %v5267_v43  ;;  %v605_v63 = vadd.f32 %v604_v44, %v6628_v61  ;;  %v610_v62 = vpop.f32.mrb[51].mxu0  ;;  %v803_v11 = vpop.f32.mrb[51].mxu1 }
 0x257   :  { %v7154_v40 = vadd.f32 %v6652_v8, %v1075_v53  ;;  %1787 = vmatmul.mubr.bf16.gmra.mrb[68].mxu0 %v1332_v34  ;;  %v1078_v9 = vmul.f32 %v6643_v5, %v928_v52  ;;  %v929_v58 = vmax.f32 %v601_v48, 0.0  ;;  %v798_v30 = vadd.f32 %v797_v55, %v6634_v1  ;;  %v5268_v55 = vld [vmem:[%s8321_s11 + $0x140] ss:$8 sps:$4 sm:$0xff]  }
 0x258   :  { %v7159_v43 = vadd.f32 %v6668_v20, %v1077_v42  ;;  %v1080_v15 = vmul.f32 %v6657_v13, %v930_v38  ;;  %v931_v56 = vmax.f32 %v794_v16, 0.0  ;;  %v932_v44 = vmax.f32 %v605_v63, 0.0 }
 0x259   :  { %v7163_v57 = vadd.f32 %v6646_v6, %v1078_v9  ;;  %v1079_v53 = vmul.f32 %v6649_v7, %v929_v58  ;;  %1864 = vmatpush1.bf16.msra.mxu0 %v5265_v36  ;;  %v934_v34 = vmax.f32 %v798_v30, 0.0  ;;  %v1281_v52 = vmax.f32 %v6767_v49, %v7092_v25  ;;  %v5273_v9 = vld [vmem:[%s8321_s11 + $0x154] ss:$8 sps:$4 sm:$0xff]  }
 0x25a   :  { %v7172_v48 = vadd.f32 %v6660_v14, %v1080_v15  ;;  %v1081_v42 = vmul.f32 %v6665_v19, %v931_v56  ;;  %v1082_v38 = vmul.f32 %v6643_v5, %v932_v44  ;;  %v1285_v16 = vmax.f32 %v6783_v22, %v7115_v31  ;;  %1865 = vmatprep.subr.bf16.mxu0 %v5270_v46 }
 0x25b   :  { %v7179_v36 = vadd.f32 %v6652_v8, %v1079_v53  ;;  %v1084_v49 = vmul.f32 %v6657_v13, %v934_v34  ;;  %v607_v25 = vadd.f32 %v606_v26, %v6637_v2  ;;  %v800_v63 = vadd.f32 %v799_v41, %v6640_v3  ;;  %v614_v46 = vpop.f32.mrb[52].mxu0  ;;  %v807_v15 = vpop.f32.mrb[52].mxu1 }
 0x25c   :  { %8374 = vst [vmem:[#allocation86_spill] sm:$0xff] %v7172_v48  ;;  %v7188_v58 = vadd.f32 %v6668_v20, %v1081_v42  ;;  %v7191_v30 = vadd.f32 %v6646_v6, %v1082_v38  ;;  %v1337_v22 = vpack.c.bf16 %v1285_v16, %v1281_v52  ;;  %v1280_v31 = vmax.f32 %v6759_v39, %v7080_v50  ;;  %v616_v53 = vpop.f32.mrb[53].mxu0  ;;  %v809_v34 = vpop.f32.mrb[53].mxu1  ;;  %v5271_v38 = vld [vmem:[%s8321_s11 + $0x150] ss:$8 sps:$4 sm:$0xff]  }
 0x25d   :  { %v7196_v26 = vadd.f32 %v6660_v14, %v1084_v49  ;;  %v933_v41 = vmax.f32 %v607_v25, 0.0  ;;  %v935_v56 = vmax.f32 %v800_v63, 0.0  ;;  %v1284_v44 = vmax.f32 %v6775_v12, %v7103_v17  ;;  %1866 = vmatpush1.bf16.msra.mxu0 %v5268_v55  ;;  %v618_v16 = vpop.f32.mrb[54].mxu0  ;;  %v811_v49 = vpop.f32.mrb[54].mxu1 }
 0x25e   :  { %1796 = vmatprep.mubr.bf16.mxu0 %v1337_v22  ;;  %v609_v42 = vadd.f32 %v608_v60, %v6628_v61  ;;  %v802_v52 = vadd.f32 %v801_v29, %v6634_v1  ;;  %v611_v39 = vadd.f32 %v610_v62, %v6637_v2  ;;  %v804_v50 = vadd.f32 %v803_v11, %v6640_v3  ;;  %v5276_v29 = vld [vmem:[%s8321_s11 + $0x164] ss:$8 sps:$4 sm:$0xff]   ;;  %v620_v62 = vpop.f32.mrb[55].mxu0  ;;  %v813_v11 = vpop.f32.mrb[55].mxu1 }
 0x25f   :  { %8375 = vst [vmem:[#allocation87_spill] sm:$0xff] %v7196_v26  ;;  %v1083_v12 = vmul.f32 %v6649_v7, %v933_v41  ;;  %v1085_v17 = vmul.f32 %v6665_v19, %v935_v56  ;;  %v1336_v55 = vpack.c.bf16 %v1284_v44, %v1280_v31  ;;  %1867 = vmatprep.subr.bf16.mxu0 %v5273_v9 }
 0x260   :  { %v615_v60 = vadd.f32 %v614_v46, %v6628_v61  ;;  %v936_v25 = vmax.f32 %v609_v42, 0.0  ;;  %v938_v63 = vmax.f32 %v802_v52, 0.0  ;;  %v937_v22 = vmax.f32 %v611_v39, 0.0  ;;  %v5274_v52 = vld [vmem:[%s8321_s11 + $0x160] ss:$8 sps:$4 sm:$0xff]  }
 0x261   :  { %v939_v26 = vmax.f32 %v804_v50, 0.0  ;;  %v7214_v48 = vadd.f32 %v6652_v8, %v1083_v12  ;;  %v7217_v41 = vadd.f32 %v6668_v20, %v1085_v17  ;;  %1797 = vmatmul.mubr.bf16.gmra.mrb[72].mxu0 %v1336_v55  ;;  %v808_v31 = vadd.f32 %v807_v15, %v6634_v1  ;;  %v5279_v17 = vld [vmem:[%s8321_s11 + $0x174] ss:$8 sps:$4 sm:$0xff]  }
 0x262   :  { %v940_v9 = vmax.f32 %v615_v60, 0.0  ;;  %v1086_v46 = vmul.f32 %v6643_v5, %v936_v25  ;;  %v1088_v56 = vmul.f32 %v6657_v13, %v938_v63  ;;  %v1087_v44 = vmul.f32 %v6649_v7, %v937_v22  ;;  %1868 = vmatpush1.bf16.msra.mxu0 %v5271_v38 }
 0x263   :  { %v1089_v42 = vmul.f32 %v6665_v19, %v939_v26  ;;  %v942_v50 = vmax.f32 %v808_v31, 0.0  ;;  %v1289_v12 = vmax.f32 %v6807_v28, %v7154_v40  ;;  %v1293_v15 = vmax.f32 %v6823_v4, %v7179_v36  ;;  %1869 = vmatprep.subr.bf16.mxu0 %v5276_v29  ;;  %v624_v28 = vpop.f32.mrb[56].mxu0  ;;  %v817_v40 = vpop.f32.mrb[56].mxu1 }
 0x264   :  { %v1090_v39 = vmul.f32 %v6643_v5, %v940_v9  ;;  %v7236_v26 = vadd.f32 %v6646_v6, %v1086_v46  ;;  %v7239_v38 = vadd.f32 %v6660_v14, %v1088_v56  ;;  %v7242_v55 = vadd.f32 %v6652_v8, %v1087_v44  ;;  %v626_v63 = vpop.f32.mrb[57].mxu0  ;;  %v819_v22 = vpop.f32.mrb[57].mxu1 }
 0x265   :  { %v7245_v60 = vadd.f32 %v6668_v20, %v1089_v42  ;;  %v1092_v36 = vmul.f32 %v6657_v13, %v942_v50  ;;  %v1341_v29 = vpack.c.bf16 %v1293_v15, %v1289_v12  ;;  %v617_v25 = vadd.f32 %v616_v53, %v6637_v2  ;;  %v628_v44 = vpop.f32.mrb[58].mxu0  ;;  %v7258_v42 = vpop.f32.mrb[58].mxu1  ;;  %v5282_v15 = vld [vmem:[%s8321_s11 + $0x184] ss:$8 sps:$4 sm:$0xff]  }
 0x266   :  { %v7248_v4 = vadd.f32 %v6646_v6, %v1090_v39  ;;  %v810_v9 = vadd.f32 %v809_v34, %v6640_v3  ;;  %v1288_v31 = vmax.f32 %v6799_v24, %v7136_v45  ;;  %v1292_v46 = vmax.f32 %v6815_v35, %v7163_v57  ;;  %1870 = vmatpush1.bf16.msra.mxu0 %v5274_v52  ;;  %v5277_v24 = vld [vmem:[%s8321_s11 + $0x170] ss:$8 sps:$4 sm:$0xff]   ;;  %v630_v35 = vpop.f32.mrb[59].mxu0  ;;  %v823_v45 = vpop.f32.mrb[59].mxu1 }
 0x267   :  { %v619_v56 = vadd.f32 %v618_v16, %v6628_v61  ;;  %v7261_v39 = vadd.f32 %v6660_v14, %v1092_v36  ;;  %1806 = vmatprep.mubr.bf16.mxu0 %v1341_v29  ;;  %v941_v53 = vmax.f32 %v617_v25, 0.0  ;;  %v812_v50 = vadd.f32 %v811_v49, %v6634_v1  ;;  %1871 = vmatprep.subr.bf16.mxu0 %v5279_v17 }
 0x268   :  { %v621_v34 = vadd.f32 %v620_v62, %v6637_v2  ;;  %v943_v57 = vmax.f32 %v810_v9, 0.0  ;;  %v1340_v16 = vpack.c.bf16 %v1292_v46, %v1288_v31  ;;  %v814_v12 = vadd.f32 %v813_v11, %v6640_v3 }
 0x269   :  { %8376 = vst [vmem:[#allocation88_spill] sm:$0xff] %v7261_v39  ;;  %v944_v52 = vmax.f32 %v619_v56, 0.0  ;;  %v1091_v49 = vmul.f32 %v6649_v7, %v941_v53  ;;  %v946_v36 = vmax.f32 %v812_v50, 0.0  ;;  %v625_v29 = vadd.f32 %v624_v28, %v6628_v61  ;;  %v5280_v28 = vld [vmem:[%s8321_s11 + $0x180] ss:$8 sps:$4 sm:$0xff]  }
 0x26a   :  { %v945_v62 = vmax.f32 %v621_v34, 0.0  ;;  %v1093_v25 = vmul.f32 %v6665_v19, %v943_v57  ;;  %1807 = vmatmul.mubr.bf16.gmra.mrb[76].mxu0 %v1340_v16  ;;  %v947_v9 = vmax.f32 %v814_v12, 0.0  ;;  %v818_v31 = vadd.f32 %v817_v40, %v6634_v1  ;;  %v5285_v16 = vld [vmem:[%s8321_s11 + $0x194] ss:$8 sps:$4 sm:$0xff]  }
 0x26b   :  { %v1094_v17 = vmul.f32 %v6643_v5, %v944_v52  ;;  %v7278_v11 = vadd.f32 %v6652_v8, %v1091_v49  ;;  %v1096_v46 = vmul.f32 %v6657_v13, %v946_v36  ;;  %1872 = vmatpush1.bf16.msra.mxu0 %v5277_v24  ;;  %v948_v53 = vmax.f32 %v625_v29, 0.0  ;;  %v634_v24 = vpop.f32.mrb[60].mxu0  ;;  %v827_v52 = vpop.f32.mrb[60].mxu1 }
 0x26c   :  { %v1095_v56 = vmul.f32 %v6649_v7, %v945_v62  ;;  %v7286_v50 = vadd.f32 %v6668_v20, %v1093_v25  ;;  %v1097_v40 = vmul.f32 %v6665_v19, %v947_v9  ;;  %v950_v57 = vmax.f32 %v818_v31, 0.0  ;;  %1873 = vmatprep.subr.bf16.mxu0 %v5282_v15  ;;  %v636_v29 = vpop.f32.mrb[61].mxu0  ;;  %v829_v25 = vpop.f32.mrb[61].mxu1 }
 0x26d   :  { %v7289_v34 = vadd.f32 %v6646_v6, %v1094_v17  ;;  %v7296_v12 = vadd.f32 %v6660_v14, %v1096_v46  ;;  %v1098_v36 = vmul.f32 %v6643_v5, %v948_v53  ;;  %v1297_v62 = vmax.f32 %v6847_v23, %v7214_v48  ;;  %v7311_v46 = vpop.f32.mrb[62].mxu0 }
 0x26e   :  { %v7299_v49 = vadd.f32 %v6652_v8, %v1095_v56  ;;  %v7305_v15 = vadd.f32 %v6668_v20, %v1097_v40  ;;  %v1100_v17 = vmul.f32 %v6657_v13, %v950_v57  ;;  %v1301_v9 = vmax.f32 %v6863_v54, %v7242_v55  ;;  %v7313_v56 = vpop.f32.mrb[62].mxu1  ;;  %v640_v57 = vpop.f32.mrb[63].mxu0 }
 0x26f   :  { %8377 = vst [vmem:[#allocation89_spill] sm:$0xff] %v7296_v12  ;;  %v627_v31 = vadd.f32 %v626_v63, %v6637_v2  ;;  %v7316_v53 = vadd.f32 %v6646_v6, %v1098_v36  ;;  %v820_v23 = vadd.f32 %v819_v22, %v6640_v3  ;;  %v1296_v48 = vmax.f32 %v6839_v21, %v7191_v30  ;;  %v833_v54 = vpop.f32.mrb[63].mxu1  ;;  %v5283_v22 = vld [vmem:[%s8321_s11 + $0x190] ss:$8 sps:$4 sm:$0xff]  }
 0x270   :  { %v1300_v40 = vmax.f32 %v6855_v33, %v7236_v26  ;;  %1874 = vmatpush1.bf16.msra.mxu0 %v5280_v28  ;;  %v7324_v55 = vadd.f32 %v6660_v14, %v1100_v17  ;;  %v1345_v63 = vpack.c.bf16 %v1301_v9, %v1297_v62  ;;  %v629_v39 = vadd.f32 %v628_v44, %v6628_v61  ;;  %v5288_v26 = vld [vmem:[%s8321_s11 + $0x1a4] ss:$8 sps:$4 sm:$0xff]  }
 0x271   :  { %v949_v12 = vmax.f32 %v627_v31, 0.0  ;;  %1875 = vmatprep.subr.bf16.mxu0 %v5285_v16  ;;  %v951_v36 = vmax.f32 %v820_v23, 0.0  ;;  %v822_v33 = vadd.f32 %v7258_v42, %v6634_v1  ;;  %v631_v30 = vadd.f32 %v630_v35, %v6637_v2 }
 0x272   :  { %v1344_v21 = vpack.c.bf16 %v1300_v40, %v1296_v48  ;;  %1816 = vmatprep.mubr.bf16.mxu0 %v1345_v63  ;;  %v952_v44 = vmax.f32 %v629_v39, 0.0  ;;  %v824_v62 = vadd.f32 %v823_v45, %v6640_v3  ;;  %v635_v17 = vadd.f32 %v634_v24, %v6628_v61  ;;  %v5286_v39 = vld [vmem:[%s8321_s11 + $0x1a0] ss:$8 sps:$4 sm:$0xff]  }
 0x273   :  { %v1099_v28 = vmul.f32 %v6649_v7, %v949_v12  ;;  %v1101_v16 = vmul.f32 %v6665_v19, %v951_v36  ;;  %v954_v9 = vmax.f32 %v822_v33, 0.0  ;;  %v953_v31 = vmax.f32 %v631_v30, 0.0 }
 0x274   :  { %1817 = vmatmul.mubr.bf16.gmra.mrb[80].mxu0 %v1344_v21  ;;  %v828_v42 = vadd.f32 %v827_v52, %v6634_v1  ;;  %v1102_v23 = vmul.f32 %v6643_v5, %v952_v44  ;;  %v955_v48 = vmax.f32 %v824_v62, 0.0  ;;  %v956_v40 = vmax.f32 %v635_v17, 0.0  ;;  %v5291_v52 = vld [vmem:[%s8321_s11 + $0x1b4] ss:$8 sps:$4 sm:$0xff]  }
 0x275   :  { %v1249_v35 = vadd.f32 %v6652_v8, %v1099_v28  ;;  %1876 = vmatpush1.bf16.msra.mxu0 %v5283_v22  ;;  %v7347_v45 = vadd.f32 %v6668_v20, %v1101_v16  ;;  %v1104_v24 = vmul.f32 %v6657_v13, %v954_v9  ;;  %v1103_v12 = vmul.f32 %v6649_v7, %v953_v31 }
 0x276   :  { %v958_v63 = vmax.f32 %v828_v42, 0.0  ;;  %1877 = vmatprep.subr.bf16.mxu0 %v5288_v26  ;;  %v1252_v22 = vadd.f32 %v6646_v6, %v1102_v23  ;;  %v1105_v36 = vmul.f32 %v6665_v19, %v955_v48  ;;  %v1106_v21 = vmul.f32 %v6643_v5, %v956_v40 }
 0x277   :  { %v1305_v33 = vmax.f32 %v6887_v18, %v7278_v11  ;;  %v7360_v30 = vadd.f32 %v6660_v14, %v1104_v24  ;;  %v1253_v28 = vadd.f32 %v6652_v8, %v1103_v12  ;;  %v1309_v44 = vmax.f32 %v6903_v32, %v7299_v49  ;;  %v5289_v11 = vld [vmem:[%s8321_s11 + $0x1b0] ss:$8 sps:$4 sm:$0xff]  }
 0x278   :  { %v1108_v26 = vmul.f32 %v6657_v13, %v958_v63  ;;  %v7367_v62 = vadd.f32 %v6668_v20, %v1105_v36  ;;  %v7370_v17 = vadd.f32 %v6646_v6, %v1106_v21  ;;  %v637_v16 = vadd.f32 %v636_v29, %v6637_v2  ;;  %v5294_v29 = vld [vmem:[%s8321_s11 + $0x1c4] ss:$8 sps:$4 sm:$0xff]  }
 0x279   :  { %v830_v18 = vadd.f32 %v829_v25, %v6640_v3  ;;  %1878 = vmatpush1.bf16.msra.mxu0 %v5286_v39  ;;  %v1349_v31 = vpack.c.bf16 %v1309_v44, %v1305_v33  ;;  %v1304_v32 = vmax.f32 %v6879_v10, %v7248_v4  ;;  %v1308_v49 = vmax.f32 %v6895_v27, %v7289_v34  ;;  %v8379_v21 = vld [vmem:[#allocation66_spill] sm:$0xff] }
 0x27a   :  { %v7378_v9 = vadd.f32 %v6660_v14, %v1108_v26  ;;  %1879 = vmatprep.subr.bf16.mxu0 %v5291_v52  ;;  %v957_v25 = vmax.f32 %v637_v16, 0.0  ;;  %v639_v23 = vadd.f32 %v7311_v46, %v6628_v61  ;;  %v832_v48 = vadd.f32 %v7313_v56, %v6634_v1  ;;  %v5292_v61 = vld [vmem:[%s8321_s11 + $0x1c0] ss:$8 sps:$4 sm:$0xff]   ;;  %v5297_v56 = vld [vmem:[%s8321_s11 + $0x1d4] ss:$8 sps:$4 sm:$0xff]  }
 0x27b   :  { %v959_v42 = vmax.f32 %v830_v18, 0.0  ;;  %1826 = vmatprep.mubr.bf16.mxu0 %v1349_v31  ;;  %v1348_v40 = vpack.c.bf16 %v1308_v49, %v1304_v32  ;;  %v641_v10 = vadd.f32 %v640_v57, %v6637_v2  ;;  %v834_v4 = vadd.f32 %v833_v54, %v6640_v3  ;;  %v8378_v3 = vld [vmem:[#allocation63_spill] sm:$0xff]  ;;  %v8384_v31 = vld [vmem:[#allocation41_spill] sm:$0xff]  ;;  %v8385_v49 = vld [vmem:[#allocation78_spill] sm:$0xff] }
 0x27c   :  { %v1313_v27 = vmax.f32 %v6927_v51, %v1249_v35  ;;  %v1107_v34 = vmul.f32 %v6649_v7, %v957_v25  ;;  %v960_v24 = vmax.f32 %v639_v23, 0.0  ;;  %v962_v12 = vmax.f32 %v832_v48, 0.0  ;;  %v5295_v26 = vld [vmem:[%s8321_s11 + $0x1d0] ss:$8 sps:$4 sm:$0xff]  }
 0x27d   :  { %v1109_v39 = vmul.f32 %v6665_v19, %v959_v42  ;;  %1880 = vmatpush1.bf16.msra.mxu0 %v5289_v11  ;;  %v961_v1 = vmax.f32 %v641_v10, 0.0  ;;  %v963_v46 = vmax.f32 %v834_v4, 0.0  ;;  %v1317_v2 = vmax.f32 %v6943_v59, %v1253_v28  ;;  %v8383_v11 = vld [vmem:[#allocation77_spill] sm:$0xff]  ;;  %v8389_v23 = vld [vmem:[#allocation82_spill] sm:$0xff]  ;;  %v8391_v10 = vld [vmem:[#allocation80_spill] sm:$0xff] }
 0x27e   :  { %1827 = vmatmul.mubr.bf16.gmra.mrb[84].mxu0 %v1348_v40  ;;  %1881 = vmatprep.subr.bf16.mxu0 %v5294_v29  ;;  %v1312_v51 = vmax.f32 %v8378_v3, %v7316_v53  ;;  %v1257_v57 = vadd.f32 %v6652_v8, %v1107_v34  ;;  %v1110_v35 = vmul.f32 %v6643_v5, %v960_v24  ;;  %v8380_v5 = vld [vmem:[#allocation71_spill] sm:$0xff]  ;;  %v8386_v29 = vld [vmem:[#allocation42_spill] sm:$0xff]  ;;  %v8393_v34 = vld [vmem:[#allocation81_spill] sm:$0xff] }
 0x27f   :  { %v7407_v54 = vadd.f32 %v6668_v20, %v1109_v39  ;;  %v1112_v63 = vmul.f32 %v6657_v13, %v962_v12  ;;  %v1111_v52 = vmul.f32 %v6649_v7, %v961_v1  ;;  %v1113_v59 = vmul.f32 %v6665_v19, %v963_v46  ;;  %v8381_v13 = vld [vmem:[#allocation69_spill] sm:$0xff]  ;;  %v8390_v48 = vld [vmem:[#allocation46_spill] sm:$0xff]  ;;  %v8392_v4 = vld [vmem:[#allocation43_spill] sm:$0xff] }
 0x280   :  { %v1353_v36 = vpack.c.bf16 %v1317_v2, %v1313_v27  ;;  %v1316_v53 = vmax.f32 %v8379_v21, %v1252_v22  ;;  %v1260_v33 = vadd.f32 %v6646_v6, %v1110_v35  ;;  %v1321_v44 = vmax.f32 %v8380_v5, %v1257_v57  ;;  %v8382_v22 = vld [vmem:[#allocation73_spill] sm:$0xff]  ;;  %v8395_v46 = vld [vmem:[#allocation84_spill] sm:$0xff]  ;;  %v8397_v3 = vld [vmem:[#allocation50_spill] sm:$0xff] }
 0x281   :  { %v7416_v28 = vadd.f32 %v6660_v14, %v1112_v63  ;;  %1882 = vmatpush1.bf16.msra.mxu0 %v5292_v61  ;;  %v1320_v7 = vmax.f32 %v8381_v13, %v7370_v17  ;;  %v1261_v19 = vadd.f32 %v6652_v8, %v1111_v52  ;;  %v7426_v16 = vadd.f32 %v6668_v20, %v1113_v59  ;;  %v5300_v14 = vld [vmem:[%s8321_s11 + $0x1e4] ss:$8 sps:$4 sm:$0xff]   ;;  %v8388_v20 = vld [vmem:[#allocation75_spill] sm:$0xff]  ;;  %v5298_v12 = vld [vmem:[%s8321_s11 + $0x1e0] ss:$8 sps:$4 sm:$0xff]  }
 0x282   :  { %1836 = vmatprep.mubr.bf16.mxu0 %v1353_v36  ;;  %v1352_v6 = vpack.c.bf16 %v1316_v53, %v1312_v51  ;;  %1883 = vmatprep.subr.bf16.mxu0 %v5297_v56  ;;  %v1324_v18 = vmax.f32 %v8382_v22, %v1260_v33  ;;  %v1267_v32 = vmax.f32 %v8384_v31, %v8383_v11  ;;  %v8387_v8 = vld [vmem:[#allocation44_spill] sm:$0xff]  ;;  %v8394_v39 = vld [vmem:[#allocation45_spill] sm:$0xff]  ;;  %v8398_v59 = vld [vmem:[#allocation83_spill] sm:$0xff] }
 0x283   :  { %v1271_v17 = vmax.f32 %v8386_v29, %v8385_v49  ;;  %v1275_v25 = vmax.f32 %v8387_v8, %v7046_v37  ;;  %v1325_v42 = vmax.f32 %v8388_v20, %v1261_v19  ;;  %v1279_v40 = vmax.f32 %v8390_v48, %v8389_v23  ;;  %v8396_v37 = vld [vmem:[#allocation48_spill] sm:$0xff]  ;;  %v8399_v36 = vld [vmem:[#allocation47_spill] sm:$0xff]  ;;  %v8400_v53 = vld [vmem:[#allocation49_spill] sm:$0xff] }
 0x284   :  { %v1274_v27 = vmax.f32 %v8392_v4, %v8391_v10  ;;  %v1278_v24 = vmax.f32 %v8394_v39, %v8393_v34  ;;  %v1356_v61 = vpack.c.bf16 %v1324_v18, %v1320_v7  ;;  %v1283_v2 = vmax.f32 %v8396_v37, %v8395_v46  ;;  %v5303_v57 = vld [vmem:[%s8321_s11 + $0x1f4] ss:$8 sps:$4 sm:$0xff]   ;;  %v8403_v13 = vld [vmem:[#allocation85_spill] sm:$0xff] }
 0x285   :  { %1884 = vmatpush1.bf16.msra.mxu0 %v5295_v26  ;;  %v1331_v1 = vpack.c.bf16 %v1271_v17, %v1267_v32  ;;  %v1287_v51 = vmax.f32 %v8397_v3, %v7118_v0  ;;  %v1357_v56 = vpack.c.bf16 %v1325_v42, %v1321_v44  ;;  %v1335_v35 = vpack.c.bf16 %v1279_v40, %v1275_v25  ;;  %v8401_v26 = vld [vmem:[#allocation52_spill] sm:$0xff]  ;;  %v8402_v0 = vld [vmem:[#allocation54_spill] sm:$0xff]  ;;  %v8404_v7 = vld [vmem:[#allocation51_spill] sm:$0xff] }
 0x286   :  { %1837 = vmatmul.mubr.bf16.gmra.mrb[88].mxu0 %v1352_v6  ;;  %1885 = vmatprep.subr.bf16.mxu0 %v5300_v14  ;;  %v1334_v63 = vpack.c.bf16 %v1278_v24, %v1274_v27  ;;  %v1282_v21 = vmax.f32 %v8399_v36, %v8398_v59  ;;  %v1286_v33 = vmax.f32 %v8400_v53, %v7112_v47  ;;  %v8405_v6 = vld [vmem:[#allocation86_spill] sm:$0xff]  ;;  %v8406_v14 = vld [vmem:[#allocation53_spill] sm:$0xff]  ;;  %v8407_v18 = vld [vmem:[#allocation56_spill] sm:$0xff] }
 0x287   :  { %v1339_v52 = vpack.c.bf16 %v1287_v51, %v1283_v2  ;;  %v1291_v5 = vmax.f32 %v8401_v26, %v7159_v43  ;;  %1846 = vmatprep.mubr.bf16.mxu0 %v1357_v56  ;;  %v1295_v44 = vmax.f32 %v8402_v0, %v7188_v58  ;;  %v1290_v19 = vmax.f32 %v8404_v7, %v8403_v13  ;;  %v5301_v47 = vld [vmem:[%s8321_s11 + $0x1f0] ss:$8 sps:$4 sm:$0xff]   ;;  %v8411_v17 = vld [vmem:[#allocation57_spill] sm:$0xff]  ;;  %v8414_v4 = vld [vmem:[#allocation88_spill] sm:$0xff]  ;;  %s6103_s11 = smov 96  }
 0x288   :  { %v1294_v22 = vmax.f32 %v8406_v14, %v8405_v6  ;;  %v1299_v11 = vmax.f32 %v8407_v18, %v7217_v41  ;;  %v1338_v31 = vpack.c.bf16 %v1286_v33, %v1282_v21  ;;  %v8408_v43 = vld [vmem:[#allocation58_spill] sm:$0xff]  ;;  %v8409_v49 = vld [vmem:[#allocation87_spill] sm:$0xff]  ;;  %v1302_v8 = vmax.f32 %v8411_v17, %v7239_v38  ;;  %v8412_v41 = vld [vmem:[#allocation60_spill] sm:$0xff] }
 0x289   :  { %1886 = vmatpush1.bf16.msra.mxu0 %v5298_v12  ;;  %v1303_v32 = vmax.f32 %v8408_v43, %v7245_v60  ;;  %v8410_v58 = vld [vmem:[#allocation55_spill] sm:$0xff]  ;;  %v1343_v25 = vpack.c.bf16 %v1295_v44, %v1291_v5  ;;  %v1307_v42 = vmax.f32 %v8412_v41, %v7286_v50  ;;  %v8413_v23 = vld [vmem:[#allocation62_spill] sm:$0xff]  ;;  %v8416_v34 = vld [vmem:[#allocation89_spill] sm:$0xff] }
 0x28a   :  { %v1298_v29 = vmax.f32 %v8410_v58, %v8409_v49  ;;  %1887 = vmatprep.subr.bf16.mxu0 %v5303_v57  ;;  %v1342_v20 = vpack.c.bf16 %v1294_v22, %v1290_v19  ;;  %v1311_v48 = vmax.f32 %v8413_v23, %v7305_v15  ;;  %v8415_v27 = vld [vmem:[#allocation59_spill] sm:$0xff]  ;;  %v8417_v39 = vld [vmem:[#allocation61_spill] sm:$0xff]  ;;  %v8419_v37 = vld [vmem:[#allocation68_spill] sm:$0xff] }
 0x28b   :  { %v1347_v40 = vpack.c.bf16 %v1303_v32, %v1299_v11  ;;  %v1306_v60 = vmax.f32 %v8415_v27, %v8414_v4  ;;  %v1310_v24 = vmax.f32 %v8417_v39, %v8416_v34  ;;  %v8418_v38 = vld [vmem:[#allocation65_spill] sm:$0xff]  ;;  %v1319_v2 = vmax.f32 %v8419_v37, %v7367_v62  ;;  %v8420_v50 = vld [vmem:[#allocation64_spill] sm:$0xff]  ;;  %v8421_v51 = vld [vmem:[#allocation67_spill] sm:$0xff] }
 0x28c   :  { %v1346_v10 = vpack.c.bf16 %v1302_v8, %v1298_v29  ;;  %v1351_v12 = vpack.c.bf16 %v1311_v48, %v1307_v42  ;;  %v1315_v46 = vmax.f32 %v8418_v38, %v7347_v45  ;;  %v1314_v3 = vmax.f32 %v8420_v50, %v7324_v55  ;;  %v8422_v57 = vld [vmem:[#allocation72_spill] sm:$0xff]  ;;  %v8424_v45 = vld [vmem:[#allocation70_spill] sm:$0xff]  ;;  %v8426_v44 = vld [vmem:[#allocation79_spill] sm:$0xff] }
 0x28d   :  { %1888 = vmatpush1.bf16.msra.mxu0 %v5301_v47  ;;  %v1350_v15 = vpack.c.bf16 %v1310_v24, %v1306_v60  ;;  %v1318_v56 = vmax.f32 %v8421_v51, %v7360_v30  ;;  %v1323_v59 = vmax.f32 %v8422_v57, %v7407_v54  ;;  %v8423_v36 = vld [vmem:[#allocation76_spill] sm:$0xff]  ;;  %v1322_v33 = vmax.f32 %v8424_v45, %v7378_v9  ;;  %v8425_v62 = vld [vmem:[#allocation74_spill] sm:$0xff] }
 0x28e   :  { %v1327_v21 = vmax.f32 %v8423_v36, %v7426_v16  ;;  %1847 = vmatmul.mubr.bf16.gmra.mrb[92].mxu0 %v1356_v61  ;;  %v1355_v53 = vpack.c.bf16 %v1319_v2, %v1315_v46  ;;  %v1326_v26 = vmax.f32 %v8425_v62, %v7416_v28  ;;  %v8427_v30 = vmov 0   ;;  %v5304_v9 = vld [vmem:[#allocation12] sm:$0xff]   ;;  %v5305_v54 = vld [vmem:[#allocation12 + $0x8] sm:$0xff]   ;;  %v5306_v11 = vld [vmem:[#allocation12 + $0x10] sm:$0xff]  }
 0x28f   :  { %1889 = vmatprep.mubr.bf16.mxu0 %v1331_v1  ;;  %v1354_v55 = vpack.c.bf16 %v1318_v56, %v1314_v3  ;;  %5073 = vmatprep.subr.bf16.mxu1 %v5304_v9 }
 0x290   :  { %v1359_v5 = vpack.c.bf16 %v1327_v21, %v1323_v59  ;;  %v1358_v0 = vpack.c.bf16 %v1326_v26, %v1322_v33  ;;  %5074 = vmatpush3.bf16.msra.mxu1 %v5304_v9  ;;  %v5307_v21 = vld [vmem:[#allocation12 + $0x18] sm:$0xff]  }
 0x291   :  { %5075 = vmatprep.subr.bf16.mxu1 %v5305_v54 }
 0x294   :  { %5076 = vmatpush3.bf16.msra.mxu1 %v5305_v54 }
 0x295   :  { %5077 = vmatprep.subr.bf16.mxu1 %v5306_v11 }
 0x296   :  { %1890 = vmatmul.mubr.bf16.vlgmr.msra.gmra.mrb[64].mxu0 %v8426_v44 }
 0x297   :  { %1899 = vmatprep.mubr.bf16.mxu0 %v1335_v35 }
 0x298   :  { %5078 = vmatpush3.bf16.msra.mxu1 %v5306_v11 }
 0x299   :  { %5079 = vmatprep.subr.bf16.mxu1 %v5307_v21 }
 0x29c   :  { %5080 = vmatpush3.bf16.msra.mxu1 %v5307_v21 }
 0x29e   :  { %1900 = vmatmul.mubr.bf16.gmra.mrb[68].mxu0 %v1334_v63 }
 0x29f   :  { %1909 = vmatprep.mubr.bf16.mxu0 %v1339_v52 }
 0x2a6   :  { %1910 = vmatmul.mubr.bf16.gmra.mrb[72].mxu0 %v1338_v31 }
 0x2a7   :  { %1919 = vmatprep.mubr.bf16.mxu0 %v1343_v25 }
 0x2ae   :  { %1920 = vmatmul.mubr.bf16.gmra.mrb[76].mxu0 %v1342_v20 }
 0x2af   :  { %1929 = vmatprep.mubr.bf16.mxu0 %v1347_v40 }
 0x2b6   :  { %1930 = vmatmul.mubr.bf16.gmra.mrb[80].mxu0 %v1346_v10 }
 0x2b7   :  { %1939 = vmatprep.mubr.bf16.mxu0 %v1351_v12 }
 0x2be   :  { %1940 = vmatmul.mubr.bf16.gmra.mrb[84].mxu0 %v1350_v15 }
 0x2bf   :  { %1949 = vmatprep.mubr.bf16.mxu0 %v1355_v53 }
 0x2c6   :  { %1950 = vmatmul.mubr.bf16.gmra.mrb[88].mxu0 %v1354_v55 }
 0x2c7   :  { %1959 = vmatprep.mubr.bf16.mxu0 %v1359_v5 }
 0x2ce   :  { %1960 = vmatmul.mubr.bf16.gmra.mrb[92].mxu0 %v1358_v0 }
 0x2cf   :  { %3575 = vmatprep.mubr.bf16.mxu0 %v8427_v30 }
 0x369   :  { %v7504_v28 = vpop.f32.mrb[64].mxu0 }
 0x36a   :  { %2148 = vrot.lane.b32.xlu0 %v7504_v28, %s6087_s7  ;;  %v1893_v16 = vpop.f32.mrb[65].mxu0 }
 0x36b   :  { %v7508_v61 = vpop.f32.mrb[66].mxu0  ;;  %v2229_v35 = vrot.slane %v1893_v16, 1 }
 0x36c   :  { %v1897_v1 = vpop.f32.mrb[67].mxu0 }
 0x36d   :  { %v2230_v63 = vrot.slane %v1897_v1, 1  ;;  %v8428_v1 = vld [vmem:[#allocation36_spill] sm:$0xff] }
 0x36e   :  { %2150 = vrot.lane.b32.xlu0 %v7508_v61, %s6087_s7 }
 0x36f   :  { %v7513_v52 = vsel %vm2228_vm1, %v2229_v35, %v2230_v63  ;;  %v2016_v35 = vand.u32 31, %v8428_v1 }
 0x371   :  { %v7515_v13 = vpop.f32.mrb[68].mxu0  ;;  %vm2108_vm3 = vcmp.ne.s32.totalorder %v2016_v35, 0 }
 0x372   :  { %2152 = vrot.lane.b32.xlu1 %v7515_v13, %s6087_s7  ;;  %v1903_v7 = vpop.f32.mrb[69].mxu0 }
 0x373   :  { %v2232_v19 = vrot.slane %v1903_v7, 1  ;;  %v7519_v6 = vpop.f32.mrb[70].mxu0 }
 0x374   :  { %v1907_v14 = vpop.f32.mrb[71].mxu0 }
 0x375   :  { %v2234_v22 = vrot.slane %v1907_v14, 1  ;;  %v7522_v18 = vsel %vm2228_vm1, %v2230_v63, %v2232_v19 }
 0x376   :  { %2154 = vrot.lane.b32.xlu1 %v7519_v6, %s6087_s7 }
 0x377   :  { %v7527_v47 = vsel %vm2228_vm1, %v2232_v19, %v2234_v22 }
 0x379   :  { %v7529_v31 = vpop.f32.mrb[72].mxu0 }
 0x37a   :  { %2156 = vrot.lane.b32.xlu0 %v7529_v31, %s6087_s7  ;;  %v1913_v43 = vpop.f32.mrb[73].mxu0 }
 0x37b   :  { %v2236_v32 = vrot.slane %v1913_v43, 1  ;;  %v7533_v49 = vpop.f32.mrb[74].mxu0 }
 0x37c   :  { %2158 = vrot.lane.b32.xlu1 %v7533_v49, %s6087_s7  ;;  %v1917_v58 = vpop.f32.mrb[75].mxu0 }
 0x37d   :  { %v2238_v29 = vrot.slane %v1917_v58, 1  ;;  %v7538_v17 = vsel %vm2228_vm1, %v2234_v22, %v2236_v32 }
 0x37f   :  { %v7541_v8 = vsel %vm2228_vm1, %v2236_v32, %v2238_v29  ;;  %v2008_v32 = vadd.s32 32, %v8428_v1 }
 0x381   :  { %v7543_v25 = vpop.f32.mrb[76].mxu0 }
 0x382   :  { %2160 = vrot.lane.b32.xlu0 %v7543_v25, %s6087_s7  ;;  %v1923_v20 = vpop.f32.mrb[77].mxu0 }
 0x383   :  { %v2240_v41 = vrot.slane %v1923_v20, 1  ;;  %v7547_v42 = vpop.f32.mrb[78].mxu0 }
 0x384   :  { %2162 = vrot.lane.b32.xlu1 %v7547_v42, %s6087_s7  ;;  %v7551_v23 = vpop.f32.mrb[79].mxu0 }
 0x385   :  { %v2242_v48 = vrot.slane %v7551_v23, 1  ;;  %v7555_v40 = vsel %vm2228_vm1, %v2238_v29, %v2240_v41 }
 0x387   :  { %v7560_v10 = vsel %vm2228_vm1, %v2240_v41, %v2242_v48  ;;  %v2044_v41 = vand.u32 31, %v2008_v32 }
 0x389   :  { %v1931_v4 = vpop.f32.mrb[80].mxu0  ;;  %vm2112_vm4 = vcmp.ne.s32.totalorder %v2044_v41, 0 }
 0x38a   :  { %2188 = vrot.lane.b32.xlu0 %v1931_v4, %s6087_s7  ;;  %v1933_v27 = vpop.f32.mrb[81].mxu0  ;;  %v1979_v34 = vrot.slane %v1931_v4, 7 }
 0x38b   :  { %v1935_v60 = vpop.f32.mrb[82].mxu0 }
 0x38c   :  { %v1980_v39 = vrot.slane %v1935_v60, 7  ;;  %2190 = vrot.lane.b32.xlu1 %v1935_v60, %s6087_s7  ;;  %v1937_v24 = vpop.f32.mrb[83].mxu0  ;;  %v2002_v63 = vsel %vm1978_vm2, 0.0, %v1979_v34 }
 0x38d   :  { %v2132_v19 = vsel %vm2108_vm3, %v2002_v63, 0.0  ;;  %v7601_v63 = vld [vmem:[#allocation11] ss:$0 sm:$0xff] }
 0x38e   :  { %v1981_v12 = vsel %vm1978_vm2, %v1979_v34, %v1980_v39 }
 0x391   :  { %v1941_v38 = vpop.f32.mrb[84].mxu0 }
 0x392   :  { %v1982_v46 = vrot.slane %v1941_v38, 7  ;;  %2192 = vrot.lane.b32.xlu0 %v1941_v38, %s6087_s7  ;;  %v1943_v37 = vpop.f32.mrb[85].mxu0 }
 0x393   :  { %v1945_v2 = vpop.f32.mrb[86].mxu0 }
 0x394   :  { %v1984_v50 = vrot.slane %v1945_v2, 7  ;;  %2194 = vrot.lane.b32.xlu1 %v1945_v2, %s6087_s7  ;;  %v1947_v3 = vpop.f32.mrb[87].mxu0  ;;  %v1983_v15 = vsel %vm1978_vm2, %v1980_v39, %v1982_v46 }
 0x396   :  { %v1985_v51 = vsel %vm1978_vm2, %v1982_v46, %v1984_v50 }
 0x399   :  { %v1951_v56 = vpop.f32.mrb[88].mxu0 }
 0x39a   :  { %v1986_v57 = vrot.slane %v1951_v56, 7  ;;  %2196 = vrot.lane.b32.xlu0 %v1951_v56, %s6087_s7  ;;  %v1953_v59 = vpop.f32.mrb[89].mxu0 }
 0x39b   :  { %v1955_v36 = vpop.f32.mrb[90].mxu0 }
 0x39c   :  { %v1988_v53 = vrot.slane %v1955_v36, 7  ;;  %2198 = vrot.lane.b32.xlu1 %v1955_v36, %s6087_s7  ;;  %v1957_v45 = vpop.f32.mrb[91].mxu0  ;;  %v1987_v33 = vsel %vm1978_vm2, %v1984_v50, %v1986_v57 }
 0x39d   :  { %v2136_v2 = vsel %vm2112_vm4, %v1987_v33, 0.0 }
 0x39e   :  { %v1989_v62 = vsel %vm1978_vm2, %v1986_v57, %v1988_v53 }
 0x3a1   :  { %v1961_v26 = vpop.f32.mrb[92].mxu0 }
 0x3a2   :  { %v1990_v55 = vrot.slane %v1961_v26, 7  ;;  %2200 = vrot.lane.b32.xlu0 %v1961_v26, %s6087_s7  ;;  %v1963_v5 = vpop.f32.mrb[93].mxu0 }
 0x3a3   :  { %v1965_v0 = vpop.f32.mrb[94].mxu0 }
 0x3a4   :  { %v1992_v44 = vrot.slane %v1965_v0, 7  ;;  %2202 = vrot.lane.b32.xlu1 %v1965_v0, %s6087_s7  ;;  %v1967_v9 = vpop.f32.mrb[95].mxu0  ;;  %v1991_v54 = vsel %vm1978_vm2, %v1988_v53, %v1990_v55  ;;  %v7580_v53 = vld [vmem:[#allocation8] ss:$0 sm:$0xff] }
 0x3a6   :  { %v1993_v16 = vsel %vm1978_vm2, %v1990_v55, %v1992_v44  ;;  %v7592_v55 = vld [vmem:[#allocation9] ss:$0 sm:$0xff] }
 0x3dc   :  { %v2149_v7 = vpop.permute.xlu0 %2148 }
 0x3dd   :  { %v2172_v14 = vadd.f32 %v2149_v7, %v2132_v19 }
 0x3df   :  { %v2180_v22 = vadd.f32 %v2172_v14, %v1933_v27 }
 0x3e0   :  { %v2151_v11 = vpop.permute.xlu0 %2150 }
 0x3e1   :  { %v2173_v43 = vadd.f32 %v2151_v11, %v1981_v12 }
 0x3e3   :  { %v2181_v58 = vadd.f32 %v2173_v43, %v1937_v24 }
 0x3e4   :  { %v2153_v29 = vpop.permute.xlu1 %2152 }
 0x3e5   :  { %v2174_v20 = vadd.f32 %v2153_v29, %v1983_v15 }
 0x3e7   :  { %v2182_v4 = vadd.f32 %v2174_v20, %v1943_v37 }
 0x3e8   :  { %v2155_v60 = vpop.permute.xlu1 %2154 }
 0x3e9   :  { %v2175_v39 = vadd.f32 %v2155_v60, %v1985_v51  ;;  %v2300_v51 = vadd.f32 %v7580_v53, %v2180_v22  ;;  %v2302_v35 = vadd.f32 %v7580_v53, %v2182_v4 }
 0x3eb   :  { %v2183_v38 = vadd.f32 %v2175_v39, %v1947_v3  ;;  %v2301_v3 = vadd.f32 %v7580_v53, %v2181_v58  ;;  %v2310_v32 = vmax.f32 %v2302_v35, 0.0 }
 0x3ec   :  { %v2157_v46 = vpop.permute.xlu0 %2156 }
 0x3ed   :  { %v2176_v34 = vadd.f32 %v2157_v46, %v2136_v2  ;;  %v2309_v44 = vmax.f32 %v2301_v3, 0.0 }
 0x3ee   :  { %v2159_v50 = vpop.permute.xlu1 %2158 }
 0x3ef   :  { %v2184_v56 = vadd.f32 %v2176_v34, %v1953_v59  ;;  %v2177_v57 = vadd.f32 %v2159_v50, %v1989_v62  ;;  %v7590_v59 = vadd.s32 24, %v8428_v1  ;;  %v2325_v50 = vmul.f32 %v7592_v55, %v2310_v32 }
 0x3f1   :  { %v2185_v27 = vadd.f32 %v2177_v57, %v1957_v45  ;;  %v2308_v45 = vmax.f32 %v2300_v51, 0.0  ;;  %v2304_v57 = vadd.f32 %v7580_v53, %v2184_v56 }
 0x3f4   :  { %v2161_v36 = vpop.permute.xlu0 %2160 }
 0x3f5   :  { %v2178_v12 = vadd.f32 %v2161_v36, %v1991_v54 }
 0x3f6   :  { %v2163_v21 = vpop.permute.xlu1 %2162 }
 0x3f7   :  { %v7582_v24 = vadd.f32 %v2178_v12, %v1963_v5  ;;  %v2179_v15 = vadd.f32 %v2163_v21, %v1993_v16  ;;  %v2037_v16 = vand.u32 31, %v7590_v59 }
 0x3f9   :  { %v7584_v37 = vadd.f32 %v2179_v15, %v1967_v9  ;;  %vm2256_vm5 = vcmp.ne.s32.totalorder %v2037_v16, 31  ;;  %v2011_v15 = vadd.s32 56, %v8428_v1 }
 0x3fc   :  { %v2189_v33 = vpop.permute.xlu0 %2188 }
 0x3fd   :  { %v2212_v26 = vadd.f32 %v2189_v33, %v7504_v28  ;;  %v2323_v28 = vmul.f32 %v7592_v55, %v2308_v45  ;;  %v2340_v33 = vadd.f32 %v7601_v63, %v2325_v50 }
 0x3fe   :  { %v2191_v62 = vpop.permute.xlu1 %2190 }
 0x3ff   :  { %v2285_v5 = vadd.f32 %v7513_v52, %v2212_v26  ;;  %v2213_v0 = vadd.f32 %v2191_v62, %v7508_v61  ;;  %v2324_v52 = vmul.f32 %v7592_v55, %v2309_v44  ;;  %v2303_v61 = vadd.f32 %v7580_v53, %v2183_v38 }
 0x400   :  { %v2338_v43 = vadd.f32 %v7601_v63, %v2323_v28  ;;  %v2280_v38 = vsel %vm2256_vm5, %v7538_v17, 0.0  ;;  %v2305_v17 = vadd.f32 %v7580_v53, %v2185_v27  ;;  %v2312_v26 = vmax.f32 %v2304_v57, 0.0 }
 0x401   :  { %v2346_v9 = vadd.f32 %v7580_v53, %v2285_v5  ;;  %v2286_v54 = vadd.f32 %v7522_v18, %v2213_v0  ;;  %v2339_v60 = vadd.f32 %v7601_v63, %v2324_v52  ;;  %v2311_v39 = vmax.f32 %v2303_v61, 0.0 }
 0x403   :  { %v2354_v7 = vmax.f32 %v2346_v9, 0.0  ;;  %v2347_v19 = vadd.f32 %v7580_v53, %v2286_v54  ;;  %v2326_v12 = vmul.f32 %v7592_v55, %v2311_v39  ;;  %v2313_v9 = vmax.f32 %v2305_v17, 0.0 }
 0x404   :  { %v2193_v14 = vpop.permute.xlu0 %2192  ;;  %v2065_v54 = vand.u32 31, %v2011_v15 }
 0x405   :  { %v2362_v22 = vmul.f32 %v7592_v55, %v2354_v7  ;;  %v2355_v11 = vmax.f32 %v2347_v19, 0.0  ;;  %v2214_v18 = vadd.f32 %v2193_v14, %v7515_v13  ;;  %v2341_v44 = vadd.f32 %v7601_v63, %v2326_v12 }
 0x406   :  { %v2195_v58 = vpop.permute.xlu1 %2194  ;;  %v2327_v7 = vmul.f32 %v7592_v55, %v2312_v26  ;;  %v2306_v19 = vadd.f32 %v7580_v53, %v7582_v24  ;;  %v2328_v61 = vmul.f32 %v7592_v55, %v2313_v9  ;;  %v2307_v14 = vadd.f32 %v7580_v53, %v7584_v37 }
 0x407   :  { %v2370_v29 = vadd.f32 %v7601_v63, %v2362_v22  ;;  %v2363_v20 = vmul.f32 %v7592_v55, %v2355_v11  ;;  %v2287_v41 = vadd.f32 %v7527_v47, %v2214_v18  ;;  %v2215_v4 = vadd.f32 %v2195_v58, %v7519_v6 }
 0x408   :  { %vm7644_vm7 = vcmp.ne.s32.totalorder %v2065_v54, 31  ;;  %v2342_v32 = vadd.f32 %v7601_v63, %v2327_v7  ;;  %v2314_v58 = vmax.f32 %v2306_v19, 0.0 }
 0x409   :  { %v2378_v13 = vmax.f32 %v2338_v43, %v2370_v29  ;;  %v2371_v46 = vadd.f32 %v7601_v63, %v2363_v20  ;;  %v2348_v2 = vadd.f32 %v7580_v53, %v2287_v41  ;;  %v2288_v34 = vadd.f32 %v2280_v38, %v2215_v4 }
 0x40a   :  { %v2315_v4 = vmax.f32 %v2307_v14, 0.0 }
 0x40b   :  { %2387 = vst.msk [vmem:[#allocation2] sm:$0xff] %vm2386_vm6, %v2378_v13  ;;  %v2379_v47 = vmax.f32 %v2339_v60, %v2371_v46  ;;  %v2356_v6 = vmax.f32 %v2348_v2, 0.0  ;;  %v2349_v36 = vadd.f32 %v7580_v53, %v2288_v34  ;;  %v2329_v46 = vmul.f32 %v7592_v55, %v2314_v58 }
 0x40c   :  { %v2197_v21 = vpop.permute.xlu0 %2196  ;;  %v2330_v57 = vmul.f32 %v7592_v55, %v2315_v4  ;;  %v5313_v4 = vld [vmem:[#allocation18 + $0x24] ss:$16 sps:$4 sm:$0xff]  }
 0x40d   :  { %2388 = vst.msk [vmem:[#allocation2 + $0x8] sm:$0xff] %vm2386_vm6, %v2379_v47  ;;  %v2364_v51 = vmul.f32 %v7592_v55, %v2356_v6  ;;  %v2357_v3 = vmax.f32 %v2349_v36, 0.0  ;;  %v2216_v56 = vadd.f32 %v2197_v21, %v7529_v31  ;;  %v2344_v12 = vadd.f32 %v7601_v63, %v2329_v46 }
 0x40e   :  { %v2199_v45 = vpop.permute.xlu1 %2198 }
 0x40f   :  { %v2372_v62 = vadd.f32 %v7601_v63, %v2364_v51  ;;  %v2365_v5 = vmul.f32 %v7592_v55, %v2357_v3  ;;  %v2289_v27 = vadd.f32 %v7541_v8, %v2216_v56  ;;  %v2217_v0 = vadd.f32 %v2199_v45, %v7533_v49 }
 0x411   :  { %v2380_v16 = vmax.f32 %v2340_v33, %v2372_v62  ;;  %v2373_v28 = vadd.f32 %v7601_v63, %v2365_v5  ;;  %v2350_v31 = vadd.f32 %v7580_v53, %v2289_v27  ;;  %v2290_v35 = vadd.f32 %v7555_v40, %v2217_v0 }
 0x412   :  { %v2252_v40 = vsel %vm2228_vm1, %v2242_v48, 0.0  ;;  %v2343_v48 = vadd.f32 %v7601_v63, %v2328_v61 }
 0x413   :  { %2389 = vst.msk [vmem:[#allocation2 + $0x10] sm:$0xff] %vm2386_vm6, %v2380_v16  ;;  %v2381_v8 = vmax.f32 %v2341_v44, %v2373_v28  ;;  %v2358_v49 = vmax.f32 %v2350_v31, 0.0  ;;  %v2351_v52 = vadd.f32 %v7580_v53, %v2290_v35  ;;  %v2284_v60 = vsel %vm7644_vm7, %v2252_v40, 0.0 }
 0x414   :  { %v2201_v22 = vpop.permute.xlu0 %2200  ;;  %v2395_v34 = vld [vmem:[#allocation2] ss:$2 sm:$0xff]  ;;  %v2403_v62 = vld [vmem:[#allocation2 + $0x1] ss:$2 sm:$0xff] }
 0x415   :  { %2390 = vst.msk [vmem:[#allocation2 + $0x18] sm:$0xff] %vm2386_vm6, %v2381_v8  ;;  %v2366_v24 = vmul.f32 %v7592_v55, %v2358_v49  ;;  %v2359_v18 = vmax.f32 %v2351_v52, 0.0  ;;  %v2218_v43 = vadd.f32 %v2201_v22, %v7543_v25 }
 0x416   :  { %v2203_v37 = vpop.permute.xlu1 %2202 }
 0x417   :  { %v2374_v29 = vadd.f32 %v7601_v63, %v2366_v24  ;;  %v2367_v20 = vmul.f32 %v7592_v55, %v2359_v18  ;;  %v2291_v41 = vadd.f32 %v7560_v10, %v2218_v43  ;;  %v2219_v23 = vadd.f32 %v2203_v37, %v7547_v42 }
 0x419   :  { %v2382_v39 = vmax.f32 %v2342_v32, %v2374_v29  ;;  %v2375_v25 = vadd.f32 %v7601_v63, %v2367_v20  ;;  %v2352_v38 = vadd.f32 %v7580_v53, %v2291_v41  ;;  %v2292_v13 = vadd.f32 %v2284_v60, %v2219_v23  ;;  %v5308_v20 = vld [vmem:[#allocation18] ss:$16 sps:$4 sm:$0xff]   ;;  %v5310_v41 = vld [vmem:[#allocation18 + $0x4] ss:$16 sps:$4 sm:$0xff]  }
 0x41a   :  { %2839 = vmatprep.subr.bf16.mxu1 %v5310_v41  ;;  %v2564_v23 = vand.u32 15, %v7590_v59 }
 0x41b   :  { %2391 = vst.msk [vmem:[#allocation2 + $0x20] sm:$0xff] %vm2386_vm6, %v2382_v39  ;;  %v2383_v2 = vmax.f32 %v2343_v48, %v2375_v25  ;;  %v2360_v10 = vmax.f32 %v2352_v38, 0.0  ;;  %v2353_v42 = vadd.f32 %v7580_v53, %v2292_v13  ;;  %v2345_v53 = vadd.f32 %v7601_v63, %v2330_v57  ;;  %v5311_v48 = vld [vmem:[#allocation18 + $0x20] ss:$16 sps:$4 sm:$0xff]   ;;  %v5316_v39 = vld [vmem:[#allocation18 + $0xc] ss:$16 sps:$4 sm:$0xff]  }
 0x41c   :  { %v2397_v50 = vld [vmem:[#allocation2 + $0x10] ss:$2 sm:$0xff]  ;;  %v2405_v56 = vld [vmem:[#allocation2 + $0x11] ss:$2 sm:$0xff]  ;;  %vm2670_vm9 = vcmp.ne.s32.totalorder %v2564_v23, 15 }
 0x41d   :  { %2392 = vst.msk [vmem:[#allocation2 + $0x28] sm:$0xff] %vm2386_vm6, %v2383_v2  ;;  %v2368_v47 = vmul.f32 %v7592_v55, %v2360_v10  ;;  %v2361_v6 = vmax.f32 %v2353_v42, 0.0  ;;  %v2410_v36 = vpack.c.bf16 %v2397_v50, %v2395_v34  ;;  %v2412_v5 = vpack.c.bf16 %v2405_v56, %v2403_v62 }
 0x41e   :  { %v2006_v42 = vadd.s32 16, %v8428_v1  ;;  %v2543_v34 = vand.u32 15, %v8428_v1 }
 0x41f   :  { %v2376_v17 = vadd.f32 %v7601_v63, %v2368_v47  ;;  %v2369_v21 = vmul.f32 %v7592_v55, %v2361_v6  ;;  %5081 = vmatprep.mubr.msk.bf16.mxu1 %vm2386_vm6, %v2410_v36 }
 0x420   :  { %v2557_v47 = vand.u32 15, %v2006_v42  ;;  %vm2587_vm10 = vcmp.ne.s32.totalorder %v2543_v34, 0 }
 0x421   :  { %v2384_v15 = vmax.f32 %v2344_v12, %v2376_v17  ;;  %v2377_v51 = vadd.f32 %v7601_v63, %v2369_v21  ;;  %v2005_v63 = vadd.s32 8, %v8428_v1  ;;  %v4857_v21 = vld [vmem:[#allocation14] ss:$0 sm:$0xff] }
 0x422   :  { %vm7729_vm11 = vcmp.ne.s32.totalorder %v2557_v47, 0  ;;  %v5319_v47 = vld [vmem:[#allocation18 + $0x2c] ss:$16 sps:$4 sm:$0xff]  }
 0x423   :  { %2393 = vst.msk [vmem:[#allocation2 + $0x30] sm:$0xff] %vm2386_vm6, %v2384_v15  ;;  %v2385_v3 = vmax.f32 %v2345_v53, %v2377_v51  ;;  %v2550_v35 = vand.u32 15, %v2005_v63 }
 0x424   :  { %v2399_v33 = vld [vmem:[#allocation2 + $0x20] ss:$2 sm:$0xff]  ;;  %v2407_v27 = vld [vmem:[#allocation2 + $0x21] ss:$2 sm:$0xff] }
 0x425   :  { %2394 = vst.msk [vmem:[#allocation2 + $0x38] sm:$0xff] %vm2386_vm6, %v2385_v3  ;;  %vm2668_vm8 = vcmp.ne.s32.totalorder %v2550_v35, 15 }
 0x42c   :  { %v2401_v26 = vld [vmem:[#allocation2 + $0x30] ss:$2 sm:$0xff]  ;;  %v2409_v55 = vld [vmem:[#allocation2 + $0x31] ss:$2 sm:$0xff] }
 0x42d   :  { %v2411_v45 = vpack.c.bf16 %v2401_v26, %v2399_v33  ;;  %v2413_v0 = vpack.c.bf16 %v2409_v55, %v2407_v27  ;;  %v4858_v55 = vld [vmem:[#allocation15] ss:$0 sm:$0xff] }
 0x42f   :  { %5082 = vmatmul.mubr.msk.bf16.vlgmr.msra.gmra.mrb[64].mxu1 %vm2386_vm6, %v2411_v45 }
 0x430   :  { %5085 = vmatprep.mubr.msk.bf16.mxu1 %vm2386_vm6, %v2412_v5  ;;  %2840 = vmatpush1.bf16.msra.mxu1 %v5308_v20 }
 0x431   :  { %2841 = vmatprep.subr.bf16.mxu1 %v5313_v4 }
 0x434   :  { %2842 = vmatpush1.bf16.msra.mxu1 %v5311_v48 }
 0x435   :  { %2892 = vmatprep.subr.bf16.mxu1 %v5316_v39 }
 0x437   :  { %5086 = vmatmul.mubr.msk.bf16.gmra.mrb[68].mxu1 %vm2386_vm6, %v2413_v0 }
 0x438   :  { %2871 = vmatprep.mubr.bf16.mxu1 %v8427_v30 }
 0x502   :  { %v7683_v44 = vpop.f32.mrb[64].mxu1 }
 0x503   :  { %2611 = vrot.lane.b32.xlu0 %v7683_v44, %s6103_s11  ;;  %v7687_v9 = vpop.f32.mrb[65].mxu1  ;;  %v2658_v16 = vrot.slane %v7683_v44, 1 }
 0x504   :  { %v7689_v54 = vpop.f32.mrb[66].mxu1  ;;  %v2655_v7 = vrot.slane %v7687_v9, 1 }
 0x505   :  { %v2660_v28 = vrot.slane %v7689_v54, 1  ;;  %2613 = vrot.lane.b32.xlu1 %v7689_v54, %s6103_s11  ;;  %v7695_v31 = vpop.f32.mrb[67].mxu1 }
 0x506   :  { %v2656_v19 = vrot.slane %v7695_v31, 1 }
 0x507   :  { %2607 = vrot.lane.b32.xlu0 %v7687_v9, %s6103_s11  ;;  %v2661_v8 = vsel %vm2228_vm1, %v2658_v16, %v2660_v28  ;;  %v2666_v60 = vsel %vm2228_vm1, %v2660_v28, 0.0 }
 0x508   :  { %v2657_v49 = vsel %vm2228_vm1, %v2655_v7, %v2656_v19  ;;  %v2659_v52 = vsel %vm2228_vm1, %v2656_v19, %v2658_v16  ;;  %v2682_v25 = vsel %vm2670_vm9, %v2666_v60, 0.0 }
 0x509   :  { %2609 = vrot.lane.b32.xlu1 %v7695_v31, %s6103_s11  ;;  %v2680_v11 = vsel %vm2668_vm8, %v2659_v52, 0.0  ;;  %v4859_v52 = vld [vmem:[#allocation17] ss:$0 sm:$0xff] }
 0x50a   :  { %v5087_v61 = vpop.f32.mrb[68].mxu1 }
 0x50b   :  { %2687 = vrot.lane.b32.xlu0 %v2657_v49, %s6087_s7  ;;  %v2508_v14 = vpop.f32.mrb[69].mxu1  ;;  %v2530_v40 = vrot.slane %v5087_v61, 7 }
 0x50c   :  { %v5088_v22 = vpop.f32.mrb[70].mxu1  ;;  %v2527_v43 = vrot.slane %v2508_v14, 7 }
 0x50d   :  { %v2532_v24 = vrot.slane %v5088_v22, 7  ;;  %2689 = vrot.lane.b32.xlu1 %v2680_v11, %s6087_s7  ;;  %v2511_v18 = vpop.f32.mrb[71].mxu1 }
 0x50e   :  { %v2528_v32 = vrot.slane %v2511_v18, 7  ;;  %v2538_v6 = vsel %vm1978_vm2, 0.0, %v2527_v43 }
 0x50f   :  { %2643 = vrot.lane.b32.xlu0 %v5087_v61, %s6103_s11  ;;  %v7710_v58 = vsel %vm1978_vm2, %v2530_v40, %v2532_v24  ;;  %v2599_v17 = vsel %vm2587_vm10, %v2538_v6, 0.0 }
 0x510   :  { %v2531_v37 = vsel %vm1978_vm2, %v2528_v32, %v2530_v40  ;;  %v2529_v29 = vsel %vm1978_vm2, %v2527_v43, %v2528_v32 }
 0x511   :  { %2645 = vrot.lane.b32.xlu1 %v5088_v22, %s6103_s11  ;;  %v2601_v5 = vsel %vm7729_vm11, %v2531_v37, 0.0 }
 0x513   :  { %2639 = vrot.lane.b32.xlu0 %v2508_v14, %s6103_s11 }
 0x515   :  { %2641 = vrot.lane.b32.xlu1 %v2511_v18, %s6103_s11 }
 0x517   :  { %2623 = vrot.lane.b32.xlu0 %v2508_v14, %s6087_s7 }
 0x519   :  { %2625 = vrot.lane.b32.xlu1 %v2511_v18, %s6087_s7 }
 0x51b   :  { %2627 = vrot.lane.b32.xlu0 %v5087_v61, %s6087_s7 }
 0x51d   :  { %2629 = vrot.lane.b32.xlu1 %v5088_v22, %s6087_s7 }
 0x51f   :  { %2691 = vrot.lane.b32.xlu0 %v2661_v8, %s6087_s7 }
 0x521   :  { %2693 = vrot.lane.b32.xlu1 %v2682_v25, %s6087_s7 }
 0x575   :  { %v2612_v38 = vpop.permute.xlu0 %2611 }
 0x576   :  { %v2621_v28 = vadd.f32 %v2612_v38, %v2601_v5  ;;  %v5326_v5 = vld [vmem:[%s8284_s14 + $0x20] ss:$16 sps:$4 sm:$0xff]  }
 0x577   :  { %v2614_v59 = vpop.permute.xlu1 %2613 }
 0x578   :  { %v2622_v49 = vadd.f32 %v2614_v59, %v7710_v58 }
 0x579   :  { %v2608_v13 = vpop.permute.xlu0 %2607 }
 0x57a   :  { %v2619_v51 = vadd.f32 %v2608_v13, %v2599_v17  ;;  %v5317_v17 = vld [vmem:[#allocation18 + $0x28] ss:$16 sps:$4 sm:$0xff]  }
 0x57b   :  { %v2610_v46 = vpop.permute.xlu1 %2609 }
 0x57c   :  { %v2620_v33 = vadd.f32 %v2610_v46, %v2529_v29 }
 0x57d   :  { %v2688_v2 = vpop.permute.xlu0 %2687 }
 0x57f   :  { %v2690_v10 = vpop.permute.xlu1 %2689 }
 0x581   :  { %v2644_v50 = vpop.permute.xlu0 %2643 }
 0x582   :  { %v2653_v22 = vadd.f32 %v7683_v44, %v2644_v50 }
 0x583   :  { %v2646_v57 = vpop.permute.xlu1 %2645 }
 0x584   :  { %v2654_v18 = vadd.f32 %v7689_v54, %v2646_v57 }
 0x585   :  { %v2640_v36 = vpop.permute.xlu0 %2639 }
 0x586   :  { %v2651_v12 = vadd.f32 %v2640_v36, %v7687_v9 }
 0x587   :  { %v2642_v53 = vpop.permute.xlu1 %2641 }
 0x588   :  { %v2699_v3 = vadd.f32 %v2688_v2, %v2651_v12  ;;  %v2652_v1 = vadd.f32 %v2642_v53, %v7695_v31 }
 0x589   :  { %v2624_v56 = vpop.permute.xlu0 %2623 }
 0x58a   :  { %v2740_v26 = vadd.f32 %v4857_v21, %v2699_v3  ;;  %v2700_v45 = vadd.f32 %v2690_v10, %v2652_v1  ;;  %v2635_v62 = vadd.f32 %v2624_v56, %v2619_v51  ;;  %v5314_v10 = vld [vmem:[#allocation18 + $0x8] ss:$16 sps:$4 sm:$0xff]   ;;  %v5320_v1 = vld [vmem:[%s8284_s14] ss:$16 sps:$4 sm:$0xff]   ;;  %v5322_v56 = vld [vmem:[%s8284_s14 + $0x4] ss:$16 sps:$4 sm:$0xff]  }
 0x58b   :  { %v2626_v27 = vpop.permute.xlu1 %2625 }
 0x58c   :  { %v2744_v0 = vmax.f32 %v2740_v26, 0.0  ;;  %v2741_v63 = vadd.f32 %v4857_v21, %v2700_v45  ;;  %v2710_v9 = vadd.f32 %v4857_v21, %v2635_v62  ;;  %v2636_v16 = vadd.f32 %v2626_v27, %v2620_v33  ;;  %v5323_v33 = vld [vmem:[%s8286_s16] ss:$16 sps:$4 sm:$0xff]   ;;  %v5325_v26 = vld [vmem:[%s8286_s16 + $0x4] ss:$16 sps:$4 sm:$0xff]  }
 0x58d   :  { %v2628_v35 = vpop.permute.xlu0 %2627  ;;  %v5328_v45 = vld [vmem:[%s8284_s14 + $0x24] ss:$16 sps:$4 sm:$0xff]   ;;  %3543 = vmatprep.subr.bf16.mxu0 %v5325_v26 }
 0x58e   :  { %v2748_v7 = vmul.f32 %v4858_v55, %v2744_v0  ;;  %v2745_v19 = vmax.f32 %v2741_v63, 0.0  ;;  %v2714_v8 = vmax.f32 %v2710_v9, 0.0  ;;  %v2711_v31 = vadd.f32 %v4857_v21, %v2636_v16  ;;  %v5331_v62 = vld [vmem:[%s8286_s16 + $0x24] ss:$16 sps:$4 sm:$0xff]   ;;  %3544 = vmatpush1.bf16.msra.mxu0 %v5323_v33  ;;  %v5332_v63 = vld [vmem:[%s8284_s14 + $0x40] ss:$16 sps:$4 sm:$0xff]  }
 0x58f   :  { %v2637_v61 = vadd.f32 %v2628_v35, %v2621_v28  ;;  %v2630_v14 = vpop.permute.xlu1 %2629  ;;  %v5334_v27 = vld [vmem:[%s8284_s14 + $0x44] ss:$16 sps:$4 sm:$0xff]   ;;  %3545 = vmatprep.subr.bf16.mxu0 %v5331_v62  ;;  %v5335_v9 = vld [vmem:[%s8286_s16 + $0x40] ss:$16 sps:$4 sm:$0xff]  }
 0x590   :  { %v2749_v11 = vmul.f32 %v4858_v55, %v2745_v19  ;;  %v2725_v40 = vmul.f32 %v4858_v55, %v2714_v8  ;;  %v2715_v24 = vmax.f32 %v2711_v31, 0.0  ;;  %v2638_v32 = vadd.f32 %v2630_v14, %v2622_v49  ;;  %v5337_v0 = vld [vmem:[%s8286_s16 + $0x44] ss:$16 sps:$4 sm:$0xff]   ;;  %v5338_v35 = vld [vmem:[%s8284_s14 + $0x60] ss:$16 sps:$4 sm:$0xff]  }
 0x591   :  { %v2712_v43 = vadd.f32 %v4857_v21, %v2637_v61  ;;  %v2692_v37 = vpop.permute.xlu0 %2691  ;;  %v2752_v29 = vadd.f32 %v4859_v52, %v2748_v7  ;;  %v5340_v16 = vld [vmem:[%s8284_s14 + $0x64] ss:$16 sps:$4 sm:$0xff]   ;;  %v5341_v7 = vld [vmem:[%s8286_s16 + $0x60] ss:$16 sps:$4 sm:$0xff]  }
 0x592   :  { %v2736_v20 = vadd.f32 %v4859_v52, %v2725_v40  ;;  %v2726_v41 = vmul.f32 %v4858_v55, %v2715_v24  ;;  %v2701_v23 = vadd.f32 %v2692_v37, %v2653_v22  ;;  %v2753_v48 = vadd.f32 %v4859_v52, %v2749_v11  ;;  %v5343_v28 = vld [vmem:[%s8286_s16 + $0x64] ss:$16 sps:$4 sm:$0xff]   ;;  %v5344_v31 = vld [vmem:[%s8284_s14 + $0x80] ss:$16 sps:$4 sm:$0xff]  }
 0x593   :  { %v2716_v4 = vmax.f32 %v2712_v43, 0.0  ;;  %v2713_v58 = vadd.f32 %v4857_v21, %v2638_v32  ;;  %v2694_v60 = vpop.permute.xlu1 %2693  ;;  %v5346_v19 = vld [vmem:[%s8284_s14 + $0x84] ss:$16 sps:$4 sm:$0xff]   ;;  %v5347_v49 = vld [vmem:[%s8286_s16 + $0x80] ss:$16 sps:$4 sm:$0xff]  }
 0x594   :  { %v2756_v39 = vmax.f32 %v2736_v20, %v2752_v29  ;;  %v2737_v25 = vadd.f32 %v4859_v52, %v2726_v41  ;;  %v2742_v38 = vadd.f32 %v4857_v21, %v2701_v23  ;;  %v2702_v44 = vadd.f32 %v2694_v60, %v2654_v18  ;;  %v5349_v8 = vld [vmem:[%s8286_s16 + $0x84] ss:$16 sps:$4 sm:$0xff]   ;;  %v5350_v14 = vld [vmem:[%s8284_s14 + $0xa0] ss:$16 sps:$4 sm:$0xff]   ;;  %v5370_v20 = vld [vmem:[%s8284_s14 + $0xc] ss:$16 sps:$4 sm:$0xff]  }
 0x595   :  { %v2717_v59 = vmax.f32 %v2713_v58, 0.0  ;;  %v2727_v46 = vmul.f32 %v4858_v55, %v2716_v4  ;;  %v5355_v61 = vld [vmem:[%s8286_s16 + $0xa4] ss:$16 sps:$4 sm:$0xff]   ;;  %v5353_v22 = vld [vmem:[%s8286_s16 + $0xa0] ss:$16 sps:$4 sm:$0xff]  }
 0x596   :  { %v2757_v13 = vmax.f32 %v2737_v25, %v2753_v48  ;;  %v2746_v2 = vmax.f32 %v2742_v38, 0.0  ;;  %v2743_v54 = vadd.f32 %v4857_v21, %v2702_v44  ;;  %v5358_v11 = vld [vmem:[%s8284_s14 + $0xc4] ss:$16 sps:$4 sm:$0xff]   ;;  %v5356_v24 = vld [vmem:[%s8284_s14 + $0xc0] ss:$16 sps:$4 sm:$0xff]  }
 0x597   :  { %v2728_v34 = vmul.f32 %v4858_v55, %v2717_v59  ;;  %v2738_v6 = vadd.f32 %v4859_v52, %v2727_v46  ;;  %v5361_v40 = vld [vmem:[%s8286_s16 + $0xc4] ss:$16 sps:$4 sm:$0xff]   ;;  %v5359_v18 = vld [vmem:[%s8286_s16 + $0xc0] ss:$16 sps:$4 sm:$0xff]  }
 0x598   :  { %v2760_v42 = vpack.c.bf16 %v2757_v13, %v2756_v39  ;;  %v2750_v50 = vmul.f32 %v4858_v55, %v2746_v2  ;;  %v2747_v57 = vmax.f32 %v2743_v54, 0.0  ;;  %v5364_v43 = vld [vmem:[%s8284_s14 + $0xe4] ss:$16 sps:$4 sm:$0xff]   ;;  %v5362_v37 = vld [vmem:[%s8284_s14 + $0xe0] ss:$16 sps:$4 sm:$0xff]  }
 0x599   :  { %v2739_v53 = vadd.f32 %v4859_v52, %v2728_v34  ;;  %v5367_v32 = vld [vmem:[%s8286_s16 + $0xe4] ss:$16 sps:$4 sm:$0xff]   ;;  %v5365_v29 = vld [vmem:[%s8286_s16 + $0xe0] ss:$16 sps:$4 sm:$0xff]  }
 0x59a   :  { %v2754_v36 = vadd.f32 %v4859_v52, %v2750_v50  ;;  %v2751_v12 = vmul.f32 %v4858_v55, %v2747_v57  ;;  %4868 = vmatmul.mubr.msk.bf16.vlgmr.msra.gmra.mrb[72].mxu1 %vm2832_vm12, %v2760_v42  ;;  %v5329_v55 = vld [vmem:[%s8286_s16 + $0x20] ss:$16 sps:$4 sm:$0xff]   ;;  %v8433_v23 = vld [vmem:[#allocation37_spill] sm:$0xff]  ;;  %v8434_v4 = vld [vmem:[#allocation39_spill] sm:$0xff] }
 0x59b   :  { %2893 = vmatpush1.bf16.msra.mxu1 %v5314_v10  ;;  %2881 = vmatprep.mubr.bf16.mxu1 %v8427_v30  ;;  %v2770_v41 = vld [vmem:[#allocation20] sm:$0xf]  ;;  %v8436_v57 = vld [vmem:[#allocation40_spill] sm:$0xff] }
 0x59c   :  { %v2758_v15 = vmax.f32 %v2738_v6, %v2754_v36  ;;  %v2755_v51 = vadd.f32 %v4859_v52, %v2751_v12  ;;  %2894 = vmatprep.subr.bf16.mxu1 %v5319_v47  ;;  %3546 = vmatpush1.bf16.msra.mxu0 %v5329_v55  ;;  %v5352_v52 = vld [vmem:[%s8284_s14 + $0xa4] ss:$16 sps:$4 sm:$0xff]   ;;  %v7847_v48 = vrot.slane %v2770_v41, %v8433_v23 }
 0x59d   :  { %3547 = vmatprep.subr.bf16.mxu0 %v5337_v0  ;;  %v7850_v58 = vrot.slane %v2770_v41, %v8434_v4  ;;  %v8435_v34 = vld [vmem:[#allocation38_spill] sm:$0xff]  ;;  %v7860_v47 = vrot.slane %v2770_v41, %v8436_v57 }
 0x59e   :  { %v2759_v21 = vmax.f32 %v2739_v53, %v2755_v51  ;;  %v7857_v50 = vrot.slane %v2770_v41, %v8435_v34  ;;  %v5373_v41 = vld [vmem:[%s8284_s14 + $0x2c] ss:$16 sps:$4 sm:$0xff]  }
 0x59f   :  { %2895 = vmatpush1.bf16.msra.mxu1 %v5317_v17 }
 0x5a0   :  { %v2761_v3 = vpack.c.bf16 %v2759_v21, %v2758_v15  ;;  %3186 = vmatprep.subr.bf16.mxu1 %v5322_v56  ;;  %3548 = vmatpush1.bf16.msra.mxu0 %v5335_v9 }
 0x5a1   :  { %3549 = vmatprep.subr.bf16.mxu0 %v5343_v28 }
 0x5a2   :  { %4869 = vmatmul.mubr.msk.bf16.gmra.mrb[76].mxu1 %vm2832_vm12, %v2761_v3 }
 0x5a3   :  { %2924 = vmatprep.mubr.bf16.mxu1 %v8427_v30 }
 0x5a4   :  { %3550 = vmatpush1.bf16.msra.mxu0 %v5341_v7 }
 0x5a5   :  { %3551 = vmatprep.subr.bf16.mxu0 %v5349_v8 }
 0x5a8   :  { %3552 = vmatpush1.bf16.msra.mxu0 %v5347_v49 }
 0x5a9   :  { %3553 = vmatprep.subr.bf16.mxu0 %v5355_v61 }
 0x5aa   :  { %4870 = vmatmul.mubr.msk.bf16.vlgmr.msra.gmra.mrb[80].mxu1 %vm2832_vm12, %v2760_v42 }
 0x5ab   :  { %2934 = vmatprep.mubr.bf16.mxu1 %v8427_v30  ;;  %3187 = vmatpush1.bf16.msra.mxu1 %v5320_v1 }
 0x5ac   :  { %3188 = vmatprep.subr.bf16.mxu1 %v5328_v45  ;;  %3554 = vmatpush1.bf16.msra.mxu0 %v5353_v22 }
 0x5ad   :  { %3555 = vmatprep.subr.bf16.mxu0 %v5361_v40 }
 0x5af   :  { %3189 = vmatpush1.bf16.msra.mxu1 %v5326_v5 }
 0x5b0   :  { %3190 = vmatprep.subr.bf16.mxu1 %v5334_v27  ;;  %3556 = vmatpush1.bf16.msra.mxu0 %v5359_v18 }
 0x5b1   :  { %3557 = vmatprep.subr.bf16.mxu0 %v5367_v32 }
 0x5b2   :  { %4871 = vmatmul.mubr.msk.bf16.gmra.mrb[84].mxu1 %vm2832_vm12, %v2761_v3 }
 0x5b3   :  { %3218 = vmatprep.mubr.bf16.mxu1 %v8427_v30  ;;  %3191 = vmatpush1.bf16.msra.mxu1 %v5332_v63 }
 0x5b4   :  { %3192 = vmatprep.subr.bf16.mxu1 %v5340_v16  ;;  %3558 = vmatpush1.bf16.msra.mxu0 %v5365_v29  ;;  %v5368_v29 = vld [vmem:[%s8284_s14 + $0x8] ss:$16 sps:$4 sm:$0xff]  }
 0x5b7   :  { %3193 = vmatpush1.bf16.msra.mxu1 %v5338_v35 }
 0x5b8   :  { %3194 = vmatprep.subr.bf16.mxu1 %v5346_v19 }
 0x5bb   :  { %3195 = vmatpush1.bf16.msra.mxu1 %v5344_v31 }
 0x5bc   :  { %3196 = vmatprep.subr.bf16.mxu1 %v5352_v52 }
 0x5bf   :  { %3197 = vmatpush1.bf16.msra.mxu1 %v5350_v14 }
 0x5c0   :  { %3198 = vmatprep.subr.bf16.mxu1 %v5358_v11 }
 0x5c3   :  { %3199 = vmatpush1.bf16.msra.mxu1 %v5356_v24 }
 0x5c4   :  { %3200 = vmatprep.subr.bf16.mxu1 %v5364_v43 }
 0x5c7   :  { %3201 = vmatpush1.bf16.msra.mxu1 %v5362_v37 }
 0x5c8   :  { %3229 = vmatprep.subr.bf16.mxu1 %v5370_v20 }
 0x66d   :  { %v2873_v60 = vpop.f32.mrb[72].mxu1 }
 0x66e   :  { %v2874_v39 = vadd.f32 %v2873_v60, %v7847_v48  ;;  %v2875_v25 = vpop.f32.mrb[73].mxu1  ;;  %v5371_v60 = vld [vmem:[%s8284_s14 + $0x28] ss:$16 sps:$4 sm:$0xff]  }
 0x66f   :  { %v2876_v38 = vadd.f32 %v2875_v25, %v7850_v58  ;;  %v2877_v44 = vpop.f32.mrb[74].mxu1  ;;  %v5374_v25 = vld [vmem:[%s8284_s14 + $0x48] ss:$16 sps:$4 sm:$0xff]  }
 0x670   :  { %v4872_v59 = vmul.f32 -1.442695, %v2874_v39  ;;  %v2878_v13 = vadd.f32 %v2877_v44, %v7847_v48  ;;  %v2879_v46 = vpop.f32.mrb[75].mxu1  ;;  %v5376_v39 = vld [vmem:[%s8284_s14 + $0x4c] ss:$16 sps:$4 sm:$0xff]  }
 0x671   :  { %v4873_v2 = vmul.f32 -1.442695, %v2876_v38  ;;  %v2880_v54 = vadd.f32 %v2879_v46, %v7850_v58  ;;  %v5379_v38 = vld [vmem:[%s8284_s14 + $0x6c] ss:$16 sps:$4 sm:$0xff]   ;;  %v5377_v44 = vld [vmem:[%s8284_s14 + $0x68] ss:$16 sps:$4 sm:$0xff]  }
 0x672   :  { %5560 = vpow2.f32 %v4872_v59  ;;  %v4875_v10 = vmul.f32 -1.442695, %v2878_v13  ;;  %v5382_v59 = vld [vmem:[%s8284_s14 + $0x8c] ss:$16 sps:$4 sm:$0xff]   ;;  %v5380_v13 = vld [vmem:[%s8284_s14 + $0x88] ss:$16 sps:$4 sm:$0xff]  }
 0x673   :  { %5562 = vpow2.f32 %v4873_v2  ;;  %v4876_v42 = vmul.f32 -1.442695, %v2880_v54  ;;  %v5385_v46 = vld [vmem:[%s8284_s14 + $0xac] ss:$16 sps:$4 sm:$0xff]   ;;  %v5383_v2 = vld [vmem:[%s8284_s14 + $0xa8] ss:$16 sps:$4 sm:$0xff]  }
 0x674   :  { %5564 = vpow2.f32 %v4875_v10  ;;  %v5388_v54 = vld [vmem:[%s8284_s14 + $0xcc] ss:$16 sps:$4 sm:$0xff]   ;;  %v5386_v10 = vld [vmem:[%s8284_s14 + $0xc8] ss:$16 sps:$4 sm:$0xff]  }
 0x675   :  { %5566 = vpow2.f32 %v4876_v42  ;;  %v5391_v42 = vld [vmem:[%s8284_s14 + $0xec] ss:$16 sps:$4 sm:$0xff]  }
 0x67c   :  { %v5561_v6 = vpop.eup %5560 }
 0x67d   :  { %v5563_v36 = vpop.eup %5562  ;;  %v2995_v12 = vadd.f32 1.0, %v5561_v6  ;;  %v2926_v17 = vpop.f32.mrb[80].mxu1  ;;  %v5389_v6 = vld [vmem:[%s8284_s14 + $0xe8] ss:$16 sps:$4 sm:$0xff]  }
 0x67e   :  { %v5565_v53 = vpop.eup %5564  ;;  %v2996_v15 = vadd.f32 1.0, %v5563_v36  ;;  %v2927_v51 = vadd.f32 %v2926_v17, %v7857_v50  ;;  %v2928_v21 = vpop.f32.mrb[81].mxu1  ;;  %v5394_v36 = vld [vmem:[%s8286_s16 + $0xc] ss:$16 sps:$4 sm:$0xff]  }
 0x67f   :  { %v5567_v3 = vpop.eup %5566  ;;  %5568 = vrcp.f32 %v2995_v12  ;;  %v2998_v1 = vadd.f32 1.0, %v5565_v53  ;;  %v2929_v56 = vadd.f32 %v2928_v21, %v7860_v47  ;;  %v2930_v33 = vpop.f32.mrb[82].mxu1  ;;  %v5392_v12 = vld [vmem:[%s8286_s16 + $0x8] ss:$16 sps:$4 sm:$0xff]   ;;  %v5397_v17 = vld [vmem:[%s8286_s16 + $0x2c] ss:$16 sps:$4 sm:$0xff]  }
 0x680   :  { %5570 = vrcp.f32 %v2996_v15  ;;  %v2999_v26 = vadd.f32 1.0, %v5567_v3  ;;  %v4874_v45 = vmul.f32 -1.442695, %v2927_v51  ;;  %v2931_v62 = vadd.f32 %v2930_v33, %v7857_v50  ;;  %v2932_v5 = vpop.f32.mrb[83].mxu1  ;;  %v5395_v53 = vld [vmem:[%s8286_s16 + $0x28] ss:$16 sps:$4 sm:$0xff]  }
 0x681   :  { %5572 = vrcp.f32 %v2998_v1  ;;  %v2933_v27 = vadd.f32 %v2932_v5, %v7860_v47  ;;  %v5400_v15 = vld [vmem:[%s8286_s16 + $0x4c] ss:$16 sps:$4 sm:$0xff]   ;;  %v5398_v51 = vld [vmem:[%s8286_s16 + $0x48] ss:$16 sps:$4 sm:$0xff]  }
 0x682   :  { %5574 = vrcp.f32 %v2999_v26  ;;  %v4877_v55 = vmul.f32 -1.442695, %v2931_v62  ;;  %v5403_v21 = vld [vmem:[%s8286_s16 + $0x6c] ss:$16 sps:$4 sm:$0xff]   ;;  %v5401_v3 = vld [vmem:[%s8286_s16 + $0x68] ss:$16 sps:$4 sm:$0xff]  }
 0x683   :  { %5576 = vpow2.f32 %v4874_v45  ;;  %v5406_v1 = vld [vmem:[%s8286_s16 + $0x8c] ss:$16 sps:$4 sm:$0xff]   ;;  %v5407_v26 = vld [vmem:[%s8286_s16 + $0xa8] ss:$16 sps:$4 sm:$0xff]  }
 0x684   :  { %5578 = vtanh.f32 %v2929_v56  ;;  %v5404_v56 = vld [vmem:[%s8286_s16 + $0x88] ss:$16 sps:$4 sm:$0xff]   ;;  %v5409_v33 = vld [vmem:[%s8286_s16 + $0xac] ss:$16 sps:$4 sm:$0xff]  }
 0x685   :  { %5580 = vpow2.f32 %v4877_v55  ;;  %v5412_v45 = vld [vmem:[%s8286_s16 + $0xcc] ss:$16 sps:$4 sm:$0xff]   ;;  %v5410_v62 = vld [vmem:[%s8286_s16 + $0xc8] ss:$16 sps:$4 sm:$0xff]  }
 0x686   :  { %5582 = vtanh.f32 %v2933_v27  ;;  %v5415_v5 = vld [vmem:[%s8286_s16 + $0xec] ss:$16 sps:$4 sm:$0xff]   ;;  %v5413_v55 = vld [vmem:[%s8286_s16 + $0xe8] ss:$16 sps:$4 sm:$0xff]   ;;  %v5416_v27 = vld [vmem:[%s8287_s17] ss:$16 sps:$4 sm:$0xff]  }
 0x689   :  { %v5569_v0 = vpop.eup %5568 }
 0x68a   :  { %v5571_v63 = vpop.eup %5570 }
 0x68b   :  { %v5573_v9 = vpop.eup %5572  ;;  %v3013_v35 = vmul.f32 0.0, %v5571_v63  ;;  %v5419_v63 = vld [vmem:[%s8287_s17 + $0x8] ss:$16 sps:$4 sm:$0xff]  }
 0x68c   :  { %v5575_v16 = vpop.eup %5574 }
 0x68d   :  { %v5577_v28 = vpop.eup %5576  ;;  %v3014_v31 = vmul.f32 0.0, %v5575_v16  ;;  %v5424_v16 = vld [vmem:[%s8287_s17 + $0x24] ss:$16 sps:$4 sm:$0xff]  }
 0x68e   :  { %v5579_v7 = vpop.eup %5578  ;;  %v2997_v19 = vadd.f32 1.0, %v5577_v28  ;;  %v5427_v28 = vld [vmem:[%s8287_s17 + $0x2c] ss:$16 sps:$4 sm:$0xff]  }
 0x68f   :  { %v5581_v8 = vpop.eup %5580  ;;  %v3017_v49 = vmul.f32 %v5579_v7, %v5569_v0  ;;  %v5418_v0 = vld [vmem:[%s8287_s17 + $0x4] ss:$16 sps:$4 sm:$0xff]   ;;  %v5425_v7 = vld [vmem:[%s8287_s17 + $0x28] ss:$16 sps:$4 sm:$0xff]  }
 0x690   :  { %v5583_v52 = vpop.eup %5582  ;;  %v3000_v61 = vadd.f32 1.0, %v5581_v8  ;;  %5584 = vrcp.f32 %v2997_v19  ;;  %3890 = vmatprep.subr.bf16.mxu0 %v5418_v0  ;;  %v5430_v19 = vld [vmem:[%s8287_s17 + $0x44] ss:$16 sps:$4 sm:$0xff]   ;;  %v5433_v8 = vld [vmem:[%s8287_s17 + $0x4c] ss:$16 sps:$4 sm:$0xff]  }
 0x691   :  { %v7866_v14 = vadd.f32 %v3017_v49, %v3013_v35  ;;  %v3018_v22 = vmul.f32 %v5583_v52, %v5573_v9  ;;  %v5421_v9 = vld [vmem:[%s8287_s17 + $0xc] ss:$16 sps:$4 sm:$0xff]   ;;  %v5422_v35 = vld [vmem:[%s8287_s17 + $0x20] ss:$16 sps:$4 sm:$0xff]   ;;  %v5431_v49 = vld [vmem:[%s8287_s17 + $0x48] ss:$16 sps:$4 sm:$0xff]  }
 0x692   :  { %5586 = vrcp.f32 %v3000_v61  ;;  %v5436_v52 = vld [vmem:[%s8287_s17 + $0x64] ss:$16 sps:$4 sm:$0xff]   ;;  %v5439_v61 = vld [vmem:[%s8287_s17 + $0x6c] ss:$16 sps:$4 sm:$0xff]  }
 0x693   :  { %5588 = vtanh.f32 %v7866_v14  ;;  %v7869_v11 = vadd.f32 %v3018_v22, %v3014_v31  ;;  %v5428_v31 = vld [vmem:[%s8287_s17 + $0x40] ss:$16 sps:$4 sm:$0xff]  }
 0x694   :  { %v5434_v22 = vld [vmem:[%s8287_s17 + $0x60] ss:$16 sps:$4 sm:$0xff]  }
 0x695   :  { %5590 = vtanh.f32 %v7869_v11 }
 0x69a   :  { %v5585_v40 = vpop.eup %5584 }
 0x69c   :  { %v5587_v24 = vpop.eup %5586 }
 0x69d   :  { %v5589_v18 = vpop.eup %5588 }
 0x69e   :  { %v3023_v32 = vmul.f32 %v5589_v18, %v5585_v40  ;;  %v5437_v40 = vld [vmem:[%s8287_s17 + $0x68] ss:$16 sps:$4 sm:$0xff]   ;;  %v5445_v18 = vld [vmem:[%s8287_s17 + $0x8c] ss:$16 sps:$4 sm:$0xff]  }
 0x69f   :  { %v5591_v43 = vpop.eup %5590 }
 0x6a0   :  { %v3024_v37 = vmul.f32 %v5591_v43, %v5587_v24  ;;  %v5442_v24 = vld [vmem:[%s8287_s17 + $0x84] ss:$16 sps:$4 sm:$0xff]   ;;  %v5440_v43 = vld [vmem:[%s8287_s17 + $0x80] ss:$16 sps:$4 sm:$0xff]  }
 0x6a2   :  { %v7875_v20 = vpack.c.bf16 %v3024_v37, %v3023_v32  ;;  %v5443_v32 = vld [vmem:[%s8287_s17 + $0x88] ss:$16 sps:$4 sm:$0xff]   ;;  %v5448_v37 = vld [vmem:[%s8287_s17 + $0xa4] ss:$16 sps:$4 sm:$0xff]  }
 0x6a4   :  { %3219 = vmatmul.mubr.bf16.vlgmr.msra.gmra.mrb[76].mxu1 %v7875_v20  ;;  %3576 = vmatmul.mubr.bf16.vlgmr.msra.gmra.mrb[96].mxu0 %v7875_v20 }
 0x6a5   :  { %3230 = vmatpush1.bf16.msra.mxu1 %v5368_v29  ;;  %3261 = vmatprep.mubr.bf16.mxu1 %v8427_v30  ;;  %v5451_v29 = vld [vmem:[%s8287_s17 + $0xac] ss:$16 sps:$4 sm:$0xff]  }
 0x6a6   :  { %3231 = vmatprep.subr.bf16.mxu1 %v5373_v41  ;;  %3585 = vmatprep.mubr.bf16.mxu0 %v8427_v30  ;;  %v5449_v41 = vld [vmem:[%s8287_s17 + $0xa8] ss:$16 sps:$4 sm:$0xff]  }
 0x6a7   :  { %3891 = vmatpush1.bf16.msra.mxu0 %v5416_v27 }
 0x6a8   :  { %3892 = vmatprep.subr.bf16.mxu0 %v5424_v16  ;;  %v8081_v16 = vld [vmem:[#allocation21] sm:$0xf] }
 0x6a9   :  { %3232 = vmatpush1.bf16.msra.mxu1 %v5371_v60  ;;  %v5454_v60 = vld [vmem:[%s8287_s17 + $0xc4] ss:$16 sps:$4 sm:$0xff]  }
 0x6aa   :  { %3233 = vmatprep.subr.bf16.mxu1 %v5376_v39  ;;  %v5457_v39 = vld [vmem:[%s8287_s17 + $0xcc] ss:$16 sps:$4 sm:$0xff]  }
 0x6ab   :  { %3893 = vmatpush1.bf16.msra.mxu0 %v5422_v35 }
 0x6ac   :  { %3894 = vmatprep.subr.bf16.mxu0 %v5430_v19 }
 0x6ad   :  { %3234 = vmatpush1.bf16.msra.mxu1 %v5374_v25  ;;  %v5452_v25 = vld [vmem:[%s8287_s17 + $0xc0] ss:$16 sps:$4 sm:$0xff]  }
 0x6ae   :  { %3235 = vmatprep.subr.bf16.mxu1 %v5379_v38  ;;  %v5455_v38 = vld [vmem:[%s8287_s17 + $0xc8] ss:$16 sps:$4 sm:$0xff]  }
 0x6af   :  { %3895 = vmatpush1.bf16.msra.mxu0 %v5428_v31  ;;  %v8091_v31 = vrot.slane %v8081_v16, %v8434_v4 }
 0x6b0   :  { %3896 = vmatprep.subr.bf16.mxu0 %v5436_v52 }
 0x6b1   :  { %3236 = vmatpush1.bf16.msra.mxu1 %v5377_v44  ;;  %v5460_v44 = vld [vmem:[%s8287_s17 + $0xe4] ss:$16 sps:$4 sm:$0xff]  }
 0x6b2   :  { %3237 = vmatprep.subr.bf16.mxu1 %v5382_v59  ;;  %v5463_v59 = vld [vmem:[%s8287_s17 + $0xec] ss:$16 sps:$4 sm:$0xff]  }
 0x6b3   :  { %3897 = vmatpush1.bf16.msra.mxu0 %v5434_v22 }
 0x6b4   :  { %3898 = vmatprep.subr.bf16.mxu0 %v5442_v24 }
 0x6b5   :  { %3238 = vmatpush1.bf16.msra.mxu1 %v5380_v13  ;;  %v5458_v13 = vld [vmem:[%s8287_s17 + $0xe0] ss:$16 sps:$4 sm:$0xff]  }
 0x6b6   :  { %3239 = vmatprep.subr.bf16.mxu1 %v5385_v46  ;;  %v5461_v46 = vld [vmem:[%s8287_s17 + $0xe8] ss:$16 sps:$4 sm:$0xff]  }
 0x6b7   :  { %3899 = vmatpush1.bf16.msra.mxu0 %v5440_v43 }
 0x6b8   :  { %3900 = vmatprep.subr.bf16.mxu0 %v5448_v37 }
 0x6b9   :  { %3240 = vmatpush1.bf16.msra.mxu1 %v5383_v2  ;;  %v5466_v2 = vld [vmem:[%s8289_s19 + $0x4] ss:$16 sps:$4 sm:$0xff]  }
 0x6ba   :  { %3241 = vmatprep.subr.bf16.mxu1 %v5388_v54  ;;  %v5469_v54 = vld [vmem:[%s8289_s19 + $0xc] ss:$16 sps:$4 sm:$0xff]  }
 0x6bd   :  { %3242 = vmatpush1.bf16.msra.mxu1 %v5386_v10 }
 0x6be   :  { %3243 = vmatprep.subr.bf16.mxu1 %v5391_v42 }
 0x6c1   :  { %3244 = vmatpush1.bf16.msra.mxu1 %v5389_v6 }
 0x6c2   :  { %3596 = vmatprep.subr.bf16.mxu1 %v5394_v36 }
 0x6c4   :  { %3262 = vmatmul.mubr.bf16.vlgmr.msra.gmra.mrb[84].mxu1 %v7875_v20 }
 0x6c5   :  { %3597 = vmatpush1.bf16.msra.mxu1 %v5392_v12  ;;  %3628 = vmatprep.mubr.bf16.mxu1 %v8427_v30 }
 0x6c6   :  { %3598 = vmatprep.subr.bf16.mxu1 %v5397_v17 }
 0x6c9   :  { %3599 = vmatpush1.bf16.msra.mxu1 %v5395_v53 }
 0x6ca   :  { %3600 = vmatprep.subr.bf16.mxu1 %v5400_v15 }
 0x6cd   :  { %3601 = vmatpush1.bf16.msra.mxu1 %v5398_v51 }
 0x6ce   :  { %3602 = vmatprep.subr.bf16.mxu1 %v5403_v21 }
 0x6d1   :  { %3603 = vmatpush1.bf16.msra.mxu1 %v5401_v3 }
 0x6d2   :  { %3604 = vmatprep.subr.bf16.mxu1 %v5406_v1 }
 0x6d5   :  { %3605 = vmatpush1.bf16.msra.mxu1 %v5404_v56 }
 0x6d6   :  { %3606 = vmatprep.subr.bf16.mxu1 %v5409_v33 }
 0x6d9   :  { %3607 = vmatpush1.bf16.msra.mxu1 %v5407_v26 }
 0x6da   :  { %3608 = vmatprep.subr.bf16.mxu1 %v5412_v45 }
 0x6dd   :  { %3609 = vmatpush1.bf16.msra.mxu1 %v5410_v62 }
 0x6de   :  { %3610 = vmatprep.subr.bf16.mxu1 %v5415_v5 }
 0x6e1   :  { %3611 = vmatpush1.bf16.msra.mxu1 %v5413_v55 }
 0x6e2   :  { %3933 = vmatprep.subr.bf16.mxu1 %v5421_v9 }
 0x6e4   :  { %3629 = vmatmul.mubr.bf16.vlgmr.msra.gmra.mrb[88].mxu1 %v7875_v20  ;;  %v5446_v20 = vld [vmem:[%s8287_s17 + $0xa0] ss:$16 sps:$4 sm:$0xff]  }
 0x6e5   :  { %3638 = vmatprep.mubr.bf16.mxu1 %v8427_v30  ;;  %3934 = vmatpush1.bf16.msra.mxu1 %v5419_v63 }
 0x6e6   :  { %3935 = vmatprep.subr.bf16.mxu1 %v5427_v28  ;;  %3901 = vmatpush1.bf16.msra.mxu0 %v5446_v20 }
 0x6e7   :  { %3902 = vmatprep.subr.bf16.mxu0 %v5454_v60 }
 0x6e9   :  { %3936 = vmatpush1.bf16.msra.mxu1 %v5425_v7  ;;  %v8086_v7 = vrot.slane %v8081_v16, %v8433_v23 }
 0x6ea   :  { %3937 = vmatprep.subr.bf16.mxu1 %v5433_v8  ;;  %3903 = vmatpush1.bf16.msra.mxu0 %v5452_v25 }
 0x6eb   :  { %3904 = vmatprep.subr.bf16.mxu0 %v5460_v44 }
 0x6ed   :  { %3938 = vmatpush1.bf16.msra.mxu1 %v5431_v49 }
 0x6ee   :  { %3939 = vmatprep.subr.bf16.mxu1 %v5439_v61  ;;  %3905 = vmatpush1.bf16.msra.mxu0 %v5458_v13 }
 0x6ef   :  { %4247 = vmatprep.subr.bf16.mxu0 %v5466_v2 }
 0x6f1   :  { %3940 = vmatpush1.bf16.msra.mxu1 %v5437_v40 }
 0x6f2   :  { %3941 = vmatprep.subr.bf16.mxu1 %v5445_v18 }
 0x6f5   :  { %3942 = vmatpush1.bf16.msra.mxu1 %v5443_v32 }
 0x6f6   :  { %3943 = vmatprep.subr.bf16.mxu1 %v5451_v29 }
 0x6f9   :  { %3944 = vmatpush1.bf16.msra.mxu1 %v5449_v41 }
 0x6fa   :  { %3945 = vmatprep.subr.bf16.mxu1 %v5457_v39 }
 0x6fd   :  { %3946 = vmatpush1.bf16.msra.mxu1 %v5455_v38 }
 0x6fe   :  { %3947 = vmatprep.subr.bf16.mxu1 %v5463_v59 }
 0x701   :  { %3948 = vmatpush1.bf16.msra.mxu1 %v5461_v46 }
 0x702   :  { %4298 = vmatprep.subr.bf16.mxu1 %v5469_v54 }
 0x777   :  { %v3220_v10 = vpop.f32.mrb[76].mxu1  ;;  %v3577_v42 = vpop.f32.mrb[96].mxu0 }
 0x778   :  { %v3222_v6 = vpop.f32.mrb[77].mxu1  ;;  %v3579_v36 = vpop.f32.mrb[97].mxu0  ;;  %v5089_v51 = vadd.f32 %v3220_v10, %v7847_v48  ;;  %v3578_v24 = vadd.f32 %v3577_v42, %v8086_v7 }
 0x779   :  { %v3224_v12 = vpop.f32.mrb[78].mxu1  ;;  %v3581_v17 = vpop.f32.mrb[98].mxu0  ;;  %v5090_v21 = vadd.f32 %v3222_v6, %v7850_v58  ;;  %v3580_v18 = vadd.f32 %v3579_v36, %v8091_v31 }
 0x77a   :  { %v3226_v53 = vpop.f32.mrb[79].mxu1  ;;  %v3583_v15 = vpop.f32.mrb[99].mxu0  ;;  %v5091_v3 = vadd.f32 %v3224_v12, %v7847_v48  ;;  %v4910_v56 = vmul.f32 -1.442695, %v5089_v51  ;;  %v3582_v43 = vadd.f32 %v3581_v17, %v8086_v7  ;;  %v4948_v29 = vmul.f32 -1.442695, %v3578_v24 }
 0x77b   :  { %v5092_v1 = vadd.f32 %v3226_v53, %v7850_v58  ;;  %v4911_v33 = vmul.f32 -1.442695, %v5090_v21  ;;  %v3584_v32 = vadd.f32 %v3583_v15, %v8091_v31 }
 0x77c   :  { %v4913_v26 = vmul.f32 -1.442695, %v5091_v3  ;;  %5592 = vpow2.f32 %v4910_v56  ;;  %v4951_v60 = vmul.f32 -1.442695, %v3582_v43 }
 0x77d   :  { %v4914_v45 = vmul.f32 -1.442695, %v5092_v1  ;;  %5594 = vpow2.f32 %v4911_v33  ;;  %v8107_v33 = vrot.slane %v8081_v16, %v8436_v57 }
 0x77e   :  { %5596 = vpow2.f32 %v4913_v26 }
 0x77f   :  { %5598 = vpow2.f32 %v4914_v45 }
 0x786   :  { %v5593_v62 = vpop.eup %5592 }
 0x787   :  { %v5595_v5 = vpop.eup %5594  ;;  %v3298_v0 = vadd.f32 1.0, %v5593_v62 }
 0x788   :  { %v5597_v55 = vpop.eup %5596  ;;  %v3299_v63 = vadd.f32 1.0, %v5595_v5 }
 0x789   :  { %v5599_v27 = vpop.eup %5598  ;;  %v3301_v9 = vadd.f32 1.0, %v5597_v55  ;;  %5600 = vrcp.f32 %v3298_v0 }
 0x78a   :  { %v3302_v48 = vadd.f32 1.0, %v5599_v27  ;;  %5602 = vrcp.f32 %v3299_v63 }
 0x78b   :  { %5604 = vrcp.f32 %v3301_v9 }
 0x78c   :  { %5606 = vrcp.f32 %v3302_v48 }
 0x793   :  { %v5601_v37 = vpop.eup %5600 }
 0x794   :  { %v5603_v20 = vpop.eup %5602 }
 0x795   :  { %v5605_v41 = vpop.eup %5604  ;;  %v3316_v44 = vmul.f32 %v5603_v20, %v7866_v14 }
 0x796   :  { %v5607_v39 = vpop.eup %5606 }
 0x797   :  { %v3263_v58 = vpop.f32.mrb[84].mxu1  ;;  %v3317_v54 = vmul.f32 %v5607_v39, %v7869_v11  ;;  %v8103_v11 = vrot.slane %v8081_v16, %v8435_v34 }
 0x798   :  { %v5093_v28 = vadd.f32 %v3263_v58, %v7857_v50  ;;  %v3265_v35 = vpop.f32.mrb[85].mxu1 }
 0x799   :  { %v5094_v19 = vadd.f32 %v3265_v35, %v7860_v47  ;;  %v3267_v8 = vpop.f32.mrb[86].mxu1 }
 0x79a   :  { %v4912_v49 = vmul.f32 -1.442695, %v5093_v28  ;;  %v5095_v52 = vadd.f32 %v3267_v8, %v7857_v50  ;;  %v3269_v61 = vpop.f32.mrb[87].mxu1  ;;  %v4949_v50 = vmul.f32 -1.442695, %v3580_v18 }
 0x79b   :  { %5608 = vtanh.f32 %v5094_v19  ;;  %v5096_v22 = vadd.f32 %v3269_v61, %v7860_v47  ;;  %v4952_v47 = vmul.f32 -1.442695, %v3584_v32 }
 0x79c   :  { %5610 = vpow2.f32 %v4912_v49  ;;  %v4915_v40 = vmul.f32 -1.442695, %v5095_v52 }
 0x79d   :  { %5612 = vtanh.f32 %v5096_v22 }
 0x79e   :  { %5614 = vpow2.f32 %v4915_v40 }
 0x79f   :  { %5616 = vpow2.f32 %v4948_v29 }
 0x7a0   :  { %5618 = vpow2.f32 %v4949_v50 }
 0x7a1   :  { %5620 = vpow2.f32 %v4951_v60 }
 0x7a2   :  { %5622 = vpow2.f32 %v4952_v47 }
 0x7a5   :  { %v5609_v25 = vpop.eup %5608 }
 0x7a6   :  { %v5611_v38 = vpop.eup %5610  ;;  %v3320_v59 = vmul.f32 %v5609_v25, %v5601_v37 }
 0x7a7   :  { %v5613_v13 = vpop.eup %5612  ;;  %v3300_v46 = vadd.f32 1.0, %v5611_v38 }
 0x7a8   :  { %v5615_v2 = vpop.eup %5614  ;;  %v3322_v10 = vadd.f32 %v3320_v59, %v3316_v44  ;;  %v3321_v42 = vmul.f32 %v5613_v13, %v5605_v41  ;;  %v5464_v13 = vld [vmem:[%s8289_s19] ss:$16 sps:$4 sm:$0xff]  }
 0x7a9   :  { %5624 = vrcp.f32 %v3300_v46  ;;  %v3303_v6 = vadd.f32 1.0, %v5615_v2  ;;  %v5617_v12 = vpop.eup %5616  ;;  %v5467_v46 = vld [vmem:[%s8289_s19 + $0x8] ss:$16 sps:$4 sm:$0xff]  }
 0x7aa   :  { %5626 = vtanh.f32 %v3322_v10  ;;  %v3323_v36 = vadd.f32 %v3321_v42, %v3317_v54  ;;  %v5619_v17 = vpop.eup %5618  ;;  %v3699_v51 = vadd.f32 1.0, %v5617_v12  ;;  %v5472_v54 = vld [vmem:[%s8289_s19 + $0x24] ss:$16 sps:$4 sm:$0xff]   ;;  %v5475_v10 = vld [vmem:[%s8289_s19 + $0x2c] ss:$16 sps:$4 sm:$0xff]  }
 0x7ab   :  { %5628 = vrcp.f32 %v3303_v6  ;;  %v5621_v14 = vpop.eup %5620  ;;  %v3700_v3 = vadd.f32 1.0, %v5619_v17  ;;  %v5470_v42 = vld [vmem:[%s8289_s19 + $0x20] ss:$16 sps:$4 sm:$0xff]   ;;  %v5473_v6 = vld [vmem:[%s8289_s19 + $0x28] ss:$16 sps:$4 sm:$0xff]  }
 0x7ac   :  { %5630 = vtanh.f32 %v3323_v36  ;;  %v5623_v53 = vpop.eup %5622  ;;  %v3702_v56 = vadd.f32 1.0, %v5621_v14  ;;  %v5478_v36 = vld [vmem:[%s8289_s19 + $0x44] ss:$16 sps:$4 sm:$0xff]   ;;  %v5481_v12 = vld [vmem:[%s8289_s19 + $0x4c] ss:$16 sps:$4 sm:$0xff]  }
 0x7ad   :  { %v3703_v62 = vadd.f32 1.0, %v5623_v53  ;;  %5632 = vrcp.f32 %v3699_v51  ;;  %v5476_v17 = vld [vmem:[%s8289_s19 + $0x40] ss:$16 sps:$4 sm:$0xff]   ;;  %v5479_v14 = vld [vmem:[%s8289_s19 + $0x48] ss:$16 sps:$4 sm:$0xff]  }
 0x7ae   :  { %5634 = vrcp.f32 %v3700_v3  ;;  %v5484_v53 = vld [vmem:[%s8289_s19 + $0x64] ss:$16 sps:$4 sm:$0xff]   ;;  %v5482_v51 = vld [vmem:[%s8289_s19 + $0x60] ss:$16 sps:$4 sm:$0xff]  }
 0x7af   :  { %5636 = vrcp.f32 %v3702_v56  ;;  %v5490_v3 = vld [vmem:[%s8289_s19 + $0x84] ss:$16 sps:$4 sm:$0xff]   ;;  %v5488_v56 = vld [vmem:[%s8289_s19 + $0x80] ss:$16 sps:$4 sm:$0xff]  }
 0x7b0   :  { %5638 = vrcp.f32 %v3703_v62  ;;  %v5499_v62 = vld [vmem:[%s8289_s19 + $0xac] ss:$16 sps:$4 sm:$0xff]  }
 0x7b3   :  { %v5625_v15 = vpop.eup %5624 }
 0x7b4   :  { %v5627_v21 = vpop.eup %5626 }
 0x7b5   :  { %v5629_v1 = vpop.eup %5628  ;;  %v3326_v26 = vmul.f32 %v5627_v21, %v5625_v15  ;;  %v5487_v15 = vld [vmem:[%s8289_s19 + $0x6c] ss:$16 sps:$4 sm:$0xff]   ;;  %v5485_v21 = vld [vmem:[%s8289_s19 + $0x68] ss:$16 sps:$4 sm:$0xff]  }
 0x7b6   :  { %v5631_v45 = vpop.eup %5630 }
 0x7b7   :  { %v3630_v5 = vpop.f32.mrb[88].mxu1  ;;  %v3327_v55 = vmul.f32 %v5631_v45, %v5629_v1  ;;  %v5633_v8 = vpop.eup %5632  ;;  %v5493_v1 = vld [vmem:[%s8289_s19 + $0x8c] ss:$16 sps:$4 sm:$0xff]   ;;  %v5496_v45 = vld [vmem:[%s8289_s19 + $0xa4] ss:$16 sps:$4 sm:$0xff]  }
 0x7b8   :  { %v3631_v27 = vadd.f32 %v3630_v5, %v8103_v11  ;;  %v3632_v0 = vpop.f32.mrb[89].mxu1  ;;  %v5635_v49 = vpop.eup %5634  ;;  %v5494_v5 = vld [vmem:[%s8289_s19 + $0xa0] ss:$16 sps:$4 sm:$0xff]  }
 0x7b9   :  { %v3633_v63 = vadd.f32 %v3632_v0, %v8107_v33  ;;  %v3634_v9 = vpop.f32.mrb[90].mxu1  ;;  %v3328_v48 = vpack.c.bf16 %v3327_v55, %v3326_v26  ;;  %v5637_v52 = vpop.eup %5636  ;;  %v3717_v24 = vmul.f32 0.0, %v5635_v49  ;;  %v5491_v26 = vld [vmem:[%s8289_s19 + $0x88] ss:$16 sps:$4 sm:$0xff]   ;;  %v5505_v0 = vld [vmem:[%s8289_s19 + $0xcc] ss:$16 sps:$4 sm:$0xff]  }
 0x7ba   :  { %v4950_v58 = vmul.f32 -1.442695, %v3631_v27  ;;  %v3635_v16 = vadd.f32 %v3634_v9, %v8103_v11  ;;  %v3636_v28 = vpop.f32.mrb[91].mxu1  ;;  %v5639_v61 = vpop.eup %5638  ;;  %v5497_v55 = vld [vmem:[%s8289_s19 + $0xa8] ss:$16 sps:$4 sm:$0xff]  }
 0x7bb   :  { %5640 = vtanh.f32 %v3633_v63  ;;  %v3637_v35 = vadd.f32 %v3636_v28, %v8107_v33  ;;  %3586 = vmatmul.mubr.bf16.gmra.mrb[100].mxu0 %v3328_v48  ;;  %3639 = vmatmul.mubr.bf16.gmra.mrb[92].mxu1 %v3328_v48  ;;  %v3718_v29 = vmul.f32 0.0, %v5639_v61  ;;  %v5502_v27 = vld [vmem:[%s8289_s19 + $0xc4] ss:$16 sps:$4 sm:$0xff]   ;;  %v5500_v63 = vld [vmem:[%s8289_s19 + $0xc0] ss:$16 sps:$4 sm:$0xff]  }
 0x7bc   :  { %5642 = vpow2.f32 %v4950_v58  ;;  %v4953_v19 = vmul.f32 -1.442695, %v3635_v16  ;;  %3922 = vmatprep.mubr.bf16.mxu0 %v8427_v30  ;;  %3965 = vmatprep.mubr.bf16.mxu1 %v8427_v30  ;;  %v5503_v9 = vld [vmem:[%s8289_s19 + $0xc8] ss:$16 sps:$4 sm:$0xff]   ;;  %v5508_v48 = vld [vmem:[%s8289_s19 + $0xe4] ss:$16 sps:$4 sm:$0xff]  }
 0x7bd   :  { %5644 = vtanh.f32 %v3637_v35  ;;  %v5511_v58 = vld [vmem:[%s8289_s19 + $0xec] ss:$16 sps:$4 sm:$0xff]   ;;  %v5506_v16 = vld [vmem:[%s8289_s19 + $0xe0] ss:$16 sps:$4 sm:$0xff]   ;;  %v5509_v28 = vld [vmem:[%s8289_s19 + $0xe8] ss:$16 sps:$4 sm:$0xff]  }
 0x7be   :  { %5646 = vpow2.f32 %v4953_v19  ;;  %v5512_v35 = vld [vmem:[#allocation23] ss:$16 sps:$4 sm:$0xff]   ;;  %v5514_v19 = vld [vmem:[#allocation23 + $0x4] ss:$16 sps:$4 sm:$0xff]   ;;  %v5517_v49 = vld [vmem:[#allocation23 + $0xc] ss:$16 sps:$4 sm:$0xff]  }
 0x7bf   :  { %v5523_v61 = vld [vmem:[#allocation23 + $0x2c] ss:$16 sps:$4 sm:$0xff]   ;;  %s6104_s19 = smov [#allocation26]  }
 0x7c0   :  { %s4714_s2 = sshll.u32 %s6104_s19, 4  ;;  %s4715_s2 = int_to_ptr.vmem [resolvable:$true] %s4714_s2 }
 0x7c1   :  { %s6044_s30 = scalar_lea.vmem %s4715_s2, 32  ;;  %p6049_p1 = scmp.lt.s32.totalorder %s4715_s2, %s4715_s2 }
 0x7c2   :  { %p6045_p0 = scmp.ne.s32.totalorder %s4715_s2, %s6044_s30  ;;  %p6050_p2 = scmp.lt.s32.totalorder %s6044_s30, %s6044_s30 }
 0x7c4   :  { %p6051_p3 = por %p6050_p2, %p6049_p1 }
 0x7c5   :  { %v5641_v22 = vpop.eup %5640 }
 0x7c6   :  { %v5643_v40 = vpop.eup %5642  ;;  %v3721_v18 = vmul.f32 %v5641_v22, %v5633_v8  ;;  %v5515_v8 = vld [vmem:[#allocation23 + $0x8] ss:$16 sps:$4 sm:$0xff]   ;;  %v5518_v22 = vld [vmem:[#allocation23 + $0x20] ss:$16 sps:$4 sm:$0xff]   ;;  %p6052_p4 = pnand %p6051_p3, %p6045_p0 }
 0x7c7   :  { %v5645_v43 = vpop.eup %5644  ;;  %v3701_v32 = vadd.f32 1.0, %v5643_v40  ;;  %v5521_v40 = vld [vmem:[#allocation23 + $0x28] ss:$16 sps:$4 sm:$0xff]  }
 0x7c8   :  { %v5647_v37 = vpop.eup %5646  ;;  %v8115_v20 = vadd.f32 %v3721_v18, %v3717_v24  ;;  %v3722_v50 = vmul.f32 %v5645_v43, %v5637_v52  ;;  %v5520_v52 = vld [vmem:[#allocation23 + $0x24] ss:$16 sps:$4 sm:$0xff]   ;;  %v5529_v18 = vld [vmem:[#allocation23 + $0x4c] ss:$16 sps:$4 sm:$0xff]   ;;  %v5524_v43 = vld [vmem:[#allocation23 + $0x40] ss:$16 sps:$4 sm:$0xff]  }
 0x7c9   :  { %5648 = vrcp.f32 %v3701_v32  ;;  %v3704_v41 = vadd.f32 1.0, %v5647_v37  ;;  %v5526_v24 = vld [vmem:[#allocation23 + $0x44] ss:$16 sps:$4 sm:$0xff]   ;;  %v5527_v32 = vld [vmem:[#allocation23 + $0x48] ss:$16 sps:$4 sm:$0xff]  }
 0x7ca   :  { %5650 = vtanh.f32 %v8115_v20  ;;  %v8118_v60 = vadd.f32 %v3722_v50, %v3718_v29  ;;  %v5532_v37 = vld [vmem:[#allocation23 + $0x64] ss:$16 sps:$4 sm:$0xff]   ;;  %v5535_v29 = vld [vmem:[#allocation23 + $0x6c] ss:$16 sps:$4 sm:$0xff]   ;;  %v5530_v50 = vld [vmem:[#allocation23 + $0x60] ss:$16 sps:$4 sm:$0xff]  }
 0x7cb   :  { %5652 = vrcp.f32 %v3704_v41  ;;  %v5533_v41 = vld [vmem:[#allocation23 + $0x68] ss:$16 sps:$4 sm:$0xff]  }
 0x7cc   :  { %5654 = vtanh.f32 %v8118_v60 }
 0x7d3   :  { %v5649_v39 = vpop.eup %5648 }
 0x7d4   :  { %v5651_v47 = vpop.eup %5650 }
 0x7d5   :  { %v5653_v25 = vpop.eup %5652  ;;  %v3727_v44 = vmul.f32 %v5651_v47, %v5649_v39  ;;  %v5538_v39 = vld [vmem:[#allocation23 + $0x84] ss:$16 sps:$4 sm:$0xff]   ;;  %v5541_v47 = vld [vmem:[#allocation23 + $0x8c] ss:$16 sps:$4 sm:$0xff]  }
 0x7d6   :  { %v5655_v38 = vpop.eup %5654 }
 0x7d7   :  { %v3728_v59 = vmul.f32 %v5655_v38, %v5653_v25  ;;  %v5536_v25 = vld [vmem:[#allocation23 + $0x80] ss:$16 sps:$4 sm:$0xff]   ;;  %v5539_v38 = vld [vmem:[#allocation23 + $0x88] ss:$16 sps:$4 sm:$0xff]  }
 0x7d9   :  { %v8127_v2 = vpack.c.bf16 %v3728_v59, %v3727_v44  ;;  %v5544_v44 = vld [vmem:[#allocation23 + $0xa4] ss:$16 sps:$4 sm:$0xff]   ;;  %v5547_v59 = vld [vmem:[#allocation23 + $0xac] ss:$16 sps:$4 sm:$0xff]  }
 0x7db   :  { %3923 = vmatmul.mubr.bf16.vlgmr.msra.gmra.mrb[100].mxu0 %v8127_v2  ;;  %3966 = vmatmul.mubr.bf16.vlgmr.msra.gmra.mrb[92].mxu1 %v8127_v2 }
 0x7dc   :  { %4248 = vmatpush1.bf16.msra.mxu0 %v5464_v13  ;;  %4299 = vmatpush1.bf16.msra.mxu1 %v5467_v46  ;;  %v5542_v13 = vld [vmem:[#allocation23 + $0xa0] ss:$16 sps:$4 sm:$0xff]   ;;  %v5545_v46 = vld [vmem:[#allocation23 + $0xa8] ss:$16 sps:$4 sm:$0xff]  }
 0x7dd   :  { %4249 = vmatprep.subr.bf16.mxu0 %v5472_v54  ;;  %4300 = vmatprep.subr.bf16.mxu1 %v5475_v10  ;;  %v5553_v54 = vld [vmem:[#allocation23 + $0xcc] ss:$16 sps:$4 sm:$0xff]   ;;  %v5548_v10 = vld [vmem:[#allocation23 + $0xc0] ss:$16 sps:$4 sm:$0xff]  }
 0x7de   :  { %4279 = vmatprep.mubr.bf16.mxu0 %v8427_v30  ;;  %4330 = vmatprep.mubr.bf16.mxu1 %v8427_v30 }
 0x7e0   :  { %4250 = vmatpush1.bf16.msra.mxu0 %v5470_v42  ;;  %4301 = vmatpush1.bf16.msra.mxu1 %v5473_v6  ;;  %v5551_v42 = vld [vmem:[#allocation23 + $0xc8] ss:$16 sps:$4 sm:$0xff]   ;;  %v5556_v6 = vld [vmem:[#allocation23 + $0xe4] ss:$16 sps:$4 sm:$0xff]  }
 0x7e1   :  { %4251 = vmatprep.subr.bf16.mxu0 %v5478_v36  ;;  %4302 = vmatprep.subr.bf16.mxu1 %v5481_v12  ;;  %v5559_v36 = vld [vmem:[#allocation23 + $0xec] ss:$16 sps:$4 sm:$0xff]   ;;  %v5554_v12 = vld [vmem:[#allocation23 + $0xe0] ss:$16 sps:$4 sm:$0xff]  }
 0x7e4   :  { %4252 = vmatpush1.bf16.msra.mxu0 %v5476_v17  ;;  %4303 = vmatpush1.bf16.msra.mxu1 %v5479_v14  ;;  %v5557_v17 = vld [vmem:[#allocation23 + $0xe8] ss:$16 sps:$4 sm:$0xff]  }
 0x7e5   :  { %4253 = vmatprep.subr.bf16.mxu0 %v5484_v53  ;;  %4304 = vmatprep.subr.bf16.mxu1 %v5487_v15 }
 0x7e8   :  { %4254 = vmatpush1.bf16.msra.mxu0 %v5482_v51  ;;  %4305 = vmatpush1.bf16.msra.mxu1 %v5485_v21 }
 0x7e9   :  { %4255 = vmatprep.subr.bf16.mxu0 %v5490_v3  ;;  %4306 = vmatprep.subr.bf16.mxu1 %v5493_v1 }
 0x7ec   :  { %4256 = vmatpush1.bf16.msra.mxu0 %v5488_v56  ;;  %4307 = vmatpush1.bf16.msra.mxu1 %v5491_v26 }
 0x7ed   :  { %4257 = vmatprep.subr.bf16.mxu0 %v5496_v45  ;;  %4308 = vmatprep.subr.bf16.mxu1 %v5499_v62 }
 0x7f0   :  { %4258 = vmatpush1.bf16.msra.mxu0 %v5494_v5  ;;  %4309 = vmatpush1.bf16.msra.mxu1 %v5497_v55 }
 0x7f1   :  { %4259 = vmatprep.subr.bf16.mxu0 %v5502_v27  ;;  %4310 = vmatprep.subr.bf16.mxu1 %v5505_v0 }
 0x7f4   :  { %4260 = vmatpush1.bf16.msra.mxu0 %v5500_v63  ;;  %4311 = vmatpush1.bf16.msra.mxu1 %v5503_v9 }
 0x7f5   :  { %4261 = vmatprep.subr.bf16.mxu0 %v5508_v48  ;;  %4312 = vmatprep.subr.bf16.mxu1 %v5511_v58 }
 0x7f8   :  { %4262 = vmatpush1.bf16.msra.mxu0 %v5506_v16  ;;  %4313 = vmatpush1.bf16.msra.mxu1 %v5509_v28 }
 0x7f9   :  { %4590 = vmatprep.subr.bf16.mxu0 %v5514_v19  ;;  %4631 = vmatprep.subr.bf16.mxu1 %v5517_v49 }
 0x7fb   :  { %4280 = vmatmul.mubr.bf16.vlgmr.msra.gmra.mrb[104].mxu0 %v8127_v2  ;;  %4331 = vmatmul.mubr.bf16.vlgmr.msra.gmra.mrb[96].mxu1 %v8127_v2  ;;  %v5550_v2 = vld [vmem:[#allocation23 + $0xc4] ss:$16 sps:$4 sm:$0xff]  }
 0x7fc   :  { %4289 = vmatprep.mubr.bf16.mxu0 %v8427_v30  ;;  %4340 = vmatprep.mubr.bf16.mxu1 %v8427_v30 }
 0x7fd   :  { %4591 = vmatpush1.bf16.msra.mxu0 %v5512_v35  ;;  %4632 = vmatpush1.bf16.msra.mxu1 %v5515_v8 }
 0x7fe   :  { %4592 = vmatprep.subr.bf16.mxu0 %v5520_v52  ;;  %4633 = vmatprep.subr.bf16.mxu1 %v5523_v61 }
 0x801   :  { %4593 = vmatpush1.bf16.msra.mxu0 %v5518_v22  ;;  %4634 = vmatpush1.bf16.msra.mxu1 %v5521_v40 }
 0x802   :  { %4594 = vmatprep.subr.bf16.mxu0 %v5526_v24  ;;  %4635 = vmatprep.subr.bf16.mxu1 %v5529_v18  ;;  %v4065_v24 = vld [vmem:[#allocation24] sm:$0xf] }
 0x805   :  { %4595 = vmatpush1.bf16.msra.mxu0 %v5524_v43  ;;  %4636 = vmatpush1.bf16.msra.mxu1 %v5527_v32 }
 0x806   :  { %4596 = vmatprep.subr.bf16.mxu0 %v5532_v37  ;;  %4637 = vmatprep.subr.bf16.mxu1 %v5535_v29  ;;  %v8230_v37 = vrot.slane %v4065_v24, %v8433_v23 }
 0x809   :  { %4597 = vmatpush1.bf16.msra.mxu0 %v5530_v50  ;;  %4638 = vmatpush1.bf16.msra.mxu1 %v5533_v41  ;;  %v8233_v41 = vrot.slane %v4065_v24, %v8434_v4 }
 0x80a   :  { %4598 = vmatprep.subr.bf16.mxu0 %v5538_v39  ;;  %4639 = vmatprep.subr.bf16.mxu1 %v5541_v47 }
 0x80d   :  { %4599 = vmatpush1.bf16.msra.mxu0 %v5536_v25  ;;  %4640 = vmatpush1.bf16.msra.mxu1 %v5539_v38 }
 0x80e   :  { %4600 = vmatprep.subr.bf16.mxu0 %v5544_v44  ;;  %4641 = vmatprep.subr.bf16.mxu1 %v5547_v59 }
 0x811   :  { %4601 = vmatpush1.bf16.msra.mxu0 %v5542_v13  ;;  %4642 = vmatpush1.bf16.msra.mxu1 %v5545_v46 }
 0x812   :  { %4602 = vmatprep.subr.bf16.mxu0 %v5550_v2  ;;  %4643 = vmatprep.subr.bf16.mxu1 %v5553_v54 }
 0x815   :  { %4603 = vmatpush1.bf16.msra.mxu0 %v5548_v10  ;;  %4644 = vmatpush1.bf16.msra.mxu1 %v5551_v42 }
 0x816   :  { %4604 = vmatprep.subr.bf16.mxu0 %v5556_v6  ;;  %4645 = vmatprep.subr.bf16.mxu1 %v5559_v36 }
 0x819   :  { %4605 = vmatpush1.bf16.msra.mxu0 %v5554_v12  ;;  %4646 = vmatpush1.bf16.msra.mxu1 %v5557_v17 }
 0x8ae   :  { %v3924_v14 = vpop.f32.mrb[100].mxu0  ;;  %v3967_v53 = vpop.f32.mrb[92].mxu1 }
 0x8af   :  { %v5097_v15 = vadd.f32 %v3924_v14, %v8086_v7  ;;  %v3926_v51 = vpop.f32.mrb[101].mxu0  ;;  %v3969_v21 = vpop.f32.mrb[93].mxu1  ;;  %v5101_v9 = vadd.f32 %v3967_v53, %v8103_v11 }
 0x8b0   :  { %v5098_v3 = vadd.f32 %v3926_v51, %v8091_v31  ;;  %v3928_v1 = vpop.f32.mrb[102].mxu0  ;;  %v3971_v56 = vpop.f32.mrb[94].mxu1  ;;  %v5102_v58 = vadd.f32 %v3969_v21, %v8107_v33 }
 0x8b1   :  { %v4986_v26 = vmul.f32 -1.442695, %v5097_v15  ;;  %v5099_v45 = vadd.f32 %v3928_v1, %v8086_v7  ;;  %v3930_v62 = vpop.f32.mrb[103].mxu0  ;;  %v3973_v5 = vpop.f32.mrb[95].mxu1  ;;  %v5103_v48 = vadd.f32 %v3971_v56, %v8103_v11  ;;  %v4988_v16 = vmul.f32 -1.442695, %v5101_v9 }
 0x8b2   :  { %v4987_v55 = vmul.f32 -1.442695, %v5098_v3  ;;  %v5100_v27 = vadd.f32 %v3930_v62, %v8091_v31  ;;  %v5104_v35 = vadd.f32 %v3973_v5, %v8107_v33  ;;  %v8241_v15 = vrot.slane %v4065_v24, %v8435_v34 }
 0x8b3   :  { %5656 = vpow2.f32 %v4986_v26  ;;  %v4989_v0 = vmul.f32 -1.442695, %v5099_v45  ;;  %v4991_v28 = vmul.f32 -1.442695, %v5103_v48  ;;  %v8245_v3 = vrot.slane %v4065_v24, %v8436_v57 }
 0x8b4   :  { %v4990_v63 = vmul.f32 -1.442695, %v5100_v27  ;;  %5658 = vpow2.f32 %v4987_v55 }
 0x8b5   :  { %5660 = vpow2.f32 %v4989_v0 }
 0x8b6   :  { %5662 = vpow2.f32 %v4990_v63 }
 0x8b7   :  { %5664 = vtanh.f32 %v5102_v58 }
 0x8b8   :  { %5666 = vpow2.f32 %v4988_v16 }
 0x8b9   :  { %5668 = vpow2.f32 %v4991_v28 }
 0x8bd   :  { %v5657_v7 = vpop.eup %5656 }
 0x8be   :  { %v4002_v19 = vadd.f32 1.0, %v5657_v7  ;;  %v5659_v31 = vpop.eup %5658 }
 0x8bf   :  { %v5661_v8 = vpop.eup %5660  ;;  %v4003_v49 = vadd.f32 1.0, %v5659_v31 }
 0x8c0   :  { %5670 = vrcp.f32 %v4002_v19  ;;  %v4005_v52 = vadd.f32 1.0, %v5661_v8  ;;  %v5663_v61 = vpop.eup %5662 }
 0x8c1   :  { %5672 = vtanh.f32 %v5104_v35  ;;  %v4006_v11 = vadd.f32 1.0, %v5663_v61  ;;  %v5665_v22 = vpop.eup %5664 }
 0x8c2   :  { %5674 = vrcp.f32 %v4003_v49  ;;  %v5667_v40 = vpop.eup %5666 }
 0x8c3   :  { %5676 = vrcp.f32 %v4005_v52  ;;  %v5669_v18 = vpop.eup %5668  ;;  %v4004_v50 = vadd.f32 1.0, %v5667_v40 }
 0x8c4   :  { %5678 = vrcp.f32 %v4006_v11  ;;  %v4007_v25 = vadd.f32 1.0, %v5669_v18 }
 0x8c5   :  { %5680 = vrcp.f32 %v4004_v50 }
 0x8ca   :  { %v5671_v43 = vpop.eup %5670 }
 0x8cb   :  { %v5673_v33 = vpop.eup %5672  ;;  %v4024_v32 = vmul.f32 %v5671_v43, %v5665_v22 }
 0x8cc   :  { %v5675_v29 = vpop.eup %5674 }
 0x8cd   :  { %v5677_v39 = vpop.eup %5676  ;;  %v4020_v47 = vmul.f32 %v5675_v29, %v8115_v20 }
 0x8ce   :  { %v4025_v38 = vmul.f32 %v5677_v39, %v5673_v33  ;;  %v4281_v44 = vpop.f32.mrb[104].mxu0  ;;  %v4332_v59 = vpop.f32.mrb[96].mxu1 }
 0x8cf   :  { %v5679_v13 = vpop.eup %5678  ;;  %v4026_v46 = vadd.f32 %v4024_v32, %v4020_v47  ;;  %v4282_v2 = vadd.f32 %v4281_v44, %v8230_v37  ;;  %v4283_v54 = vpop.f32.mrb[105].mxu0  ;;  %v4333_v1 = vadd.f32 %v4332_v59, %v8241_v15 }
 0x8d0   :  { %v4334_v10 = vpop.f32.mrb[97].mxu1  ;;  %v4021_v23 = vmul.f32 %v5679_v13, %v8118_v60  ;;  %v4284_v42 = vadd.f32 %v4283_v54, %v8233_v41  ;;  %v4285_v4 = vpop.f32.mrb[106].mxu0 }
 0x8d1   :  { %v4336_v6 = vpop.f32.mrb[98].mxu1  ;;  %5682 = vtanh.f32 %v4026_v46  ;;  %v5024_v36 = vmul.f32 -1.442695, %v4282_v2  ;;  %v4286_v20 = vadd.f32 %v4285_v4, %v8230_v37  ;;  %v4287_v12 = vpop.f32.mrb[107].mxu0  ;;  %v4335_v45 = vadd.f32 %v4334_v10, %v8245_v3 }
 0x8d2   :  { %v4338_v17 = vpop.f32.mrb[99].mxu1  ;;  %5684 = vrcp.f32 %v4007_v25  ;;  %v4027_v14 = vadd.f32 %v4025_v38, %v4021_v23  ;;  %v5025_v53 = vmul.f32 -1.442695, %v4284_v42  ;;  %v4288_v60 = vadd.f32 %v4287_v12, %v8233_v41  ;;  %v5681_v26 = vpop.eup %5680 }
 0x8d3   :  { %5686 = vpow2.f32 %v5024_v36  ;;  %v5027_v51 = vmul.f32 -1.442695, %v4286_v20  ;;  %v4337_v56 = vadd.f32 %v4336_v6, %v8241_v15  ;;  %v5026_v62 = vmul.f32 -1.442695, %v4333_v1 }
 0x8d4   :  { %5688 = vtanh.f32 %v4027_v14  ;;  %v5028_v21 = vmul.f32 -1.442695, %v4288_v60  ;;  %v4339_v57 = vadd.f32 %v4338_v17, %v8245_v3 }
 0x8d5   :  { %5690 = vpow2.f32 %v5025_v53  ;;  %v5029_v0 = vmul.f32 -1.442695, %v4337_v56 }
 0x8d6   :  { %5692 = vpow2.f32 %v5027_v51 }
 0x8d7   :  { %5694 = vpow2.f32 %v5028_v21 }
 0x8d8   :  { %5696 = vtanh.f32 %v4335_v45 }
 0x8d9   :  { %5698 = vpow2.f32 %v5026_v62 }
 0x8db   :  { %v5683_v34 = vpop.eup %5682 }
 0x8dc   :  { %v5685_v5 = vpop.eup %5684  ;;  %v4030_v55 = vmul.f32 %v5683_v34, %v5681_v26 }
 0x8dd   :  { %v5687_v27 = vpop.eup %5686 }
 0x8de   :  { %v5689_v63 = vpop.eup %5688  ;;  %v4399_v9 = vadd.f32 1.0, %v5687_v27 }
 0x8df   :  { %v4031_v48 = vmul.f32 %v5689_v63, %v5685_v5  ;;  %v5691_v58 = vpop.eup %5690 }
 0x8e0   :  { %5700 = vrcp.f32 %v4399_v9  ;;  %v5693_v16 = vpop.eup %5692  ;;  %v4400_v28 = vadd.f32 1.0, %v5691_v58 }
 0x8e1   :  { %5702 = vpow2.f32 %v5029_v0  ;;  %v4032_v7 = vpack.c.bf16 %v4031_v48, %v4030_v55  ;;  %v4402_v35 = vadd.f32 1.0, %v5693_v16  ;;  %v5695_v19 = vpop.eup %5694 }
 0x8e2   :  { %5704 = vtanh.f32 %v4339_v57  ;;  %v4403_v31 = vadd.f32 1.0, %v5695_v19  ;;  %v5697_v8 = vpop.eup %5696 }
 0x8e3   :  { %5706 = vrcp.f32 %v4400_v28  ;;  %4290 = vmatmul.mubr.bf16.gmra.mrb[108].mxu0 %v4032_v7  ;;  %4341 = vmatmul.mubr.bf16.gmra.mrb[100].mxu1 %v4032_v7  ;;  %v5699_v49 = vpop.eup %5698 }
 0x8e4   :  { %5708 = vrcp.f32 %v4402_v35  ;;  %4622 = vmatprep.mubr.bf16.mxu0 %v8427_v30  ;;  %4663 = vmatprep.mubr.bf16.mxu1 %v8427_v30  ;;  %v4401_v24 = vadd.f32 1.0, %v5699_v49 }
 0x8e5   :  { %5710 = vrcp.f32 %v4403_v31 }
 0x8e6   :  { %5712 = vrcp.f32 %v4401_v24 }
 0x8ea   :  { %v5701_v52 = vpop.eup %5700 }
 0x8eb   :  { %v5703_v61 = vpop.eup %5702  ;;  %v4421_v11 = vmul.f32 %v5701_v52, %v5697_v8 }
 0x8ec   :  { %v5705_v22 = vpop.eup %5704  ;;  %v4404_v50 = vadd.f32 1.0, %v5703_v61 }
 0x8ed   :  { %v5707_v40 = vpop.eup %5706 }
 0x8ee   :  { %v5709_v18 = vpop.eup %5708  ;;  %v4417_v43 = vmul.f32 0.0, %v5707_v40 }
 0x8ef   :  { %v4422_v33 = vmul.f32 %v5709_v18, %v5705_v22  ;;  %v5711_v32 = vpop.eup %5710 }
 0x8f0   :  { %v4423_v29 = vadd.f32 %v4421_v11, %v4417_v43  ;;  %v4418_v39 = vmul.f32 0.0, %v5711_v32  ;;  %v5713_v30 = vpop.eup %5712 }
 0x8f2   :  { %5714 = vtanh.f32 %v4423_v29  ;;  %v4424_v47 = vadd.f32 %v4422_v33, %v4418_v39 }
 0x8f3   :  { %5716 = vrcp.f32 %v4404_v50 }
 0x8f4   :  { %5718 = vtanh.f32 %v4424_v47 }
 0x8fc   :  { %v5715_v25 = vpop.eup %5714 }
 0x8fd   :  { %v4427_v38 = vmul.f32 %v5715_v25, %v5713_v30  ;;  %v5717_v44 = vpop.eup %5716 }
 0x8fe   :  { %v5719_v59 = vpop.eup %5718 }
 0x8ff   :  { %v4428_v13 = vmul.f32 %v5719_v59, %v5717_v44 }
 0x901   :  { %v4429_v46 = vpack.c.bf16 %v4428_v13, %v4427_v38  ;;  %v4701_v63 = vrot.slane %v4428_v13, 7 }
 0x903   :  { %4623 = vmatmul.mubr.bf16.vlgmr.msra.gmra.mrb[108].mxu0 %v4429_v46  ;;  %4664 = vmatmul.mubr.bf16.vlgmr.msra.gmra.mrb[100].mxu1 %v4429_v46 }
 0x9d6   :  { %v4624_v2 = vpop.f32.mrb[108].mxu0  ;;  %v4665_v54 = vpop.f32.mrb[100].mxu1 }
 0x9d7   :  { %v4625_v10 = vpop.f32.mrb[109].mxu0  ;;  %v4666_v23 = vpop.f32.mrb[101].mxu1 }
 0x9d8   :  { %v4626_v42 = vpop.f32.mrb[110].mxu0  ;;  %v4667_v4 = vpop.f32.mrb[102].mxu1 }
 0x9d9   :  { %v5105_v6 = vadd.f32 %v4626_v42, %v8230_v37  ;;  %v4628_v36 = vpop.f32.mrb[111].mxu0  ;;  %v4669_v20 = vpop.f32.mrb[103].mxu1  ;;  %v5107_v53 = vadd.f32 %v4667_v4, %v8241_v15 }
 0x9da   :  { %v5106_v12 = vadd.f32 %v4628_v36, %v8233_v41  ;;  %v5108_v51 = vadd.f32 %v4669_v20, %v8245_v3 }
 0x9db   :  { %v5062_v17 = vmul.f32 -1.442695, %v5105_v6  ;;  %v5064_v60 = vmul.f32 -1.442695, %v5107_v53 }
 0x9dc   :  { %v5063_v14 = vmul.f32 -1.442695, %v5106_v12 }
 0x9dd   :  { %5720 = vpow2.f32 %v5062_v17 }
 0x9de   :  { %5722 = vpow2.f32 %v5063_v14 }
 0x9df   :  { %5724 = vtanh.f32 %v5108_v51 }
 0x9e0   :  { %5726 = vpow2.f32 %v5064_v60 }
 0x9e7   :  { %v5721_v21 = vpop.eup %5720 }
 0x9e8   :  { %v4685_v1 = vadd.f32 1.0, %v5721_v21  ;;  %v5723_v56 = vpop.eup %5722 }
 0x9e9   :  { %v4686_v37 = vadd.f32 1.0, %v5723_v56  ;;  %v5725_v26 = vpop.eup %5724 }
 0x9ea   :  { %5728 = vrcp.f32 %v4685_v1  ;;  %v5727_v45 = vpop.eup %5726 }
 0x9eb   :  { %5730 = vrcp.f32 %v4686_v37  ;;  %v4687_v5 = vadd.f32 1.0, %v5727_v45 }
 0x9ed   :  { %5732 = vrcp.f32 %v4687_v5 }
 0x9f4   :  { %v5729_v41 = vpop.eup %5728 }
 0x9f5   :  { %v4696_v34 = vmul.f32 %v5729_v41, %v5725_v26  ;;  %v5731_v62 = vpop.eup %5730 }
 0x9f6   :  { %v4694_v55 = vmul.f32 %v5731_v62, %v4424_v47 }
 0x9f7   :  { %v5733_v15 = vpop.eup %5732 }
 0x9f8   :  { %v4697_v27 = vadd.f32 %v4696_v34, %v4694_v55 }
 0x9fa   :  { %5734 = vtanh.f32 %v4697_v27 }
 0xa04   :  { %v5735_v3 = vpop.eup %5734 }
 0xa05   :  { %v4699_v0 = vmul.f32 %v5735_v3, %v5733_v15 }
 0xa07   :  { %v4704_v9 = vrot.slane %v4699_v0, 6 }
 0xa09   :  { %v4706_v57 = vsel %vm1978_vm2, %v4701_v63, %v4704_v9 }
 0xa0a   :  { %4707 = vst [vmem:[#allocation26] sm:$0x3] %v4706_v57 }
 0xa0b   :  { %6055 = shalt.err (!%p6052_p4)
}
 0xa0c   :  { %s6056_s0 = scalar_lea.hbm %s8292_s22, 32 }
 0xa0d   :  { %p6057_p5 = scmp.ne.s32.totalorder %s8292_s22, %s6056_s0  ;;  %p6060_p6 = scmp.lt.u32.totalorder %s6056_s0, %s8292_s22 }
 0xa0f   :  { %p6062_p7 = pnand %p6060_p6, %p6057_p5 }
 0xa11   :  { %6065 = shalt.err (!%p6062_p7)
}
 0xa12   :  { %4717 = dma.vmem_to_hbm [thread:$0]  %s4715_s2, 32, %s8292_s22, [#allocation5]  }
 0xa13   :  { %6082 = dma.done.wait [#allocation5], 32  }
 0xa14   :  { %6083 = vsyncadd [#allocation5], 4294967264 }
 0xa15   :  { %4721 = vsyncpa [#allocation4], 1 }
 0xa16   :  { %4722 = vsyncpa [#allocation7], 1 }
 0xa17   :  { %4723 = vsyncpa [#allocation10], 1 }
 0xa18   :  { %4724 = vsyncpa [#allocation13], 1 }
 0xa19   :  { %4725 = vsyncpa [#allocation16], 1 }
 0xa1a   :  { %4726 = vsyncpa [#allocation19], 1 }
 0xa1b   :  { %4727 = vsyncpa [#allocation22], 1 }
 0xa1c   :  { %4728 = vsyncpa [#allocation25], 1 }
 0xa1d   :  { %4729 = vsyncpa [#allocation5], 1 }

</bundles_post_ra>
